<compile_context>
chip_gen: v7x
topology: tpu7x:2x2x1
jax: 0.10.0
libtpu: 0.0.40
codegen_flags: <defaults>
</compile_context>

<pallas_src>
import functools

import jax
import jax.numpy as jnp
import numpy as np
from jax import lax
from jax.experimental import pallas as pl
from jax.experimental.pallas import tpu as pltpu


_VMEM_LIMIT = 48 * 1024 * 1024   # > default scoped limit (16/32 MiB), < v7x 64 MiB physical


# ----------------------------------------------------------------------------
# helpers
# ----------------------------------------------------------------------------
def _round_up(n, m):
    return ((n + m - 1) // m) * m


def _pad_gate_cols(w, H, Hp):
    """(..., 4H) -> (..., 4Hp): zero-pad each of the 4 gate column blocks H -> Hp."""
    if Hp == H:
        return w
    pads = [(0, 0)] * (w.ndim - 1) + [(0, Hp - H)]
    return jnp.concatenate(
        [jnp.pad(w[..., g * H:(g + 1) * H], pads) for g in range(4)], axis=-1)


def _pad_whh(whh, H, Hp):
    """(H, 4H) -> (Hp, 4Hp): per-gate column pad + zero rows for the padded hidden."""
    w = _pad_gate_cols(whh, H, Hp)
    if Hp != H:
        w = jnp.pad(w, ((0, Hp - H), (0, 0)))
    return w


def _pick_time_block(T, Bp, Hp, dsize, t_block, budget_bytes=24 << 20):
    """Largest Tb <= t_block whose double-buffered gin/out working set fits the budget."""
    Tb = max(1, min(t_block, T))

    def working_set(tb):
        gin = 2 * 2 * tb * Bp * 4 * Hp * dsize   # fwd + bwd gin halves, double-buffered
        out = 2 * 2 * tb * Bp * Hp * dsize       # fwd + bwd hidden outputs, double-buffered
        return gin + out

    while Tb > 1 and working_set(Tb) > budget_bytes:
        Tb //= 2
    return Tb


# ----------------------------------------------------------------------------
# Pallas kernels
# ----------------------------------------------------------------------------
def _matmul_bias_kernel(x_ref, w_ref, b_ref, o_ref):
    acc = jnp.dot(x_ref[...], w_ref[...], preferred_element_type=jnp.float32)
    o_ref[...] = (acc + b_ref[...]).astype(o_ref.dtype)


def _dual_matmul_bias_kernel(a_ref, b_ref, wa_ref, wb_ref, bias_ref, o_ref):
    # out = a @ wa + b @ wb + bias   (concat-free bidirectional Linear)
    acc = jnp.dot(a_ref[...], wa_ref[...], preferred_element_type=jnp.float32)
    acc = acc + jnp.dot(b_ref[...], wb_ref[...], preferred_element_type=jnp.float32)
    o_ref[...] = (acc + bias_ref[...]).astype(o_ref.dtype)


def _lstm_cell(gin, h, c, whh, Hp):
    """One LSTM cell update for one direction; all math in f32."""
    gates = gin + jnp.dot(h, whh, preferred_element_type=jnp.float32)
    i = jax.nn.sigmoid(gates[:, 0:Hp])
    f = jax.nn.sigmoid(gates[:, Hp:2 * Hp])
    g = jnp.tanh(gates[:, 2 * Hp:3 * Hp])
    o = jax.nn.sigmoid(gates[:, 3 * Hp:4 * Hp])
    c_new = f * c + i * g
    h_new = o * jnp.tanh(c_new)
    return h_new, c_new


def _bilstm_recurrent_kernel(ginf_ref, ginb_ref, whhf_ref, whhb_ref,
                             out_f_ref, out_b_ref,
                             hf_sc, cf_sc, hb_sc, cb_sc, *, unroll):
    """Processes Tb timesteps of BOTH directions per (sequential) grid step.

    ginf_ref : (Tb, Bp, 4Hp) fwd gate half of gin, block t          (fwd time order)
    ginb_ref : (Tb, Bp, 4Hp) bwd gate half of gin, block n_blk-1-t  (bwd time order)
    whh*_ref : (Hp, 4Hp) per-direction recurrent weights (f32)
    out_*    : (Tb, Bp, Hp) hidden streams (bwd written time-reversed via out_spec)
    *_sc     : (Bp, Hp) f32 VMEM state, persistent across grid steps
    """
    tg = pl.program_id(0)
    Tb = out_f_ref.shape[0]
    Hp = hf_sc.shape[1]

    @pl.when(tg == 0)
    def _():
        hf_sc[...] = jnp.zeros_like(hf_sc)
        cf_sc[...] = jnp.zeros_like(cf_sc)
        hb_sc[...] = jnp.zeros_like(hb_sc)
        cb_sc[...] = jnp.zeros_like(cb_sc)

    whh_f = whhf_ref[...]
    whh_b = whhb_ref[...]

    def step(k, carry):
        # forward direction: global time = tg*Tb + k
        gin_f = ginf_ref[k].astype(jnp.float32)
        hf, cf = _lstm_cell(gin_f, hf_sc[...], cf_sc[...], whh_f, Hp)
        hf_sc[...] = hf
        cf_sc[...] = cf
        out_f_ref[k] = hf.astype(out_f_ref.dtype)

        # backward direction: global time = T_pad - 1 - (tg*Tb + k)
        gin_b = ginb_ref[Tb - 1 - k].astype(jnp.float32)
        hb, cb = _lstm_cell(gin_b, hb_sc[...], cb_sc[...], whh_b, Hp)
        hb_sc[...] = hb
        cb_sc[...] = cb
        out_b_ref[Tb - 1 - k] = hb.astype(out_b_ref.dtype)
        return carry

    lax.fori_loop(0, Tb, step, 0, unroll=unroll)


# ----------------------------------------------------------------------------
# pallas_call wrappers
# ----------------------------------------------------------------------------
def _pallas_linear(x2d, w, b, out_dtype, *, rb=512, nb=512):
    """out = x2d @ w + b, row-tiled x N-tiled, f32 accumulation."""
    rows, K = x2d.shape
    N = w.shape[1]
    rb = min(rb, rows)
    nb = min(nb, N)
    grid = (pl.cdiv(rows, rb), pl.cdiv(N, nb))
    return pl.pallas_call(
        _matmul_bias_kernel,
        out_shape=jax.ShapeDtypeStruct((rows, N), out_dtype),
        grid_spec=pltpu.PrefetchScalarGridSpec(
            num_scalar_prefetch=0,
            grid=grid,
            in_specs=[
                pl.BlockSpec((rb, K), lambda i, j: (i, 0)),
                pl.BlockSpec((K, nb), lambda i, j: (0, j)),
                pl.BlockSpec((1, nb), lambda i, j: (0, j)),
            ],
            out_specs=pl.BlockSpec((rb, nb), lambda i, j: (i, j)),
        ),
        compiler_params=pltpu.CompilerParams(
            dimension_semantics=("parallel", "parallel"),
            vmem_limit_bytes=_VMEM_LIMIT),
    )(x2d, w, b)


def _pallas_dual_linear(a2d, b2d, wa, wb, bias, *, rb=512):
    """out = a2d @ wa + b2d @ wb + bias (concat-free bidirectional Linear)."""
    rows, K = a2d.shape
    N = wa.shape[1]
    rb = min(rb, rows)
    return pl.pallas_call(
        _dual_matmul_bias_kernel,
        out_shape=jax.ShapeDtypeStruct((rows, N), jnp.float32),
        grid_spec=pltpu.PrefetchScalarGridSpec(
            num_scalar_prefetch=0,
            grid=(pl.cdiv(rows, rb),),
            in_specs=[
                pl.BlockSpec((rb, K), lambda i: (i, 0)),
                pl.BlockSpec((rb, K), lambda i: (i, 0)),
                pl.BlockSpec((K, N), lambda i: (0, 0)),
                pl.BlockSpec((K, N), lambda i: (0, 0)),
                pl.BlockSpec((1, N), lambda i: (0, 0)),
            ],
            out_specs=pl.BlockSpec((rb, N), lambda i: (i, 0)),
        ),
        compiler_params=pltpu.CompilerParams(
            dimension_semantics=("parallel",),
            vmem_limit_bytes=_VMEM_LIMIT),
    )(a2d, b2d, wa, wb, bias)


def bidirectional_lstm_pallas(x, params, *, t_block=16, row_block=512,
                              compute_dtype=jnp.bfloat16):
    """x: (T, B, nIn) float32 -> (T, B, nOut) float32."""
    T, B, nIn = x.shape
    H = params["whh_f"].shape[0]
    nOut = params["w_emb"].shape[1]

    dsize = jnp.dtype(compute_dtype).itemsize
    sub = 16 if dsize == 2 else 8               # sublane packing of the storage dtype
    Bp = _round_up(B, sub)                      # padded batch rows are independent; sliced off
    Hp = _round_up(H, 128)                      # lane-aligned gate slices & hidden stores
    if Bp != B:
        x = jnp.pad(x, ((0, 0), (0, Bp - B), (0, 0)))

    # ---- weight prep: per-gate Hp padding, gin column layout [fwd 4Hp | bwd 4Hp] ----
    wih_cat = jnp.concatenate(
        [_pad_gate_cols(params["wih_f"], H, Hp),
         _pad_gate_cols(params["wih_b"], H, Hp)], axis=1).astype(compute_dtype)  # (nIn, 8Hp)
    b_cat = jnp.concatenate(
        [_pad_gate_cols(params["b_f"], H, Hp),
         _pad_gate_cols(params["b_b"], H, Hp)], axis=1).astype(jnp.float32)      # (1, 8Hp)
    # recurrent weights kept f32: they sit on the serial critical path and accumulate error
    whh_f = _pad_whh(params["whh_f"], H, Hp).astype(jnp.float32)                 # (Hp, 4Hp)
    whh_b = _pad_whh(params["whh_b"], H, Hp).astype(jnp.float32)                 # (Hp, 4Hp)

    # ---- 1) hoisted input projection: one bf16 GEMM for all T, both directions ----
    gin2d = _pallas_linear(x.reshape(T * Bp, nIn).astype(compute_dtype),
                           wih_cat, b_cat, compute_dtype, rb=row_block)
    gin = gin2d.reshape(T, Bp, 8 * Hp)

    # ---- 2) time-blocked bidirectional recurrence (Tb steps per sequential grid step) ----
    Tb = _pick_time_block(T, Bp, Hp, dsize, t_block)
    n_blk = (T + Tb - 1) // Tb
    T_pad = n_blk * Tb
    if T_pad != T:
        # Zero gin rows keep h = c = 0 through the padded steps, so the backward sweep
        # enters the real sequence with the correct zero initial state; padded forward
        # outputs are sliced off below.
        gin = jnp.pad(gin, ((0, T_pad - T), (0, 0), (0, 0)))

    unroll = True if Tb <= 8 else 4   # avoid vreg spills for large Tb / Hp
    kernel = functools.partial(_bilstm_recurrent_kernel, unroll=unroll)

    # TODO(synk): on v7x, split the batch (or the fwd/bwd directions) across the two
    # TensorCores via a leading "parallel" grid axis / pl.core_map; here the recurrence
    # runs on a single sequential "arbitrary" grid (optimal for 1-TC v5e/v6e).
    out_f, out_b = pl.pallas_call(
        kernel,
        out_shape=(jax.ShapeDtypeStruct((T_pad, Bp, Hp), compute_dtype),
                   jax.ShapeDtypeStruct((T_pad, Bp, Hp), compute_dtype)),
        grid_spec=pltpu.PrefetchScalarGridSpec(
            num_scalar_prefetch=0,
            grid=(n_blk,),
            in_specs=[
                # fwd gate half of gin, forward time order
                pl.BlockSpec((Tb, Bp, 4 * Hp), lambda t: (t, 0, 0)),
                # bwd gate half of gin, reversed time order (column block 1 = [4Hp:8Hp])
                pl.BlockSpec((Tb, Bp, 4 * Hp), lambda t: (n_blk - 1 - t, 0, 1)),
                pl.BlockSpec((Hp, 4 * Hp), lambda t: (0, 0)),   # whh_f
                pl.BlockSpec((Hp, 4 * Hp), lambda t: (0, 0)),   # whh_b
            ],
            out_specs=[
                pl.BlockSpec((Tb, Bp, Hp), lambda t: (t, 0, 0)),               # fwd hidden
                pl.BlockSpec((Tb, Bp, Hp), lambda t: (n_blk - 1 - t, 0, 0)),   # bwd hidden
            ],
            scratch_shapes=[pltpu.VMEM((Bp, Hp), jnp.float32)] * 4,   # h_f, c_f, h_b, c_b
        ),
        compiler_params=pltpu.CompilerParams(
            dimension_semantics=("arbitrary",),   # sequential recurrence over time blocks
            vmem_limit_bytes=_VMEM_LIMIT),
    )(gin, gin, whh_f, whh_b)

    # ---- 3) concat-free output Linear (split weight, lane-padded nOut) ----
    nOutP = _round_up(nOut, 128)
    w_top = jnp.pad(params["w_emb"][:H],
                    ((0, Hp - H), (0, nOutP - nOut))).astype(compute_dtype)
    w_bot = jnp.pad(params["w_emb"][H:],
                    ((0, Hp - H), (0, nOutP - nOut))).astype(compute_dtype)
    b_emb = jnp.pad(params["b_emb"], ((0, 0), (0, nOutP - nOut))).astype(jnp.float32)

    out2d = _pallas_dual_linear(
        out_f[:T].reshape(T * Bp, Hp), out_b[:T].reshape(T * Bp, Hp),
        w_top, w_bot, b_emb, rb=row_block)
    return out2d.reshape(T, Bp, nOutP)[:, :B, :nOut]


# ----------------------------------------------------------------------------
# Pure-JAX reference (matches PyTorch nn.LSTM / nn.Linear semantics)
# ----------------------------------------------------------------------------
def _lstm_dir_ref(x, wih, whh, b):
    T, B, _ = x.shape
    H = whh.shape[0]

    def step(carry, xt):
        h, c = carry
        gates = xt @ wih + h @ whh + b
        i, f, g, o = jnp.split(gates, 4, axis=-1)
        i = jax.nn.sigmoid(i)
        f = jax.nn.sigmoid(f)
        g = jnp.tanh(g)
        o = jax.nn.sigmoid(o)
        c = f * c + i * g
        h = o * jnp.tanh(c)
        return (h, c), h

    init = (jnp.zeros((B, H), jnp.float32), jnp.zeros((B, H), jnp.float32))
    _, hs = jax.lax.scan(step, init, x)
    return hs


def bidirectional_lstm_ref(x, params):
    T, B, _ = x.shape
    nOut = params["w_emb"].shape[1]
    fwd = _lstm_dir_ref(x, params["wih_f"], params["whh_f"], params["b_f"])
    bwd = _lstm_dir_ref(x[::-1], params["wih_b"], params["whh_b"], params["b_b"])[::-1]
    rec = jnp.concatenate([fwd, bwd], axis=-1)
    out = rec.reshape(T * B, -1) @ params["w_emb"] + params["b_emb"]
    return out.reshape(T, B, nOut)


# ----------------------------------------------------------------------------
# Deterministic parameter init (fan-in-uniform, like PyTorch defaults)
# ----------------------------------------------------------------------------
def init_params(key, nIn, nHidden, nOut):
    H = nHidden
    keys = jax.random.split(key, 8)
    s = 1.0 / np.sqrt(H)

    def u(k, shape):
        return jax.random.uniform(k, shape, jnp.float32, -s, s)

    s_emb = 1.0 / np.sqrt(2 * H)
    return {
        "wih_f": u(keys[0], (nIn, 4 * H)),
        "whh_f": u(keys[1], (H, 4 * H)),
        "b_f":   u(keys[2], (1, 4 * H)),   # b_ih + b_hh folded together
        "wih_b": u(keys[3], (nIn, 4 * H)),
        "whh_b": u(keys[4], (H, 4 * H)),
        "b_b":   u(keys[5], (1, 4 * H)),
        "w_emb": jax.random.uniform(keys[6], (2 * H, nOut), jnp.float32, -s_emb, s_emb),
        "b_emb": jax.random.uniform(keys[7], (1, nOut), jnp.float32, -s_emb, s_emb),
    }


# ----------------------------------------------------------------------------
if __name__ == "__main__":
    T, B, nIn, nHidden, nOut = 8, 2, 32, 32, 16

    key = jax.random.PRNGKey(0)
    kx, kp = jax.random.split(key)
    x = jax.random.normal(kx, (T, B, nIn), dtype=jnp.float32)
    params = init_params(kp, nIn, nHidden, nOut)

    run = jax.jit(bidirectional_lstm_pallas)
    out = jax.block_until_ready(run(x, params))
    ref = jax.block_until_ready(bidirectional_lstm_ref(x, params))
    # bf16 gin / GEMM operands -> relaxed tolerance vs. the f32 reference
    np.testing.assert_allclose(np.asarray(out), np.asarray(ref), rtol=2e-2, atol=2e-2)
    assert out.shape == (T, B, nOut)

    # second shape: odd T / B exercises the time-padding and batch-padding paths
    T2, B2 = 19, 3
    x2 = jax.random.normal(jax.random.PRNGKey(1), (T2, B2, nIn), dtype=jnp.float32)
    out2 = jax.block_until_ready(jax.jit(bidirectional_lstm_pallas)(x2, params))
    ref2 = bidirectional_lstm_ref(x2, params)
    np.testing.assert_allclose(np.asarray(out2), np.asarray(ref2), rtol=2e-2, atol=2e-2)
    assert out2.shape == (T2, B2, nOut)

    print("KERNEL_OK")
</pallas_src>

<mosaic_0001>
module attributes {stable_mosaic.version = 11 : i64} {
  func.func @_matmul_bias_kernel(%arg0: i32, %arg1: i32, %arg2: memref<128x32xbf16, #tpu.memory_space<vmem>>, %arg3: memref<32x512xbf16, #tpu.memory_space<vmem>>, %arg4: memref<1x512xf32, #tpu.memory_space<vmem>>, %arg5: memref<128x512xbf16, #tpu.memory_space<vmem>>) attributes {dimension_semantics = [#tpu.dimension_semantics<parallel>, #tpu.dimension_semantics<parallel>], iteration_bounds = array<i64: 1, 2>, scalar_prefetch = 0 : i64, scratch_operands = 0 : i64, tpu.core_type = #tpu.core_type<tc>, window_params = [{transform_indices = @transform_0, window_bounds = array<i64: 128, 32>}, {transform_indices = @transform_1, window_bounds = array<i64: 32, 512>}, {transform_indices = @transform_2, window_bounds = array<i64: 1, 512>}, {transform_indices = @transform_3, window_bounds = array<i64: 128, 512>}]} {
    %c0 = arith.constant 0 : index
    %c0_0 = arith.constant 0 : index
    %0 = vector.load %arg2[%c0, %c0_0] : memref<128x32xbf16, #tpu.memory_space<vmem>>, vector<128x32xbf16>
    %c0_1 = arith.constant 0 : index
    %c0_2 = arith.constant 0 : index
    %1 = vector.load %arg3[%c0_1, %c0_2] : memref<32x512xbf16, #tpu.memory_space<vmem>>, vector<32x512xbf16>
    %cst = arith.constant dense<0.000000e+00> : vector<128x512xf32>
    %2 = tpu.matmul %0, %1, %cst {dimension_numbers = #tpu.dot_dimension_numbers<[1], [0], [0], [1], [0, 0, 1, 1], [], []>} : vector<128x32xbf16>, vector<32x512xbf16>, vector<128x512xf32> -> vector<128x512xf32>
    %c0_3 = arith.constant 0 : index
    %c0_4 = arith.constant 0 : index
    %3 = vector.load %arg4[%c0_3, %c0_4] : memref<1x512xf32, #tpu.memory_space<vmem>>, vector<1x512xf32>
    %4 = vector.broadcast %3 : vector<1x512xf32> to vector<128x512xf32>
    %5 = arith.addf %2, %4 : vector<128x512xf32>
    %6 = arith.truncf %5 : vector<128x512xf32> to vector<128x512xbf16>
    %c0_5 = arith.constant 0 : index
    %c0_6 = arith.constant 0 : index
    %7 = vector.load %arg5[%c0_5, %c0_6] : memref<128x512xbf16, #tpu.memory_space<vmem>>, vector<128x512xbf16>
    tpu.vector_store %arg5[%c0_5, %c0_6], %6 {strides = array<i32>} : memref<128x512xbf16, #tpu.memory_space<vmem>>, vector<128x512xbf16>,
    return
  }
  func.func @transform_0(%arg0: i32, %arg1: i32) -> (i32, i32) {
    %c0_i32 = arith.constant 0 : i32
    %c0_i32_0 = arith.constant 0 : i32
    return %arg0, %c0_i32 : i32, i32
  }
  func.func @transform_1(%arg0: i32, %arg1: i32) -> (i32, i32) {
    %c0_i32 = arith.constant 0 : i32
    %c0_i32_0 = arith.constant 0 : i32
    return %c0_i32, %arg1 : i32, i32
  }
  func.func @transform_2(%arg0: i32, %arg1: i32) -> (i32, i32) {
    %c0_i32 = arith.constant 0 : i32
    %c0_i32_0 = arith.constant 0 : i32
    return %c0_i32, %arg1 : i32, i32
  }
  func.func @transform_3(%arg0: i32, %arg1: i32) -> (i32, i32) {
    %c0_i32 = arith.constant 0 : i32
    return %arg0, %arg1 : i32, i32
  }
}

module attributes {stable_mosaic.version = 11 : i64} {
  func.func @_bilstm_recurrent_kernel(%arg0: i32, %arg1: memref<8x16x512xbf16, #tpu.memory_space<vmem>>, %arg2: memref<8x16x512xbf16, #tpu.memory_space<vmem>>, %arg3: memref<128x512xf32, #tpu.memory_space<vmem>>, %arg4: memref<128x512xf32, #tpu.memory_space<vmem>>, %arg5: memref<8x16x128xbf16, #tpu.memory_space<vmem>>, %arg6: memref<8x16x128xbf16, #tpu.memory_space<vmem>>, %arg7: memref<16x128xf32, #tpu.memory_space<vmem>>, %arg8: memref<16x128xf32, #tpu.memory_space<vmem>>, %arg9: memref<16x128xf32, #tpu.memory_space<vmem>>, %arg10: memref<16x128xf32, #tpu.memory_space<vmem>>) attributes {dimension_semantics = [#tpu.dimension_semantics<arbitrary>], iteration_bounds = array<i64: 1>, scalar_prefetch = 0 : i64, scratch_operands = 4 : i64, tpu.core_type = #tpu.core_type<tc>, window_params = [{transform_indices = @transform_0, window_bounds = array<i64: 8, 16, 512>}, {transform_indices = @transform_1, window_bounds = array<i64: 8, 16, 512>}, {pipeline_mode = #tpu.pipeline_mode<synchronous>, transform_indices = @transform_2, window_bounds = array<i64: 128, 512>}, {pipeline_mode = #tpu.pipeline_mode<synchronous>, transform_indices = @transform_3, window_bounds = array<i64: 128, 512>}, {transform_indices = @transform_4, window_bounds = array<i64: 8, 16, 128>}, {transform_indices = @transform_5, window_bounds = array<i64: 8, 16, 128>}]} {
    %c0_i32 = arith.constant 0 : i32
    %0 = arith.cmpi eq, %arg0, %c0_i32 : i32
    %1 = arith.extui %0 : i1 to i32
    %c0_i32_0 = arith.constant 0 : i32
    %2 = arith.cmpi ne, %1, %c0_i32_0 : i32
    scf.if %2 {
      %cst_276 = arith.constant 0.000000e+00 : f32
      %661 = vector.broadcast %cst_276 : f32 to vector<16x128xf32>
      %c0_277 = arith.constant 0 : index
      %c0_278 = arith.constant 0 : index
      %662 = vector.load %arg7[%c0_277, %c0_278] : memref<16x128xf32, #tpu.memory_space<vmem>>, vector<16x128xf32>
      tpu.vector_store %arg7[%c0_277, %c0_278], %661 {strides = array<i32>} : memref<16x128xf32, #tpu.memory_space<vmem>>, vector<16x128xf32>,
      %cst_279 = arith.constant 0.000000e+00 : f32
      %663 = vector.broadcast %cst_279 : f32 to vector<16x128xf32>
      %c0_280 = arith.constant 0 : index
      %c0_281 = arith.constant 0 : index
      %664 = vector.load %arg8[%c0_280, %c0_281] : memref<16x128xf32, #tpu.memory_space<vmem>>, vector<16x128xf32>
      tpu.vector_store %arg8[%c0_280, %c0_281], %663 {strides = array<i32>} : memref<16x128xf32, #tpu.memory_space<vmem>>, vector<16x128xf32>,
      %cst_282 = arith.constant 0.000000e+00 : f32
      %665 = vector.broadcast %cst_282 : f32 to vector<16x128xf32>
      %c0_283 = arith.constant 0 : index
      %c0_284 = arith.constant 0 : index
      %666 = vector.load %arg9[%c0_283, %c0_284] : memref<16x128xf32, #tpu.memory_space<vmem>>, vector<16x128xf32>
      tpu.vector_store %arg9[%c0_283, %c0_284], %665 {strides = array<i32>} : memref<16x128xf32, #tpu.memory_space<vmem>>, vector<16x128xf32>,
      %cst_285 = arith.constant 0.000000e+00 : f32
      %667 = vector.broadcast %cst_285 : f32 to vector<16x128xf32>
      %c0_286 = arith.constant 0 : index
      %c0_287 = arith.constant 0 : index
      %668 = vector.load %arg10[%c0_286, %c0_287] : memref<16x128xf32, #tpu.memory_space<vmem>>, vector<16x128xf32>
      tpu.vector_store %arg10[%c0_286, %c0_287], %667 {strides = array<i32>} : memref<16x128xf32, #tpu.memory_space<vmem>>, vector<16x128xf32>,
    } else {
    }
    %c0 = arith.constant 0 : index
    %c0_1 = arith.constant 0 : index
    %3 = vector.load %arg3[%c0, %c0_1] : memref<128x512xf32, #tpu.memory_space<vmem>>, vector<128x512xf32>
    %c0_2 = arith.constant 0 : index
    %c0_3 = arith.constant 0 : index
    %4 = vector.load %arg4[%c0_2, %c0_3] : memref<128x512xf32, #tpu.memory_space<vmem>>, vector<128x512xf32>
    %c0_i32_4 = arith.constant 0 : i32
    %5 = arith.index_cast %c0_i32_4 : i32 to index
    %c0_5 = arith.constant 0 : index
    %c0_6 = arith.constant 0 : index
    %6 = vector.load %arg1[%5, %c0_5, %c0_6] : memref<8x16x512xbf16, #tpu.memory_space<vmem>>, vector<1x16x512xbf16>
    %7 = vector.shape_cast %6 : vector<1x16x512xbf16> to vector<16x512xbf16>
    %8 = arith.extf %7 : vector<16x512xbf16> to vector<16x512xf32>
    %c0_7 = arith.constant 0 : index
    %c0_8 = arith.constant 0 : index
    %9 = vector.load %arg7[%c0_7, %c0_8] : memref<16x128xf32, #tpu.memory_space<vmem>>, vector<16x128xf32>
    %c0_9 = arith.constant 0 : index
    %c0_10 = arith.constant 0 : index
    %10 = vector.load %arg8[%c0_9, %c0_10] : memref<16x128xf32, #tpu.memory_space<vmem>>, vector<16x128xf32>
    %cst = arith.constant dense<0.000000e+00> : vector<16x512xf32>
    %11 = tpu.matmul %9, %3, %cst {dimension_numbers = #tpu.dot_dimension_numbers<[1], [0], [0], [1], [0, 0, 1, 1], [], []>} : vector<16x128xf32>, vector<128x512xf32>, vector<16x512xf32> -> vector<16x512xf32>
    %12 = arith.addf %8, %11 : vector<16x512xf32>
    %13 = vector.extract_strided_slice %12 {offsets = [0, 0], sizes = [16, 128], strides = [1, 1]} : vector<16x512xf32> to vector<16x128xf32>
    %14 = arith.negf %13 : vector<16x128xf32>
    %15 = math.exp %14 : vector<16x128xf32>
    %cst_11 = arith.constant 1.000000e+00 : f32
    %16 = vector.broadcast %cst_11 : f32 to vector<16x128xf32>
    %17 = arith.addf %16, %15 : vector<16x128xf32>
    %18 = arith.divf %16, %17 : vector<16x128xf32>
    %19 = vector.extract_strided_slice %12 {offsets = [0, 128], sizes = [16, 128], strides = [1, 1]} : vector<16x512xf32> to vector<16x128xf32>
    %20 = arith.negf %19 : vector<16x128xf32>
    %21 = math.exp %20 : vector<16x128xf32>
    %cst_12 = arith.constant 1.000000e+00 : f32
    %22 = vector.broadcast %cst_12 : f32 to vector<16x128xf32>
    %23 = arith.addf %22, %21 : vector<16x128xf32>
    %24 = arith.divf %22, %23 : vector<16x128xf32>
    %25 = vector.extract_strided_slice %12 {offsets = [0, 256], sizes = [16, 128], strides = [1, 1]} : vector<16x512xf32> to vector<16x128xf32>
    %26 = math.tanh %25 : vector<16x128xf32>
    %27 = vector.extract_strided_slice %12 {offsets = [0, 384], sizes = [16, 128], strides = [1, 1]} : vector<16x512xf32> to vector<16x128xf32>
    %28 = arith.negf %27 : vector<16x128xf32>
    %29 = math.exp %28 : vector<16x128xf32>
    %cst_13 = arith.constant 1.000000e+00 : f32
    %30 = vector.broadcast %cst_13 : f32 to vector<16x128xf32>
    %31 = arith.addf %30, %29 : vector<16x128xf32>
    %32 = arith.divf %30, %31 : vector<16x128xf32>
    %33 = arith.mulf %24, %10 : vector<16x128xf32>
    %34 = arith.mulf %18, %26 : vector<16x128xf32>
    %35 = arith.addf %33, %34 : vector<16x128xf32>
    %36 = math.tanh %35 : vector<16x128xf32>
    %37 = arith.mulf %32, %36 : vector<16x128xf32>
    %c0_14 = arith.constant 0 : index
    %c0_15 = arith.constant 0 : index
    %38 = vector.load %arg7[%c0_14, %c0_15] : memref<16x128xf32, #tpu.memory_space<vmem>>, vector<16x128xf32>
    tpu.vector_store %arg7[%c0_14, %c0_15], %37 {strides = array<i32>} : memref<16x128xf32, #tpu.memory_space<vmem>>, vector<16x128xf32>,
    %c0_16 = arith.constant 0 : index
    %c0_17 = arith.constant 0 : index
    %39 = vector.load %arg8[%c0_16, %c0_17] : memref<16x128xf32, #tpu.memory_space<vmem>>, vector<16x128xf32>
    tpu.vector_store %arg8[%c0_16, %c0_17], %35 {strides = array<i32>} : memref<16x128xf32, #tpu.memory_space<vmem>>, vector<16x128xf32>,
    %40 = arith.truncf %37 : vector<16x128xf32> to vector<16x128xbf16>
    %41 = arith.index_cast %c0_i32_4 : i32 to index
    %c0_18 = arith.constant 0 : index
    %c0_19 = arith.constant 0 : index
    %42 = vector.load %arg5[%41, %c0_18, %c0_19] : memref<8x16x128xbf16, #tpu.memory_space<vmem>>, vector<1x16x128xbf16>
    %43 = vector.shape_cast %42 : vector<1x16x128xbf16> to vector<16x128xbf16>
    %44 = vector.shape_cast %40 : vector<16x128xbf16> to vector<1x16x128xbf16>
    tpu.vector_store %arg5[%41, %c0_18, %c0_19], %44 {strides = array<i32>} : memref<8x16x128xbf16, #tpu.memory_space<vmem>>, vector<1x16x128xbf16>,
    %c7_i32 = arith.constant 7 : i32
    %45 = arith.subi %c7_i32, %c0_i32_4 : i32
    %46 = arith.index_cast %45 : i32 to index
    %c0_20 = arith.constant 0 : index
    %c0_21 = arith.constant 0 : index
    %47 = vector.load %arg2[%46, %c0_20, %c0_21] : memref<8x16x512xbf16, #tpu.memory_space<vmem>>, vector<1x16x512xbf16>
    %48 = vector.shape_cast %47 : vector<1x16x512xbf16> to vector<16x512xbf16>
    %49 = arith.extf %48 : vector<16x512xbf16> to vector<16x512xf32>
    %c0_22 = arith.constant 0 : index
    %c0_23 = arith.constant 0 : index
    %50 = vector.load %arg9[%c0_22, %c0_23] : memref<16x128xf32, #tpu.memory_space<vmem>>, vector<16x128xf32>
    %c0_24 = arith.constant 0 : index
    %c0_25 = arith.constant 0 : index
    %51 = vector.load %arg10[%c0_24, %c0_25] : memref<16x128xf32, #tpu.memory_space<vmem>>, vector<16x128xf32>
    %cst_26 = arith.constant dense<0.000000e+00> : vector<16x512xf32>
    %52 = tpu.matmul %50, %4, %cst_26 {dimension_numbers = #tpu.dot_dimension_numbers<[1], [0], [0], [1], [0, 0, 1, 1], [], []>} : vector<16x128xf32>, vector<128x512xf32>, vector<16x512xf32> -> vector<16x512xf32>
    %53 = arith.addf %49, %52 : vector<16x512xf32>
    %54 = vector.extract_strided_slice %53 {offsets = [0, 0], sizes = [16, 128], strides = [1, 1]} : vector<16x512xf32> to vector<16x128xf32>
    %55 = arith.negf %54 : vector<16x128xf32>
    %56 = math.exp %55 : vector<16x128xf32>
    %cst_27 = arith.constant 1.000000e+00 : f32
    %57 = vector.broadcast %cst_27 : f32 to vector<16x128xf32>
    %58 = arith.addf %57, %56 : vector<16x128xf32>
    %59 = arith.divf %57, %58 : vector<16x128xf32>
    %60 = vector.extract_strided_slice %53 {offsets = [0, 128], sizes = [16, 128], strides = [1, 1]} : vector<16x512xf32> to vector<16x128xf32>
    %61 = arith.negf %60 : vector<16x128xf32>
    %62 = math.exp %61 : vector<16x128xf32>
    %cst_28 = arith.constant 1.000000e+00 : f32
    %63 = vector.broadcast %cst_28 : f32 to vector<16x128xf32>
    %64 = arith.addf %63, %62 : vector<16x128xf32>
    %65 = arith.divf %63, %64 : vector<16x128xf32>
    %66 = vector.extract_strided_slice %53 {offsets = [0, 256], sizes = [16, 128], strides = [1, 1]} : vector<16x512xf32> to vector<16x128xf32>
    %67 = math.tanh %66 : vector<16x128xf32>
    %68 = vector.extract_strided_slice %53 {offsets = [0, 384], sizes = [16, 128], strides = [1, 1]} : vector<16x512xf32> to vector<16x128xf32>
    %69 = arith.negf %68 : vector<16x128xf32>
    %70 = math.exp %69 : vector<16x128xf32>
    %cst_29 = arith.constant 1.000000e+00 : f32
    %71 = vector.broadcast %cst_29 : f32 to vector<16x128xf32>
    %72 = arith.addf %71, %70 : vector<16x128xf32>
    %73 = arith.divf %71, %72 : vector<16x128xf32>
    %74 = arith.mulf %65, %51 : vector<16x128xf32>
    %75 = arith.mulf %59, %67 : vector<16x128xf32>
    %76 = arith.addf %74, %75 : vector<16x128xf32>
    %77 = math.tanh %76 : vector<16x128xf32>
    %78 = arith.mulf %73, %77 : vector<16x128xf32>
    %c0_30 = arith.constant 0 : index
    %c0_31 = arith.constant 0 : index
    %79 = vector.load %arg9[%c0_30, %c0_31] : memref<16x128xf32, #tpu.memory_space<vmem>>, vector<16x128xf32>
    tpu.vector_store %arg9[%c0_30, %c0_31], %78 {strides = array<i32>} : memref<16x128xf32, #tpu.memory_space<vmem>>, vector<16x128xf32>,
    %c0_32 = arith.constant 0 : index
    %c0_33 = arith.constant 0 : index
    %80 = vector.load %arg10[%c0_32, %c0_33] : memref<16x128xf32, #tpu.memory_space<vmem>>, vector<16x128xf32>
    tpu.vector_store %arg10[%c0_32, %c0_33], %76 {strides = array<i32>} : memref<16x128xf32, #tpu.memory_space<vmem>>, vector<16x128xf32>,
    %81 = arith.truncf %78 : vector<16x128xf32> to vector<16x128xbf16>
    %c7_i32_34 = arith.constant 7 : i32
    %82 = arith.subi %c7_i32_34, %c0_i32_4 : i32
    %83 = arith.index_cast %82 : i32 to index
    %c0_35 = arith.constant 0 : index
    %c0_36 = arith.constant 0 : index
    %84 = vector.load %arg6[%83, %c0_35, %c0_36] : memref<8x16x128xbf16, #tpu.memory_space<vmem>>, vector<1x16x128xbf16>
    %85 = vector.shape_cast %84 : vector<1x16x128xbf16> to vector<16x128xbf16>
    %86 = vector.shape_cast %81 : vector<16x128xbf16> to vector<1x16x128xbf16>
    tpu.vector_store %arg6[%83, %c0_35, %c0_36], %86 {strides = array<i32>} : memref<8x16x128xbf16, #tpu.memory_space<vmem>>, vector<1x16x128xbf16>,
    %c1_i32 = arith.constant 1 : i32
    %87 = arith.index_cast %c1_i32 : i32 to index
    %c0_37 = arith.constant 0 : index
    %c0_38 = arith.constant 0 : index
    %88 = vector.load %arg1[%87, %c0_37, %c0_38] : memref<8x16x512xbf16, #tpu.memory_space<vmem>>, vector<1x16x512xbf16>
    %89 = vector.shape_cast %88 : vector<1x16x512xbf16> to vector<16x512xbf16>
    %90 = arith.extf %89 : vector<16x512xbf16> to vector<16x512xf32>
    %c0_39 = arith.constant 0 : index
    %c0_40 = arith.constant 0 : index
    %91 = vector.load %arg7[%c0_39, %c0_40] : memref<16x128xf32, #tpu.memory_space<vmem>>, vector<16x128xf32>
    %c0_41 = arith.constant 0 : index
    %c0_42 = arith.constant 0 : index
    %92 = vector.load %arg8[%c0_41, %c0_42] : memref<16x128xf32, #tpu.memory_space<vmem>>, vector<16x128xf32>
    %cst_43 = arith.constant dense<0.000000e+00> : vector<16x512xf32>
    %93 = tpu.matmul %91, %3, %cst_43 {dimension_numbers = #tpu.dot_dimension_numbers<[1], [0], [0], [1], [0, 0, 1, 1], [], []>} : vector<16x128xf32>, vector<128x512xf32>, vector<16x512xf32> -> vector<16x512xf32>
    %94 = arith.addf %90, %93 : vector<16x512xf32>
    %95 = vector.extract_strided_slice %94 {offsets = [0, 0], sizes = [16, 128], strides = [1, 1]} : vector<16x512xf32> to vector<16x128xf32>
    %96 = arith.negf %95 : vector<16x128xf32>
    %97 = math.exp %96 : vector<16x128xf32>
    %cst_44 = arith.constant 1.000000e+00 : f32
    %98 = vector.broadcast %cst_44 : f32 to vector<16x128xf32>
    %99 = arith.addf %98, %97 : vector<16x128xf32>
    %100 = arith.divf %98, %99 : vector<16x128xf32>
    %101 = vector.extract_strided_slice %94 {offsets = [0, 128], sizes = [16, 128], strides = [1, 1]} : vector<16x512xf32> to vector<16x128xf32>
    %102 = arith.negf %101 : vector<16x128xf32>
    %103 = math.exp %102 : vector<16x128xf32>
    %cst_45 = arith.constant 1.000000e+00 : f32
    %104 = vector.broadcast %cst_45 : f32 to vector<16x128xf32>
    %105 = arith.addf %104, %103 : vector<16x128xf32>
    %106 = arith.divf %104, %105 : vector<16x128xf32>
    %107 = vector.extract_strided_slice %94 {offsets = [0, 256], sizes = [16, 128], strides = [1, 1]} : vector<16x512xf32> to vector<16x128xf32>
    %108 = math.tanh %107 : vector<16x128xf32>
    %109 = vector.extract_strided_slice %94 {offsets = [0, 384], sizes = [16, 128], strides = [1, 1]} : vector<16x512xf32> to vector<16x128xf32>
    %110 = arith.negf %109 : vector<16x128xf32>
    %111 = math.exp %110 : vector<16x128xf32>
    %cst_46 = arith.constant 1.000000e+00 : f32
    %112 = vector.broadcast %cst_46 : f32 to vector<16x128xf32>
    %113 = arith.addf %112, %111 : vector<16x128xf32>
    %114 = arith.divf %112, %113 : vector<16x128xf32>
    %115 = arith.mulf %106, %92 : vector<16x128xf32>
    %116 = arith.mulf %100, %108 : vector<16x128xf32>
    %117 = arith.addf %115, %116 : vector<16x128xf32>
    %118 = math.tanh %117 : vector<16x128xf32>
    %119 = arith.mulf %114, %118 : vector<16x128xf32>
    %c0_47 = arith.constant 0 : index
    %c0_48 = arith.constant 0 : index
    %120 = vector.load %arg7[%c0_47, %c0_48] : memref<16x128xf32, #tpu.memory_space<vmem>>, vector<16x128xf32>
    tpu.vector_store %arg7[%c0_47, %c0_48], %119 {strides = array<i32>} : memref<16x128xf32, #tpu.memory_space<vmem>>, vector<16x128xf32>,
    %c0_49 = arith.constant 0 : index
    %c0_50 = arith.constant 0 : index
    %121 = vector.load %arg8[%c0_49, %c0_50] : memref<16x128xf32, #tpu.memory_space<vmem>>, vector<16x128xf32>
    tpu.vector_store %arg8[%c0_49, %c0_50], %117 {strides = array<i32>} : memref<16x128xf32, #tpu.memory_space<vmem>>, vector<16x128xf32>,
    %122 = arith.truncf %119 : vector<16x128xf32> to vector<16x128xbf16>
    %123 = arith.index_cast %c1_i32 : i32 to index
    %c0_51 = arith.constant 0 : index
    %c0_52 = arith.constant 0 : index
    %124 = vector.load %arg5[%123, %c0_51, %c0_52] : memref<8x16x128xbf16, #tpu.memory_space<vmem>>, vector<1x16x128xbf16>
    %125 = vector.shape_cast %124 : vector<1x16x128xbf16> to vector<16x128xbf16>
    %126 = vector.shape_cast %122 : vector<16x128xbf16> to vector<1x16x128xbf16>
    tpu.vector_store %arg5[%123, %c0_51, %c0_52], %126 {strides = array<i32>} : memref<8x16x128xbf16, #tpu.memory_space<vmem>>, vector<1x16x128xbf16>,
    %c7_i32_53 = arith.constant 7 : i32
    %127 = arith.subi %c7_i32_53, %c1_i32 : i32
    %128 = arith.index_cast %127 : i32 to index
    %c0_54 = arith.constant 0 : index
    %c0_55 = arith.constant 0 : index
    %129 = vector.load %arg2[%128, %c0_54, %c0_55] : memref<8x16x512xbf16, #tpu.memory_space<vmem>>, vector<1x16x512xbf16>
    %130 = vector.shape_cast %129 : vector<1x16x512xbf16> to vector<16x512xbf16>
    %131 = arith.extf %130 : vector<16x512xbf16> to vector<16x512xf32>
    %c0_56 = arith.constant 0 : index
    %c0_57 = arith.constant 0 : index
    %132 = vector.load %arg9[%c0_56, %c0_57] : memref<16x128xf32, #tpu.memory_space<vmem>>, vector<16x128xf32>
    %c0_58 = arith.constant 0 : index
    %c0_59 = arith.constant 0 : index
    %133 = vector.load %arg10[%c0_58, %c0_59] : memref<16x128xf32, #tpu.memory_space<vmem>>, vector<16x128xf32>
    %cst_60 = arith.constant dense<0.000000e+00> : vector<16x512xf32>
    %134 = tpu.matmul %132, %4, %cst_60 {dimension_numbers = #tpu.dot_dimension_numbers<[1], [0], [0], [1], [0, 0, 1, 1], [], []>} : vector<16x128xf32>, vector<128x512xf32>, vector<16x512xf32> -> vector<16x512xf32>
    %135 = arith.addf %131, %134 : vector<16x512xf32>
    %136 = vector.extract_strided_slice %135 {offsets = [0, 0], sizes = [16, 128], strides = [1, 1]} : vector<16x512xf32> to vector<16x128xf32>
    %137 = arith.negf %136 : vector<16x128xf32>
    %138 = math.exp %137 : vector<16x128xf32>
    %cst_61 = arith.constant 1.000000e+00 : f32
    %139 = vector.broadcast %cst_61 : f32 to vector<16x128xf32>
    %140 = arith.addf %139, %138 : vector<16x128xf32>
    %141 = arith.divf %139, %140 : vector<16x128xf32>
    %142 = vector.extract_strided_slice %135 {offsets = [0, 128], sizes = [16, 128], strides = [1, 1]} : vector<16x512xf32> to vector<16x128xf32>
    %143 = arith.negf %142 : vector<16x128xf32>
    %144 = math.exp %143 : vector<16x128xf32>
    %cst_62 = arith.constant 1.000000e+00 : f32
    %145 = vector.broadcast %cst_62 : f32 to vector<16x128xf32>
    %146 = arith.addf %145, %144 : vector<16x128xf32>
    %147 = arith.divf %145, %146 : vector<16x128xf32>
    %148 = vector.extract_strided_slice %135 {offsets = [0, 256], sizes = [16, 128], strides = [1, 1]} : vector<16x512xf32> to vector<16x128xf32>
    %149 = math.tanh %148 : vector<16x128xf32>
    %150 = vector.extract_strided_slice %135 {offsets = [0, 384], sizes = [16, 128], strides = [1, 1]} : vector<16x512xf32> to vector<16x128xf32>
    %151 = arith.negf %150 : vector<16x128xf32>
    %152 = math.exp %151 : vector<16x128xf32>
    %cst_63 = arith.constant 1.000000e+00 : f32
    %153 = vector.broadcast %cst_63 : f32 to vector<16x128xf32>
    %154 = arith.addf %153, %152 : vector<16x128xf32>
    %155 = arith.divf %153, %154 : vector<16x128xf32>
    %156 = arith.mulf %147, %133 : vector<16x128xf32>
    %157 = arith.mulf %141, %149 : vector<16x128xf32>
    %158 = arith.addf %156, %157 : vector<16x128xf32>
    %159 = math.tanh %158 : vector<16x128xf32>
    %160 = arith.mulf %155, %159 : vector<16x128xf32>
    %c0_64 = arith.constant 0 : index
    %c0_65 = arith.constant 0 : index
    %161 = vector.load %arg9[%c0_64, %c0_65] : memref<16x128xf32, #tpu.memory_space<vmem>>, vector<16x128xf32>
    tpu.vector_store %arg9[%c0_64, %c0_65], %160 {strides = array<i32>} : memref<16x128xf32, #tpu.memory_space<vmem>>, vector<16x128xf32>,
    %c0_66 = arith.constant 0 : index
    %c0_67 = arith.constant 0 : index
    %162 = vector.load %arg10[%c0_66, %c0_67] : memref<16x128xf32, #tpu.memory_space<vmem>>, vector<16x128xf32>
    tpu.vector_store %arg10[%c0_66, %c0_67], %158 {strides = array<i32>} : memref<16x128xf32, #tpu.memory_space<vmem>>, vector<16x128xf32>,
    %163 = arith.truncf %160 : vector<16x128xf32> to vector<16x128xbf16>
    %c7_i32_68 = arith.constant 7 : i32
    %164 = arith.subi %c7_i32_68, %c1_i32 : i32
    %165 = arith.index_cast %164 : i32 to index
    %c0_69 = arith.constant 0 : index
    %c0_70 = arith.constant 0 : index
    %166 = vector.load %arg6[%165, %c0_69, %c0_70] : memref<8x16x128xbf16, #tpu.memory_space<vmem>>, vector<1x16x128xbf16>
    %167 = vector.shape_cast %166 : vector<1x16x128xbf16> to vector<16x128xbf16>
    %168 = vector.shape_cast %163 : vector<16x128xbf16> to vector<1x16x128xbf16>
    tpu.vector_store %arg6[%165, %c0_69, %c0_70], %168 {strides = array<i32>} : memref<8x16x128xbf16, #tpu.memory_space<vmem>>, vector<1x16x128xbf16>,
    %c2_i32 = arith.constant 2 : i32
    %169 = arith.index_cast %c2_i32 : i32 to index
    %c0_71 = arith.constant 0 : index
    %c0_72 = arith.constant 0 : index
    %170 = vector.load %arg1[%169, %c0_71, %c0_72] : memref<8x16x512xbf16, #tpu.memory_space<vmem>>, vector<1x16x512xbf16>
    %171 = vector.shape_cast %170 : vector<1x16x512xbf16> to vector<16x512xbf16>
    %172 = arith.extf %171 : vector<16x512xbf16> to vector<16x512xf32>
    %c0_73 = arith.constant 0 : index
    %c0_74 = arith.constant 0 : index
    %173 = vector.load %arg7[%c0_73, %c0_74] : memref<16x128xf32, #tpu.memory_space<vmem>>, vector<16x128xf32>
    %c0_75 = arith.constant 0 : index
    %c0_76 = arith.constant 0 : index
    %174 = vector.load %arg8[%c0_75, %c0_76] : memref<16x128xf32, #tpu.memory_space<vmem>>, vector<16x128xf32>
    %cst_77 = arith.constant dense<0.000000e+00> : vector<16x512xf32>
    %175 = tpu.matmul %173, %3, %cst_77 {dimension_numbers = #tpu.dot_dimension_numbers<[1], [0], [0], [1], [0, 0, 1, 1], [], []>} : vector<16x128xf32>, vector<128x512xf32>, vector<16x512xf32> -> vector<16x512xf32>
    %176 = arith.addf %172, %175 : vector<16x512xf32>
    %177 = vector.extract_strided_slice %176 {offsets = [0, 0], sizes = [16, 128], strides = [1, 1]} : vector<16x512xf32> to vector<16x128xf32>
    %178 = arith.negf %177 : vector<16x128xf32>
    %179 = math.exp %178 : vector<16x128xf32>
    %cst_78 = arith.constant 1.000000e+00 : f32
    %180 = vector.broadcast %cst_78 : f32 to vector<16x128xf32>
    %181 = arith.addf %180, %179 : vector<16x128xf32>
    %182 = arith.divf %180, %181 : vector<16x128xf32>
    %183 = vector.extract_strided_slice %176 {offsets = [0, 128], sizes = [16, 128], strides = [1, 1]} : vector<16x512xf32> to vector<16x128xf32>
    %184 = arith.negf %183 : vector<16x128xf32>
    %185 = math.exp %184 : vector<16x128xf32>
    %cst_79 = arith.constant 1.000000e+00 : f32
    %186 = vector.broadcast %cst_79 : f32 to vector<16x128xf32>
    %187 = arith.addf %186, %185 : vector<16x128xf32>
    %188 = arith.divf %186, %187 : vector<16x128xf32>
    %189 = vector.extract_strided_slice %176 {offsets = [0, 256], sizes = [16, 128], strides = [1, 1]} : vector<16x512xf32> to vector<16x128xf32>
    %190 = math.tanh %189 : vector<16x128xf32>
    %191 = vector.extract_strided_slice %176 {offsets = [0, 384], sizes = [16, 128], strides = [1, 1]} : vector<16x512xf32> to vector<16x128xf32>
    %192 = arith.negf %191 : vector<16x128xf32>
    %193 = math.exp %192 : vector<16x128xf32>
    %cst_80 = arith.constant 1.000000e+00 : f32
    %194 = vector.broadcast %cst_80 : f32 to vector<16x128xf32>
    %195 = arith.addf %194, %193 : vector<16x128xf32>
    %196 = arith.divf %194, %195 : vector<16x128xf32>
    %197 = arith.mulf %188, %174 : vector<16x128xf32>
    %198 = arith.mulf %182, %190 : vector<16x128xf32>
    %199 = arith.addf %197, %198 : vector<16x128xf32>
    %200 = math.tanh %199 : vector<16x128xf32>
    %201 = arith.mulf %196, %200 : vector<16x128xf32>
    %c0_81 = arith.constant 0 : index
    %c0_82 = arith.constant 0 : index
    %202 = vector.load %arg7[%c0_81, %c0_82] : memref<16x128xf32, #tpu.memory_space<vmem>>, vector<16x128xf32>
    tpu.vector_store %arg7[%c0_81, %c0_82], %201 {strides = array<i32>} : memref<16x128xf32, #tpu.memory_space<vmem>>, vector<16x128xf32>,
    %c0_83 = arith.constant 0 : index
    %c0_84 = arith.constant 0 : index
    %203 = vector.load %arg8[%c0_83, %c0_84] : memref<16x128xf32, #tpu.memory_space<vmem>>, vector<16x128xf32>
    tpu.vector_store %arg8[%c0_83, %c0_84], %199 {strides = array<i32>} : memref<16x128xf32, #tpu.memory_space<vmem>>, vector<16x128xf32>,
    %204 = arith.truncf %201 : vector<16x128xf32> to vector<16x128xbf16>
    %205 = arith.index_cast %c2_i32 : i32 to index
    %c0_85 = arith.constant 0 : index
    %c0_86 = arith.constant 0 : index
    %206 = vector.load %arg5[%205, %c0_85, %c0_86] : memref<8x16x128xbf16, #tpu.memory_space<vmem>>, vector<1x16x128xbf16>
    %207 = vector.shape_cast %206 : vector<1x16x128xbf16> to vector<16x128xbf16>
    %208 = vector.shape_cast %204 : vector<16x128xbf16> to vector<1x16x128xbf16>
    tpu.vector_store %arg5[%205, %c0_85, %c0_86], %208 {strides = array<i32>} : memref<8x16x128xbf16, #tpu.memory_space<vmem>>, vector<1x16x128xbf16>,
    %c7_i32_87 = arith.constant 7 : i32
    %209 = arith.subi %c7_i32_87, %c2_i32 : i32
    %210 = arith.index_cast %209 : i32 to index
    %c0_88 = arith.constant 0 : index
    %c0_89 = arith.constant 0 : index
    %211 = vector.load %arg2[%210, %c0_88, %c0_89] : memref<8x16x512xbf16, #tpu.memory_space<vmem>>, vector<1x16x512xbf16>
    %212 = vector.shape_cast %211 : vector<1x16x512xbf16> to vector<16x512xbf16>
    %213 = arith.extf %212 : vector<16x512xbf16> to vector<16x512xf32>
    %c0_90 = arith.constant 0 : index
    %c0_91 = arith.constant 0 : index
    %214 = vector.load %arg9[%c0_90, %c0_91] : memref<16x128xf32, #tpu.memory_space<vmem>>, vector<16x128xf32>
    %c0_92 = arith.constant 0 : index
    %c0_93 = arith.constant 0 : index
    %215 = vector.load %arg10[%c0_92, %c0_93] : memref<16x128xf32, #tpu.memory_space<vmem>>, vector<16x128xf32>
    %cst_94 = arith.constant dense<0.000000e+00> : vector<16x512xf32>
    %216 = tpu.matmul %214, %4, %cst_94 {dimension_numbers = #tpu.dot_dimension_numbers<[1], [0], [0], [1], [0, 0, 1, 1], [], []>} : vector<16x128xf32>, vector<128x512xf32>, vector<16x512xf32> -> vector<16x512xf32>
    %217 = arith.addf %213, %216 : vector<16x512xf32>
    %218 = vector.extract_strided_slice %217 {offsets = [0, 0], sizes = [16, 128], strides = [1, 1]} : vector<16x512xf32> to vector<16x128xf32>
    %219 = arith.negf %218 : vector<16x128xf32>
    %220 = math.exp %219 : vector<16x128xf32>
    %cst_95 = arith.constant 1.000000e+00 : f32
    %221 = vector.broadcast %cst_95 : f32 to vector<16x128xf32>
    %222 = arith.addf %221, %220 : vector<16x128xf32>
    %223 = arith.divf %221, %222 : vector<16x128xf32>
    %224 = vector.extract_strided_slice %217 {offsets = [0, 128], sizes = [16, 128], strides = [1, 1]} : vector<16x512xf32> to vector<16x128xf32>
    %225 = arith.negf %224 : vector<16x128xf32>
    %226 = math.exp %225 : vector<16x128xf32>
    %cst_96 = arith.constant 1.000000e+00 : f32
    %227 = vector.broadcast %cst_96 : f32 to vector<16x128xf32>
    %228 = arith.addf %227, %226 : vector<16x128xf32>
    %229 = arith.divf %227, %228 : vector<16x128xf32>
    %230 = vector.extract_strided_slice %217 {offsets = [0, 256], sizes = [16, 128], strides = [1, 1]} : vector<16x512xf32> to vector<16x128xf32>
    %231 = math.tanh %230 : vector<16x128xf32>
    %232 = vector.extract_strided_slice %217 {offsets = [0, 384], sizes = [16, 128], strides = [1, 1]} : vector<16x512xf32> to vector<16x128xf32>
    %233 = arith.negf %232 : vector<16x128xf32>
    %234 = math.exp %233 : vector<16x128xf32>
    %cst_97 = arith.constant 1.000000e+00 : f32
    %235 = vector.broadcast %cst_97 : f32 to vector<16x128xf32>
    %236 = arith.addf %235, %234 : vector<16x128xf32>
    %237 = arith.divf %235, %236 : vector<16x128xf32>
    %238 = arith.mulf %229, %215 : vector<16x128xf32>
    %239 = arith.mulf %223, %231 : vector<16x128xf32>
    %240 = arith.addf %238, %239 : vector<16x128xf32>
    %241 = math.tanh %240 : vector<16x128xf32>
    %242 = arith.mulf %237, %241 : vector<16x128xf32>
    %c0_98 = arith.constant 0 : index
    %c0_99 = arith.constant 0 : index
    %243 = vector.load %arg9[%c0_98, %c0_99] : memref<16x128xf32, #tpu.memory_space<vmem>>, vector<16x128xf32>
    tpu.vector_store %arg9[%c0_98, %c0_99], %242 {strides = array<i32>} : memref<16x128xf32, #tpu.memory_space<vmem>>, vector<16x128xf32>,
    %c0_100 = arith.constant 0 : index
    %c0_101 = arith.constant 0 : index
    %244 = vector.load %arg10[%c0_100, %c0_101] : memref<16x128xf32, #tpu.memory_space<vmem>>, vector<16x128xf32>
    tpu.vector_store %arg10[%c0_100, %c0_101], %240 {strides = array<i32>} : memref<16x128xf32, #tpu.memory_space<vmem>>, vector<16x128xf32>,
    %245 = arith.truncf %242 : vector<16x128xf32> to vector<16x128xbf16>
    %c7_i32_102 = arith.constant 7 : i32
    %246 = arith.subi %c7_i32_102, %c2_i32 : i32
    %247 = arith.index_cast %246 : i32 to index
    %c0_103 = arith.constant 0 : index
    %c0_104 = arith.constant 0 : index
    %248 = vector.load %arg6[%247, %c0_103, %c0_104] : memref<8x16x128xbf16, #tpu.memory_space<vmem>>, vector<1x16x128xbf16>
    %249 = vector.shape_cast %248 : vector<1x16x128xbf16> to vector<16x128xbf16>
    %250 = vector.shape_cast %245 : vector<16x128xbf16> to vector<1x16x128xbf16>
    tpu.vector_store %arg6[%247, %c0_103, %c0_104], %250 {strides = array<i32>} : memref<8x16x128xbf16, #tpu.memory_space<vmem>>, vector<1x16x128xbf16>,
    %c3_i32 = arith.constant 3 : i32
    %251 = arith.index_cast %c3_i32 : i32 to index
    %c0_105 = arith.constant 0 : index
    %c0_106 = arith.constant 0 : index
    %252 = vector.load %arg1[%251, %c0_105, %c0_106] : memref<8x16x512xbf16, #tpu.memory_space<vmem>>, vector<1x16x512xbf16>
    %253 = vector.shape_cast %252 : vector<1x16x512xbf16> to vector<16x512xbf16>
    %254 = arith.extf %253 : vector<16x512xbf16> to vector<16x512xf32>
    %c0_107 = arith.constant 0 : index
    %c0_108 = arith.constant 0 : index
    %255 = vector.load %arg7[%c0_107, %c0_108] : memref<16x128xf32, #tpu.memory_space<vmem>>, vector<16x128xf32>
    %c0_109 = arith.constant 0 : index
    %c0_110 = arith.constant 0 : index
    %256 = vector.load %arg8[%c0_109, %c0_110] : memref<16x128xf32, #tpu.memory_space<vmem>>, vector<16x128xf32>
    %cst_111 = arith.constant dense<0.000000e+00> : vector<16x512xf32>
    %257 = tpu.matmul %255, %3, %cst_111 {dimension_numbers = #tpu.dot_dimension_numbers<[1], [0], [0], [1], [0, 0, 1, 1], [], []>} : vector<16x128xf32>, vector<128x512xf32>, vector<16x512xf32> -> vector<16x512xf32>
    %258 = arith.addf %254, %257 : vector<16x512xf32>
    %259 = vector.extract_strided_slice %258 {offsets = [0, 0], sizes = [16, 128], strides = [1, 1]} : vector<16x512xf32> to vector<16x128xf32>
    %260 = arith.negf %259 : vector<16x128xf32>
    %261 = math.exp %260 : vector<16x128xf32>
    %cst_112 = arith.constant 1.000000e+00 : f32
    %262 = vector.broadcast %cst_112 : f32 to vector<16x128xf32>
    %263 = arith.addf %262, %261 : vector<16x128xf32>
    %264 = arith.divf %262, %263 : vector<16x128xf32>
    %265 = vector.extract_strided_slice %258 {offsets = [0, 128], sizes = [16, 128], strides = [1, 1]} : vector<16x512xf32> to vector<16x128xf32>
    %266 = arith.negf %265 : vector<16x128xf32>
    %267 = math.exp %266 : vector<16x128xf32>
    %cst_113 = arith.constant 1.000000e+00 : f32
    %268 = vector.broadcast %cst_113 : f32 to vector<16x128xf32>
    %269 = arith.addf %268, %267 : vector<16x128xf32>
    %270 = arith.divf %268, %269 : vector<16x128xf32>
    %271 = vector.extract_strided_slice %258 {offsets = [0, 256], sizes = [16, 128], strides = [1, 1]} : vector<16x512xf32> to vector<16x128xf32>
    %272 = math.tanh %271 : vector<16x128xf32>
    %273 = vector.extract_strided_slice %258 {offsets = [0, 384], sizes = [16, 128], strides = [1, 1]} : vector<16x512xf32> to vector<16x128xf32>
    %274 = arith.negf %273 : vector<16x128xf32>
    %275 = math.exp %274 : vector<16x128xf32>
    %cst_114 = arith.constant 1.000000e+00 : f32
    %276 = vector.broadcast %cst_114 : f32 to vector<16x128xf32>
    %277 = arith.addf %276, %275 : vector<16x128xf32>
    %278 = arith.divf %276, %277 : vector<16x128xf32>
    %279 = arith.mulf %270, %256 : vector<16x128xf32>
    %280 = arith.mulf %264, %272 : vector<16x128xf32>
    %281 = arith.addf %279, %280 : vector<16x128xf32>
    %282 = math.tanh %281 : vector<16x128xf32>
    %283 = arith.mulf %278, %282 : vector<16x128xf32>
    %c0_115 = arith.constant 0 : index
    %c0_116 = arith.constant 0 : index
    %284 = vector.load %arg7[%c0_115, %c0_116] : memref<16x128xf32, #tpu.memory_space<vmem>>, vector<16x128xf32>
    tpu.vector_store %arg7[%c0_115, %c0_116], %283 {strides = array<i32>} : memref<16x128xf32, #tpu.memory_space<vmem>>, vector<16x128xf32>,
    %c0_117 = arith.constant 0 : index
    %c0_118 = arith.constant 0 : index
    %285 = vector.load %arg8[%c0_117, %c0_118] : memref<16x128xf32, #tpu.memory_space<vmem>>, vector<16x128xf32>
    tpu.vector_store %arg8[%c0_117, %c0_118], %281 {strides = array<i32>} : memref<16x128xf32, #tpu.memory_space<vmem>>, vector<16x128xf32>,
    %286 = arith.truncf %283 : vector<16x128xf32> to vector<16x128xbf16>
    %287 = arith.index_cast %c3_i32 : i32 to index
    %c0_119 = arith.constant 0 : index
    %c0_120 = arith.constant 0 : index
    %288 = vector.load %arg5[%287, %c0_119, %c0_120] : memref<8x16x128xbf16, #tpu.memory_space<vmem>>, vector<1x16x128xbf16>
    %289 = vector.shape_cast %288 : vector<1x16x128xbf16> to vector<16x128xbf16>
    %290 = vector.shape_cast %286 : vector<16x128xbf16> to vector<1x16x128xbf16>
    tpu.vector_store %arg5[%287, %c0_119, %c0_120], %290 {strides = array<i32>} : memref<8x16x128xbf16, #tpu.memory_space<vmem>>, vector<1x16x128xbf16>,
    %c7_i32_121 = arith.constant 7 : i32
    %291 = arith.subi %c7_i32_121, %c3_i32 : i32
    %292 = arith.index_cast %291 : i32 to index
    %c0_122 = arith.constant 0 : index
    %c0_123 = arith.constant 0 : index
    %293 = vector.load %arg2[%292, %c0_122, %c0_123] : memref<8x16x512xbf16, #tpu.memory_space<vmem>>, vector<1x16x512xbf16>
    %294 = vector.shape_cast %293 : vector<1x16x512xbf16> to vector<16x512xbf16>
    %295 = arith.extf %294 : vector<16x512xbf16> to vector<16x512xf32>
    %c0_124 = arith.constant 0 : index
    %c0_125 = arith.constant 0 : index
    %296 = vector.load %arg9[%c0_124, %c0_125] : memref<16x128xf32, #tpu.memory_space<vmem>>, vector<16x128xf32>
    %c0_126 = arith.constant 0 : index
    %c0_127 = arith.constant 0 : index
    %297 = vector.load %arg10[%c0_126, %c0_127] : memref<16x128xf32, #tpu.memory_space<vmem>>, vector<16x128xf32>
    %cst_128 = arith.constant dense<0.000000e+00> : vector<16x512xf32>
    %298 = tpu.matmul %296, %4, %cst_128 {dimension_numbers = #tpu.dot_dimension_numbers<[1], [0], [0], [1], [0, 0, 1, 1], [], []>} : vector<16x128xf32>, vector<128x512xf32>, vector<16x512xf32> -> vector<16x512xf32>
    %299 = arith.addf %295, %298 : vector<16x512xf32>
    %300 = vector.extract_strided_slice %299 {offsets = [0, 0], sizes = [16, 128], strides = [1, 1]} : vector<16x512xf32> to vector<16x128xf32>
    %301 = arith.negf %300 : vector<16x128xf32>
    %302 = math.exp %301 : vector<16x128xf32>
    %cst_129 = arith.constant 1.000000e+00 : f32
    %303 = vector.broadcast %cst_129 : f32 to vector<16x128xf32>
    %304 = arith.addf %303, %302 : vector<16x128xf32>
    %305 = arith.divf %303, %304 : vector<16x128xf32>
    %306 = vector.extract_strided_slice %299 {offsets = [0, 128], sizes = [16, 128], strides = [1, 1]} : vector<16x512xf32> to vector<16x128xf32>
    %307 = arith.negf %306 : vector<16x128xf32>
    %308 = math.exp %307 : vector<16x128xf32>
    %cst_130 = arith.constant 1.000000e+00 : f32
    %309 = vector.broadcast %cst_130 : f32 to vector<16x128xf32>
    %310 = arith.addf %309, %308 : vector<16x128xf32>
    %311 = arith.divf %309, %310 : vector<16x128xf32>
    %312 = vector.extract_strided_slice %299 {offsets = [0, 256], sizes = [16, 128], strides = [1, 1]} : vector<16x512xf32> to vector<16x128xf32>
    %313 = math.tanh %312 : vector<16x128xf32>
    %314 = vector.extract_strided_slice %299 {offsets = [0, 384], sizes = [16, 128], strides = [1, 1]} : vector<16x512xf32> to vector<16x128xf32>
    %315 = arith.negf %314 : vector<16x128xf32>
    %316 = math.exp %315 : vector<16x128xf32>
    %cst_131 = arith.constant 1.000000e+00 : f32
    %317 = vector.broadcast %cst_131 : f32 to vector<16x128xf32>
    %318 = arith.addf %317, %316 : vector<16x128xf32>
    %319 = arith.divf %317, %318 : vector<16x128xf32>
    %320 = arith.mulf %311, %297 : vector<16x128xf32>
    %321 = arith.mulf %305, %313 : vector<16x128xf32>
    %322 = arith.addf %320, %321 : vector<16x128xf32>
    %323 = math.tanh %322 : vector<16x128xf32>
    %324 = arith.mulf %319, %323 : vector<16x128xf32>
    %c0_132 = arith.constant 0 : index
    %c0_133 = arith.constant 0 : index
    %325 = vector.load %arg9[%c0_132, %c0_133] : memref<16x128xf32, #tpu.memory_space<vmem>>, vector<16x128xf32>
    tpu.vector_store %arg9[%c0_132, %c0_133], %324 {strides = array<i32>} : memref<16x128xf32, #tpu.memory_space<vmem>>, vector<16x128xf32>,
    %c0_134 = arith.constant 0 : index
    %c0_135 = arith.constant 0 : index
    %326 = vector.load %arg10[%c0_134, %c0_135] : memref<16x128xf32, #tpu.memory_space<vmem>>, vector<16x128xf32>
    tpu.vector_store %arg10[%c0_134, %c0_135], %322 {strides = array<i32>} : memref<16x128xf32, #tpu.memory_space<vmem>>, vector<16x128xf32>,
    %327 = arith.truncf %324 : vector<16x128xf32> to vector<16x128xbf16>
    %c7_i32_136 = arith.constant 7 : i32
    %328 = arith.subi %c7_i32_136, %c3_i32 : i32
    %329 = arith.index_cast %328 : i32 to index
    %c0_137 = arith.constant 0 : index
    %c0_138 = arith.constant 0 : index
    %330 = vector.load %arg6[%329, %c0_137, %c0_138] : memref<8x16x128xbf16, #tpu.memory_space<vmem>>, vector<1x16x128xbf16>
    %331 = vector.shape_cast %330 : vector<1x16x128xbf16> to vector<16x128xbf16>
    %332 = vector.shape_cast %327 : vector<16x128xbf16> to vector<1x16x128xbf16>
    tpu.vector_store %arg6[%329, %c0_137, %c0_138], %332 {strides = array<i32>} : memref<8x16x128xbf16, #tpu.memory_space<vmem>>, vector<1x16x128xbf16>,
    %c4_i32 = arith.constant 4 : i32
    %333 = arith.index_cast %c4_i32 : i32 to index
    %c0_139 = arith.constant 0 : index
    %c0_140 = arith.constant 0 : index
    %334 = vector.load %arg1[%333, %c0_139, %c0_140] : memref<8x16x512xbf16, #tpu.memory_space<vmem>>, vector<1x16x512xbf16>
    %335 = vector.shape_cast %334 : vector<1x16x512xbf16> to vector<16x512xbf16>
    %336 = arith.extf %335 : vector<16x512xbf16> to vector<16x512xf32>
    %c0_141 = arith.constant 0 : index
    %c0_142 = arith.constant 0 : index
    %337 = vector.load %arg7[%c0_141, %c0_142] : memref<16x128xf32, #tpu.memory_space<vmem>>, vector<16x128xf32>
    %c0_143 = arith.constant 0 : index
    %c0_144 = arith.constant 0 : index
    %338 = vector.load %arg8[%c0_143, %c0_144] : memref<16x128xf32, #tpu.memory_space<vmem>>, vector<16x128xf32>
    %cst_145 = arith.constant dense<0.000000e+00> : vector<16x512xf32>
    %339 = tpu.matmul %337, %3, %cst_145 {dimension_numbers = #tpu.dot_dimension_numbers<[1], [0], [0], [1], [0, 0, 1, 1], [], []>} : vector<16x128xf32>, vector<128x512xf32>, vector<16x512xf32> -> vector<16x512xf32>
    %340 = arith.addf %336, %339 : vector<16x512xf32>
    %341 = vector.extract_strided_slice %340 {offsets = [0, 0], sizes = [16, 128], strides = [1, 1]} : vector<16x512xf32> to vector<16x128xf32>
    %342 = arith.negf %341 : vector<16x128xf32>
    %343 = math.exp %342 : vector<16x128xf32>
    %cst_146 = arith.constant 1.000000e+00 : f32
    %344 = vector.broadcast %cst_146 : f32 to vector<16x128xf32>
    %345 = arith.addf %344, %343 : vector<16x128xf32>
    %346 = arith.divf %344, %345 : vector<16x128xf32>
    %347 = vector.extract_strided_slice %340 {offsets = [0, 128], sizes = [16, 128], strides = [1, 1]} : vector<16x512xf32> to vector<16x128xf32>
    %348 = arith.negf %347 : vector<16x128xf32>
    %349 = math.exp %348 : vector<16x128xf32>
    %cst_147 = arith.constant 1.000000e+00 : f32
    %350 = vector.broadcast %cst_147 : f32 to vector<16x128xf32>
    %351 = arith.addf %350, %349 : vector<16x128xf32>
    %352 = arith.divf %350, %351 : vector<16x128xf32>
    %353 = vector.extract_strided_slice %340 {offsets = [0, 256], sizes = [16, 128], strides = [1, 1]} : vector<16x512xf32> to vector<16x128xf32>
    %354 = math.tanh %353 : vector<16x128xf32>
    %355 = vector.extract_strided_slice %340 {offsets = [0, 384], sizes = [16, 128], strides = [1, 1]} : vector<16x512xf32> to vector<16x128xf32>
    %356 = arith.negf %355 : vector<16x128xf32>
    %357 = math.exp %356 : vector<16x128xf32>
    %cst_148 = arith.constant 1.000000e+00 : f32
    %358 = vector.broadcast %cst_148 : f32 to vector<16x128xf32>
    %359 = arith.addf %358, %357 : vector<16x128xf32>
    %360 = arith.divf %358, %359 : vector<16x128xf32>
    %361 = arith.mulf %352, %338 : vector<16x128xf32>
    %362 = arith.mulf %346, %354 : vector<16x128xf32>
    %363 = arith.addf %361, %362 : vector<16x128xf32>
    %364 = math.tanh %363 : vector<16x128xf32>
    %365 = arith.mulf %360, %364 : vector<16x128xf32>
    %c0_149 = arith.constant 0 : index
    %c0_150 = arith.constant 0 : index
    %366 = vector.load %arg7[%c0_149, %c0_150] : memref<16x128xf32, #tpu.memory_space<vmem>>, vector<16x128xf32>
    tpu.vector_store %arg7[%c0_149, %c0_150], %365 {strides = array<i32>} : memref<16x128xf32, #tpu.memory_space<vmem>>, vector<16x128xf32>,
    %c0_151 = arith.constant 0 : index
    %c0_152 = arith.constant 0 : index
    %367 = vector.load %arg8[%c0_151, %c0_152] : memref<16x128xf32, #tpu.memory_space<vmem>>, vector<16x128xf32>
    tpu.vector_store %arg8[%c0_151, %c0_152], %363 {strides = array<i32>} : memref<16x128xf32, #tpu.memory_space<vmem>>, vector<16x128xf32>,
    %368 = arith.truncf %365 : vector<16x128xf32> to vector<16x128xbf16>
    %369 = arith.index_cast %c4_i32 : i32 to index
    %c0_153 = arith.constant 0 : index
    %c0_154 = arith.constant 0 : index
    %370 = vector.load %arg5[%369, %c0_153, %c0_154] : memref<8x16x128xbf16, #tpu.memory_space<vmem>>, vector<1x16x128xbf16>
    %371 = vector.shape_cast %370 : vector<1x16x128xbf16> to vector<16x128xbf16>
    %372 = vector.shape_cast %368 : vector<16x128xbf16> to vector<1x16x128xbf16>
    tpu.vector_store %arg5[%369, %c0_153, %c0_154], %372 {strides = array<i32>} : memref<8x16x128xbf16, #tpu.memory_space<vmem>>, vector<1x16x128xbf16>,
    %c7_i32_155 = arith.constant 7 : i32
    %373 = arith.subi %c7_i32_155, %c4_i32 : i32
    %374 = arith.index_cast %373 : i32 to index
    %c0_156 = arith.constant 0 : index
    %c0_157 = arith.constant 0 : index
    %375 = vector.load %arg2[%374, %c0_156, %c0_157] : memref<8x16x512xbf16, #tpu.memory_space<vmem>>, vector<1x16x512xbf16>
    %376 = vector.shape_cast %375 : vector<1x16x512xbf16> to vector<16x512xbf16>
    %377 = arith.extf %376 : vector<16x512xbf16> to vector<16x512xf32>
    %c0_158 = arith.constant 0 : index
    %c0_159 = arith.constant 0 : index
    %378 = vector.load %arg9[%c0_158, %c0_159] : memref<16x128xf32, #tpu.memory_space<vmem>>, vector<16x128xf32>
    %c0_160 = arith.constant 0 : index
    %c0_161 = arith.constant 0 : index
    %379 = vector.load %arg10[%c0_160, %c0_161] : memref<16x128xf32, #tpu.memory_space<vmem>>, vector<16x128xf32>
    %cst_162 = arith.constant dense<0.000000e+00> : vector<16x512xf32>
    %380 = tpu.matmul %378, %4, %cst_162 {dimension_numbers = #tpu.dot_dimension_numbers<[1], [0], [0], [1], [0, 0, 1, 1], [], []>} : vector<16x128xf32>, vector<128x512xf32>, vector<16x512xf32> -> vector<16x512xf32>
    %381 = arith.addf %377, %380 : vector<16x512xf32>
    %382 = vector.extract_strided_slice %381 {offsets = [0, 0], sizes = [16, 128], strides = [1, 1]} : vector<16x512xf32> to vector<16x128xf32>
    %383 = arith.negf %382 : vector<16x128xf32>
    %384 = math.exp %383 : vector<16x128xf32>
    %cst_163 = arith.constant 1.000000e+00 : f32
    %385 = vector.broadcast %cst_163 : f32 to vector<16x128xf32>
    %386 = arith.addf %385, %384 : vector<16x128xf32>
    %387 = arith.divf %385, %386 : vector<16x128xf32>
    %388 = vector.extract_strided_slice %381 {offsets = [0, 128], sizes = [16, 128], strides = [1, 1]} : vector<16x512xf32> to vector<16x128xf32>
    %389 = arith.negf %388 : vector<16x128xf32>
    %390 = math.exp %389 : vector<16x128xf32>
    %cst_164 = arith.constant 1.000000e+00 : f32
    %391 = vector.broadcast %cst_164 : f32 to vector<16x128xf32>
    %392 = arith.addf %391, %390 : vector<16x128xf32>
    %393 = arith.divf %391, %392 : vector<16x128xf32>
    %394 = vector.extract_strided_slice %381 {offsets = [0, 256], sizes = [16, 128], strides = [1, 1]} : vector<16x512xf32> to vector<16x128xf32>
    %395 = math.tanh %394 : vector<16x128xf32>
    %396 = vector.extract_strided_slice %381 {offsets = [0, 384], sizes = [16, 128], strides = [1, 1]} : vector<16x512xf32> to vector<16x128xf32>
    %397 = arith.negf %396 : vector<16x128xf32>
    %398 = math.exp %397 : vector<16x128xf32>
    %cst_165 = arith.constant 1.000000e+00 : f32
    %399 = vector.broadcast %cst_165 : f32 to vector<16x128xf32>
    %400 = arith.addf %399, %398 : vector<16x128xf32>
    %401 = arith.divf %399, %400 : vector<16x128xf32>
    %402 = arith.mulf %393, %379 : vector<16x128xf32>
    %403 = arith.mulf %387, %395 : vector<16x128xf32>
    %404 = arith.addf %402, %403 : vector<16x128xf32>
    %405 = math.tanh %404 : vector<16x128xf32>
    %406 = arith.mulf %401, %405 : vector<16x128xf32>
    %c0_166 = arith.constant 0 : index
    %c0_167 = arith.constant 0 : index
    %407 = vector.load %arg9[%c0_166, %c0_167] : memref<16x128xf32, #tpu.memory_space<vmem>>, vector<16x128xf32>
    tpu.vector_store %arg9[%c0_166, %c0_167], %406 {strides = array<i32>} : memref<16x128xf32, #tpu.memory_space<vmem>>, vector<16x128xf32>,
    %c0_168 = arith.constant 0 : index
    %c0_169 = arith.constant 0 : index
    %408 = vector.load %arg10[%c0_168, %c0_169] : memref<16x128xf32, #tpu.memory_space<vmem>>, vector<16x128xf32>
    tpu.vector_store %arg10[%c0_168, %c0_169], %404 {strides = array<i32>} : memref<16x128xf32, #tpu.memory_space<vmem>>, vector<16x128xf32>,
    %409 = arith.truncf %406 : vector<16x128xf32> to vector<16x128xbf16>
    %c7_i32_170 = arith.constant 7 : i32
    %410 = arith.subi %c7_i32_170, %c4_i32 : i32
    %411 = arith.index_cast %410 : i32 to index
    %c0_171 = arith.constant 0 : index
    %c0_172 = arith.constant 0 : index
    %412 = vector.load %arg6[%411, %c0_171, %c0_172] : memref<8x16x128xbf16, #tpu.memory_space<vmem>>, vector<1x16x128xbf16>
    %413 = vector.shape_cast %412 : vector<1x16x128xbf16> to vector<16x128xbf16>
    %414 = vector.shape_cast %409 : vector<16x128xbf16> to vector<1x16x128xbf16>
    tpu.vector_store %arg6[%411, %c0_171, %c0_172], %414 {strides = array<i32>} : memref<8x16x128xbf16, #tpu.memory_space<vmem>>, vector<1x16x128xbf16>,
    %c5_i32 = arith.constant 5 : i32
    %415 = arith.index_cast %c5_i32 : i32 to index
    %c0_173 = arith.constant 0 : index
    %c0_174 = arith.constant 0 : index
    %416 = vector.load %arg1[%415, %c0_173, %c0_174] : memref<8x16x512xbf16, #tpu.memory_space<vmem>>, vector<1x16x512xbf16>
    %417 = vector.shape_cast %416 : vector<1x16x512xbf16> to vector<16x512xbf16>
    %418 = arith.extf %417 : vector<16x512xbf16> to vector<16x512xf32>
    %c0_175 = arith.constant 0 : index
    %c0_176 = arith.constant 0 : index
    %419 = vector.load %arg7[%c0_175, %c0_176] : memref<16x128xf32, #tpu.memory_space<vmem>>, vector<16x128xf32>
    %c0_177 = arith.constant 0 : index
    %c0_178 = arith.constant 0 : index
    %420 = vector.load %arg8[%c0_177, %c0_178] : memref<16x128xf32, #tpu.memory_space<vmem>>, vector<16x128xf32>
    %cst_179 = arith.constant dense<0.000000e+00> : vector<16x512xf32>
    %421 = tpu.matmul %419, %3, %cst_179 {dimension_numbers = #tpu.dot_dimension_numbers<[1], [0], [0], [1], [0, 0, 1, 1], [], []>} : vector<16x128xf32>, vector<128x512xf32>, vector<16x512xf32> -> vector<16x512xf32>
    %422 = arith.addf %418, %421 : vector<16x512xf32>
    %423 = vector.extract_strided_slice %422 {offsets = [0, 0], sizes = [16, 128], strides = [1, 1]} : vector<16x512xf32> to vector<16x128xf32>
    %424 = arith.negf %423 : vector<16x128xf32>
    %425 = math.exp %424 : vector<16x128xf32>
    %cst_180 = arith.constant 1.000000e+00 : f32
    %426 = vector.broadcast %cst_180 : f32 to vector<16x128xf32>
    %427 = arith.addf %426, %425 : vector<16x128xf32>
    %428 = arith.divf %426, %427 : vector<16x128xf32>
    %429 = vector.extract_strided_slice %422 {offsets = [0, 128], sizes = [16, 128], strides = [1, 1]} : vector<16x512xf32> to vector<16x128xf32>
    %430 = arith.negf %429 : vector<16x128xf32>
    %431 = math.exp %430 : vector<16x128xf32>
    %cst_181 = arith.constant 1.000000e+00 : f32
    %432 = vector.broadcast %cst_181 : f32 to vector<16x128xf32>
    %433 = arith.addf %432, %431 : vector<16x128xf32>
    %434 = arith.divf %432, %433 : vector<16x128xf32>
    %435 = vector.extract_strided_slice %422 {offsets = [0, 256], sizes = [16, 128], strides = [1, 1]} : vector<16x512xf32> to vector<16x128xf32>
    %436 = math.tanh %435 : vector<16x128xf32>
    %437 = vector.extract_strided_slice %422 {offsets = [0, 384], sizes = [16, 128], strides = [1, 1]} : vector<16x512xf32> to vector<16x128xf32>
    %438 = arith.negf %437 : vector<16x128xf32>
    %439 = math.exp %438 : vector<16x128xf32>
    %cst_182 = arith.constant 1.000000e+00 : f32
    %440 = vector.broadcast %cst_182 : f32 to vector<16x128xf32>
    %441 = arith.addf %440, %439 : vector<16x128xf32>
    %442 = arith.divf %440, %441 : vector<16x128xf32>
    %443 = arith.mulf %434, %420 : vector<16x128xf32>
    %444 = arith.mulf %428, %436 : vector<16x128xf32>
    %445 = arith.addf %443, %444 : vector<16x128xf32>
    %446 = math.tanh %445 : vector<16x128xf32>
    %447 = arith.mulf %442, %446 : vector<16x128xf32>
    %c0_183 = arith.constant 0 : index
    %c0_184 = arith.constant 0 : index
    %448 = vector.load %arg7[%c0_183, %c0_184] : memref<16x128xf32, #tpu.memory_space<vmem>>, vector<16x128xf32>
    tpu.vector_store %arg7[%c0_183, %c0_184], %447 {strides = array<i32>} : memref<16x128xf32, #tpu.memory_space<vmem>>, vector<16x128xf32>,
    %c0_185 = arith.constant 0 : index
    %c0_186 = arith.constant 0 : index
    %449 = vector.load %arg8[%c0_185, %c0_186] : memref<16x128xf32, #tpu.memory_space<vmem>>, vector<16x128xf32>
    tpu.vector_store %arg8[%c0_185, %c0_186], %445 {strides = array<i32>} : memref<16x128xf32, #tpu.memory_space<vmem>>, vector<16x128xf32>,
    %450 = arith.truncf %447 : vector<16x128xf32> to vector<16x128xbf16>
    %451 = arith.index_cast %c5_i32 : i32 to index
    %c0_187 = arith.constant 0 : index
    %c0_188 = arith.constant 0 : index
    %452 = vector.load %arg5[%451, %c0_187, %c0_188] : memref<8x16x128xbf16, #tpu.memory_space<vmem>>, vector<1x16x128xbf16>
    %453 = vector.shape_cast %452 : vector<1x16x128xbf16> to vector<16x128xbf16>
    %454 = vector.shape_cast %450 : vector<16x128xbf16> to vector<1x16x128xbf16>
    tpu.vector_store %arg5[%451, %c0_187, %c0_188], %454 {strides = array<i32>} : memref<8x16x128xbf16, #tpu.memory_space<vmem>>, vector<1x16x128xbf16>,
    %c7_i32_189 = arith.constant 7 : i32
    %455 = arith.subi %c7_i32_189, %c5_i32 : i32
    %456 = arith.index_cast %455 : i32 to index
    %c0_190 = arith.constant 0 : index
    %c0_191 = arith.constant 0 : index
    %457 = vector.load %arg2[%456, %c0_190, %c0_191] : memref<8x16x512xbf16, #tpu.memory_space<vmem>>, vector<1x16x512xbf16>
    %458 = vector.shape_cast %457 : vector<1x16x512xbf16> to vector<16x512xbf16>
    %459 = arith.extf %458 : vector<16x512xbf16> to vector<16x512xf32>
    %c0_192 = arith.constant 0 : index
    %c0_193 = arith.constant 0 : index
    %460 = vector.load %arg9[%c0_192, %c0_193] : memref<16x128xf32, #tpu.memory_space<vmem>>, vector<16x128xf32>
    %c0_194 = arith.constant 0 : index
    %c0_195 = arith.constant 0 : index
    %461 = vector.load %arg10[%c0_194, %c0_195] : memref<16x128xf32, #tpu.memory_space<vmem>>, vector<16x128xf32>
    %cst_196 = arith.constant dense<0.000000e+00> : vector<16x512xf32>
    %462 = tpu.matmul %460, %4, %cst_196 {dimension_numbers = #tpu.dot_dimension_numbers<[1], [0], [0], [1], [0, 0, 1, 1], [], []>} : vector<16x128xf32>, vector<128x512xf32>, vector<16x512xf32> -> vector<16x512xf32>
    %463 = arith.addf %459, %462 : vector<16x512xf32>
    %464 = vector.extract_strided_slice %463 {offsets = [0, 0], sizes = [16, 128], strides = [1, 1]} : vector<16x512xf32> to vector<16x128xf32>
    %465 = arith.negf %464 : vector<16x128xf32>
    %466 = math.exp %465 : vector<16x128xf32>
    %cst_197 = arith.constant 1.000000e+00 : f32
    %467 = vector.broadcast %cst_197 : f32 to vector<16x128xf32>
    %468 = arith.addf %467, %466 : vector<16x128xf32>
    %469 = arith.divf %467, %468 : vector<16x128xf32>
    %470 = vector.extract_strided_slice %463 {offsets = [0, 128], sizes = [16, 128], strides = [1, 1]} : vector<16x512xf32> to vector<16x128xf32>
    %471 = arith.negf %470 : vector<16x128xf32>
    %472 = math.exp %471 : vector<16x128xf32>
    %cst_198 = arith.constant 1.000000e+00 : f32
    %473 = vector.broadcast %cst_198 : f32 to vector<16x128xf32>
    %474 = arith.addf %473, %472 : vector<16x128xf32>
    %475 = arith.divf %473, %474 : vector<16x128xf32>
    %476 = vector.extract_strided_slice %463 {offsets = [0, 256], sizes = [16, 128], strides = [1, 1]} : vector<16x512xf32> to vector<16x128xf32>
    %477 = math.tanh %476 : vector<16x128xf32>
    %478 = vector.extract_strided_slice %463 {offsets = [0, 384], sizes = [16, 128], strides = [1, 1]} : vector<16x512xf32> to vector<16x128xf32>
    %479 = arith.negf %478 : vector<16x128xf32>
    %480 = math.exp %479 : vector<16x128xf32>
    %cst_199 = arith.constant 1.000000e+00 : f32
    %481 = vector.broadcast %cst_199 : f32 to vector<16x128xf32>
    %482 = arith.addf %481, %480 : vector<16x128xf32>
    %483 = arith.divf %481, %482 : vector<16x128xf32>
    %484 = arith.mulf %475, %461 : vector<16x128xf32>
    %485 = arith.mulf %469, %477 : vector<16x128xf32>
    %486 = arith.addf %484, %485 : vector<16x128xf32>
    %487 = math.tanh %486 : vector<16x128xf32>
    %488 = arith.mulf %483, %487 : vector<16x128xf32>
    %c0_200 = arith.constant 0 : index
    %c0_201 = arith.constant 0 : index
    %489 = vector.load %arg9[%c0_200, %c0_201] : memref<16x128xf32, #tpu.memory_space<vmem>>, vector<16x128xf32>
    tpu.vector_store %arg9[%c0_200, %c0_201], %488 {strides = array<i32>} : memref<16x128xf32, #tpu.memory_space<vmem>>, vector<16x128xf32>,
    %c0_202 = arith.constant 0 : index
    %c0_203 = arith.constant 0 : index
    %490 = vector.load %arg10[%c0_202, %c0_203] : memref<16x128xf32, #tpu.memory_space<vmem>>, vector<16x128xf32>
    tpu.vector_store %arg10[%c0_202, %c0_203], %486 {strides = array<i32>} : memref<16x128xf32, #tpu.memory_space<vmem>>, vector<16x128xf32>,
    %491 = arith.truncf %488 : vector<16x128xf32> to vector<16x128xbf16>
    %c7_i32_204 = arith.constant 7 : i32
    %492 = arith.subi %c7_i32_204, %c5_i32 : i32
    %493 = arith.index_cast %492 : i32 to index
    %c0_205 = arith.constant 0 : index
    %c0_206 = arith.constant 0 : index
    %494 = vector.load %arg6[%493, %c0_205, %c0_206] : memref<8x16x128xbf16, #tpu.memory_space<vmem>>, vector<1x16x128xbf16>
    %495 = vector.shape_cast %494 : vector<1x16x128xbf16> to vector<16x128xbf16>
    %496 = vector.shape_cast %491 : vector<16x128xbf16> to vector<1x16x128xbf16>
    tpu.vector_store %arg6[%493, %c0_205, %c0_206], %496 {strides = array<i32>} : memref<8x16x128xbf16, #tpu.memory_space<vmem>>, vector<1x16x128xbf16>,
    %c6_i32 = arith.constant 6 : i32
    %497 = arith.index_cast %c6_i32 : i32 to index
    %c0_207 = arith.constant 0 : index
    %c0_208 = arith.constant 0 : index
    %498 = vector.load %arg1[%497, %c0_207, %c0_208] : memref<8x16x512xbf16, #tpu.memory_space<vmem>>, vector<1x16x512xbf16>
    %499 = vector.shape_cast %498 : vector<1x16x512xbf16> to vector<16x512xbf16>
    %500 = arith.extf %499 : vector<16x512xbf16> to vector<16x512xf32>
    %c0_209 = arith.constant 0 : index
    %c0_210 = arith.constant 0 : index
    %501 = vector.load %arg7[%c0_209, %c0_210] : memref<16x128xf32, #tpu.memory_space<vmem>>, vector<16x128xf32>
    %c0_211 = arith.constant 0 : index
    %c0_212 = arith.constant 0 : index
    %502 = vector.load %arg8[%c0_211, %c0_212] : memref<16x128xf32, #tpu.memory_space<vmem>>, vector<16x128xf32>
    %cst_213 = arith.constant dense<0.000000e+00> : vector<16x512xf32>
    %503 = tpu.matmul %501, %3, %cst_213 {dimension_numbers = #tpu.dot_dimension_numbers<[1], [0], [0], [1], [0, 0, 1, 1], [], []>} : vector<16x128xf32>, vector<128x512xf32>, vector<16x512xf32> -> vector<16x512xf32>
    %504 = arith.addf %500, %503 : vector<16x512xf32>
    %505 = vector.extract_strided_slice %504 {offsets = [0, 0], sizes = [16, 128], strides = [1, 1]} : vector<16x512xf32> to vector<16x128xf32>
    %506 = arith.negf %505 : vector<16x128xf32>
    %507 = math.exp %506 : vector<16x128xf32>
    %cst_214 = arith.constant 1.000000e+00 : f32
    %508 = vector.broadcast %cst_214 : f32 to vector<16x128xf32>
    %509 = arith.addf %508, %507 : vector<16x128xf32>
    %510 = arith.divf %508, %509 : vector<16x128xf32>
    %511 = vector.extract_strided_slice %504 {offsets = [0, 128], sizes = [16, 128], strides = [1, 1]} : vector<16x512xf32> to vector<16x128xf32>
    %512 = arith.negf %511 : vector<16x128xf32>
    %513 = math.exp %512 : vector<16x128xf32>
    %cst_215 = arith.constant 1.000000e+00 : f32
    %514 = vector.broadcast %cst_215 : f32 to vector<16x128xf32>
    %515 = arith.addf %514, %513 : vector<16x128xf32>
    %516 = arith.divf %514, %515 : vector<16x128xf32>
    %517 = vector.extract_strided_slice %504 {offsets = [0, 256], sizes = [16, 128], strides = [1, 1]} : vector<16x512xf32> to vector<16x128xf32>
    %518 = math.tanh %517 : vector<16x128xf32>
    %519 = vector.extract_strided_slice %504 {offsets = [0, 384], sizes = [16, 128], strides = [1, 1]} : vector<16x512xf32> to vector<16x128xf32>
    %520 = arith.negf %519 : vector<16x128xf32>
    %521 = math.exp %520 : vector<16x128xf32>
    %cst_216 = arith.constant 1.000000e+00 : f32
    %522 = vector.broadcast %cst_216 : f32 to vector<16x128xf32>
    %523 = arith.addf %522, %521 : vector<16x128xf32>
    %524 = arith.divf %522, %523 : vector<16x128xf32>
    %525 = arith.mulf %516, %502 : vector<16x128xf32>
    %526 = arith.mulf %510, %518 : vector<16x128xf32>
    %527 = arith.addf %525, %526 : vector<16x128xf32>
    %528 = math.tanh %527 : vector<16x128xf32>
    %529 = arith.mulf %524, %528 : vector<16x128xf32>
    %c0_217 = arith.constant 0 : index
    %c0_218 = arith.constant 0 : index
    %530 = vector.load %arg7[%c0_217, %c0_218] : memref<16x128xf32, #tpu.memory_space<vmem>>, vector<16x128xf32>
    tpu.vector_store %arg7[%c0_217, %c0_218], %529 {strides = array<i32>} : memref<16x128xf32, #tpu.memory_space<vmem>>, vector<16x128xf32>,
    %c0_219 = arith.constant 0 : index
    %c0_220 = arith.constant 0 : index
    %531 = vector.load %arg8[%c0_219, %c0_220] : memref<16x128xf32, #tpu.memory_space<vmem>>, vector<16x128xf32>
    tpu.vector_store %arg8[%c0_219, %c0_220], %527 {strides = array<i32>} : memref<16x128xf32, #tpu.memory_space<vmem>>, vector<16x128xf32>,
    %532 = arith.truncf %529 : vector<16x128xf32> to vector<16x128xbf16>
    %533 = arith.index_cast %c6_i32 : i32 to index
    %c0_221 = arith.constant 0 : index
    %c0_222 = arith.constant 0 : index
    %534 = vector.load %arg5[%533, %c0_221, %c0_222] : memref<8x16x128xbf16, #tpu.memory_space<vmem>>, vector<1x16x128xbf16>
    %535 = vector.shape_cast %534 : vector<1x16x128xbf16> to vector<16x128xbf16>
    %536 = vector.shape_cast %532 : vector<16x128xbf16> to vector<1x16x128xbf16>
    tpu.vector_store %arg5[%533, %c0_221, %c0_222], %536 {strides = array<i32>} : memref<8x16x128xbf16, #tpu.memory_space<vmem>>, vector<1x16x128xbf16>,
    %c7_i32_223 = arith.constant 7 : i32
    %537 = arith.subi %c7_i32_223, %c6_i32 : i32
    %538 = arith.index_cast %537 : i32 to index
    %c0_224 = arith.constant 0 : index
    %c0_225 = arith.constant 0 : index
    %539 = vector.load %arg2[%538, %c0_224, %c0_225] : memref<8x16x512xbf16, #tpu.memory_space<vmem>>, vector<1x16x512xbf16>
    %540 = vector.shape_cast %539 : vector<1x16x512xbf16> to vector<16x512xbf16>
    %541 = arith.extf %540 : vector<16x512xbf16> to vector<16x512xf32>
    %c0_226 = arith.constant 0 : index
    %c0_227 = arith.constant 0 : index
    %542 = vector.load %arg9[%c0_226, %c0_227] : memref<16x128xf32, #tpu.memory_space<vmem>>, vector<16x128xf32>
    %c0_228 = arith.constant 0 : index
    %c0_229 = arith.constant 0 : index
    %543 = vector.load %arg10[%c0_228, %c0_229] : memref<16x128xf32, #tpu.memory_space<vmem>>, vector<16x128xf32>
    %cst_230 = arith.constant dense<0.000000e+00> : vector<16x512xf32>
    %544 = tpu.matmul %542, %4, %cst_230 {dimension_numbers = #tpu.dot_dimension_numbers<[1], [0], [0], [1], [0, 0, 1, 1], [], []>} : vector<16x128xf32>, vector<128x512xf32>, vector<16x512xf32> -> vector<16x512xf32>
    %545 = arith.addf %541, %544 : vector<16x512xf32>
    %546 = vector.extract_strided_slice %545 {offsets = [0, 0], sizes = [16, 128], strides = [1, 1]} : vector<16x512xf32> to vector<16x128xf32>
    %547 = arith.negf %546 : vector<16x128xf32>
    %548 = math.exp %547 : vector<16x128xf32>
    %cst_231 = arith.constant 1.000000e+00 : f32
    %549 = vector.broadcast %cst_231 : f32 to vector<16x128xf32>
    %550 = arith.addf %549, %548 : vector<16x128xf32>
    %551 = arith.divf %549, %550 : vector<16x128xf32>
    %552 = vector.extract_strided_slice %545 {offsets = [0, 128], sizes = [16, 128], strides = [1, 1]} : vector<16x512xf32> to vector<16x128xf32>
    %553 = arith.negf %552 : vector<16x128xf32>
    %554 = math.exp %553 : vector<16x128xf32>
    %cst_232 = arith.constant 1.000000e+00 : f32
    %555 = vector.broadcast %cst_232 : f32 to vector<16x128xf32>
    %556 = arith.addf %555, %554 : vector<16x128xf32>
    %557 = arith.divf %555, %556 : vector<16x128xf32>
    %558 = vector.extract_strided_slice %545 {offsets = [0, 256], sizes = [16, 128], strides = [1, 1]} : vector<16x512xf32> to vector<16x128xf32>
    %559 = math.tanh %558 : vector<16x128xf32>
    %560 = vector.extract_strided_slice %545 {offsets = [0, 384], sizes = [16, 128], strides = [1, 1]} : vector<16x512xf32> to vector<16x128xf32>
    %561 = arith.negf %560 : vector<16x128xf32>
    %562 = math.exp %561 : vector<16x128xf32>
    %cst_233 = arith.constant 1.000000e+00 : f32
    %563 = vector.broadcast %cst_233 : f32 to vector<16x128xf32>
    %564 = arith.addf %563, %562 : vector<16x128xf32>
    %565 = arith.divf %563, %564 : vector<16x128xf32>
    %566 = arith.mulf %557, %543 : vector<16x128xf32>
    %567 = arith.mulf %551, %559 : vector<16x128xf32>
    %568 = arith.addf %566, %567 : vector<16x128xf32>
    %569 = math.tanh %568 : vector<16x128xf32>
    %570 = arith.mulf %565, %569 : vector<16x128xf32>
    %c0_234 = arith.constant 0 : index
    %c0_235 = arith.constant 0 : index
    %571 = vector.load %arg9[%c0_234, %c0_235] : memref<16x128xf32, #tpu.memory_space<vmem>>, vector<16x128xf32>
    tpu.vector_store %arg9[%c0_234, %c0_235], %570 {strides = array<i32>} : memref<16x128xf32, #tpu.memory_space<vmem>>, vector<16x128xf32>,
    %c0_236 = arith.constant 0 : index
    %c0_237 = arith.constant 0 : index
    %572 = vector.load %arg10[%c0_236, %c0_237] : memref<16x128xf32, #tpu.memory_space<vmem>>, vector<16x128xf32>
    tpu.vector_store %arg10[%c0_236, %c0_237], %568 {strides = array<i32>} : memref<16x128xf32, #tpu.memory_space<vmem>>, vector<16x128xf32>,
    %573 = arith.truncf %570 : vector<16x128xf32> to vector<16x128xbf16>
    %c7_i32_238 = arith.constant 7 : i32
    %574 = arith.subi %c7_i32_238, %c6_i32 : i32
    %575 = arith.index_cast %574 : i32 to index
    %c0_239 = arith.constant 0 : index
    %c0_240 = arith.constant 0 : index
    %576 = vector.load %arg6[%575, %c0_239, %c0_240] : memref<8x16x128xbf16, #tpu.memory_space<vmem>>, vector<1x16x128xbf16>
    %577 = vector.shape_cast %576 : vector<1x16x128xbf16> to vector<16x128xbf16>
    %578 = vector.shape_cast %573 : vector<16x128xbf16> to vector<1x16x128xbf16>
    tpu.vector_store %arg6[%575, %c0_239, %c0_240], %578 {strides = array<i32>} : memref<8x16x128xbf16, #tpu.memory_space<vmem>>, vector<1x16x128xbf16>,
    %c7_i32_241 = arith.constant 7 : i32
    %579 = arith.index_cast %c7_i32_241 : i32 to index
    %c0_242 = arith.constant 0 : index
    %c0_243 = arith.constant 0 : index
    %580 = vector.load %arg1[%579, %c0_242, %c0_243] : memref<8x16x512xbf16, #tpu.memory_space<vmem>>, vector<1x16x512xbf16>
    %581 = vector.shape_cast %580 : vector<1x16x512xbf16> to vector<16x512xbf16>
    %582 = arith.extf %581 : vector<16x512xbf16> to vector<16x512xf32>
    %c0_244 = arith.constant 0 : index
    %c0_245 = arith.constant 0 : index
    %583 = vector.load %arg7[%c0_244, %c0_245] : memref<16x128xf32, #tpu.memory_space<vmem>>, vector<16x128xf32>
    %c0_246 = arith.constant 0 : index
    %c0_247 = arith.constant 0 : index
    %584 = vector.load %arg8[%c0_246, %c0_247] : memref<16x128xf32, #tpu.memory_space<vmem>>, vector<16x128xf32>
    %cst_248 = arith.constant dense<0.000000e+00> : vector<16x512xf32>
    %585 = tpu.matmul %583, %3, %cst_248 {dimension_numbers = #tpu.dot_dimension_numbers<[1], [0], [0], [1], [0, 0, 1, 1], [], []>} : vector<16x128xf32>, vector<128x512xf32>, vector<16x512xf32> -> vector<16x512xf32>
    %586 = arith.addf %582, %585 : vector<16x512xf32>
    %587 = vector.extract_strided_slice %586 {offsets = [0, 0], sizes = [16, 128], strides = [1, 1]} : vector<16x512xf32> to vector<16x128xf32>
    %588 = arith.negf %587 : vector<16x128xf32>
    %589 = math.exp %588 : vector<16x128xf32>
    %cst_249 = arith.constant 1.000000e+00 : f32
    %590 = vector.broadcast %cst_249 : f32 to vector<16x128xf32>
    %591 = arith.addf %590, %589 : vector<16x128xf32>
    %592 = arith.divf %590, %591 : vector<16x128xf32>
    %593 = vector.extract_strided_slice %586 {offsets = [0, 128], sizes = [16, 128], strides = [1, 1]} : vector<16x512xf32> to vector<16x128xf32>
    %594 = arith.negf %593 : vector<16x128xf32>
    %595 = math.exp %594 : vector<16x128xf32>
    %cst_250 = arith.constant 1.000000e+00 : f32
    %596 = vector.broadcast %cst_250 : f32 to vector<16x128xf32>
    %597 = arith.addf %596, %595 : vector<16x128xf32>
    %598 = arith.divf %596, %597 : vector<16x128xf32>
    %599 = vector.extract_strided_slice %586 {offsets = [0, 256], sizes = [16, 128], strides = [1, 1]} : vector<16x512xf32> to vector<16x128xf32>
    %600 = math.tanh %599 : vector<16x128xf32>
    %601 = vector.extract_strided_slice %586 {offsets = [0, 384], sizes = [16, 128], strides = [1, 1]} : vector<16x512xf32> to vector<16x128xf32>
    %602 = arith.negf %601 : vector<16x128xf32>
    %603 = math.exp %602 : vector<16x128xf32>
    %cst_251 = arith.constant 1.000000e+00 : f32
    %604 = vector.broadcast %cst_251 : f32 to vector<16x128xf32>
    %605 = arith.addf %604, %603 : vector<16x128xf32>
    %606 = arith.divf %604, %605 : vector<16x128xf32>
    %607 = arith.mulf %598, %584 : vector<16x128xf32>
    %608 = arith.mulf %592, %600 : vector<16x128xf32>
    %609 = arith.addf %607, %608 : vector<16x128xf32>
    %610 = math.tanh %609 : vector<16x128xf32>
    %611 = arith.mulf %606, %610 : vector<16x128xf32>
    %c0_252 = arith.constant 0 : index
    %c0_253 = arith.constant 0 : index
    %612 = vector.load %arg7[%c0_252, %c0_253] : memref<16x128xf32, #tpu.memory_space<vmem>>, vector<16x128xf32>
    tpu.vector_store %arg7[%c0_252, %c0_253], %611 {strides = array<i32>} : memref<16x128xf32, #tpu.memory_space<vmem>>, vector<16x128xf32>,
    %c0_254 = arith.constant 0 : index
    %c0_255 = arith.constant 0 : index
    %613 = vector.load %arg8[%c0_254, %c0_255] : memref<16x128xf32, #tpu.memory_space<vmem>>, vector<16x128xf32>
    tpu.vector_store %arg8[%c0_254, %c0_255], %609 {strides = array<i32>} : memref<16x128xf32, #tpu.memory_space<vmem>>, vector<16x128xf32>,
    %614 = arith.truncf %611 : vector<16x128xf32> to vector<16x128xbf16>
    %615 = arith.index_cast %c7_i32_241 : i32 to index
    %c0_256 = arith.constant 0 : index
    %c0_257 = arith.constant 0 : index
    %616 = vector.load %arg5[%615, %c0_256, %c0_257] : memref<8x16x128xbf16, #tpu.memory_space<vmem>>, vector<1x16x128xbf16>
    %617 = vector.shape_cast %616 : vector<1x16x128xbf16> to vector<16x128xbf16>
    %618 = vector.shape_cast %614 : vector<16x128xbf16> to vector<1x16x128xbf16>
    tpu.vector_store %arg5[%615, %c0_256, %c0_257], %618 {strides = array<i32>} : memref<8x16x128xbf16, #tpu.memory_space<vmem>>, vector<1x16x128xbf16>,
    %c7_i32_258 = arith.constant 7 : i32
    %619 = arith.subi %c7_i32_258, %c7_i32_241 : i32
    %620 = arith.index_cast %619 : i32 to index
    %c0_259 = arith.constant 0 : index
    %c0_260 = arith.constant 0 : index
    %621 = vector.load %arg2[%620, %c0_259, %c0_260] : memref<8x16x512xbf16, #tpu.memory_space<vmem>>, vector<1x16x512xbf16>
    %622 = vector.shape_cast %621 : vector<1x16x512xbf16> to vector<16x512xbf16>
    %623 = arith.extf %622 : vector<16x512xbf16> to vector<16x512xf32>
    %c0_261 = arith.constant 0 : index
    %c0_262 = arith.constant 0 : index
    %624 = vector.load %arg9[%c0_261, %c0_262] : memref<16x128xf32, #tpu.memory_space<vmem>>, vector<16x128xf32>
    %c0_263 = arith.constant 0 : index
    %c0_264 = arith.constant 0 : index
    %625 = vector.load %arg10[%c0_263, %c0_264] : memref<16x128xf32, #tpu.memory_space<vmem>>, vector<16x128xf32>
    %cst_265 = arith.constant dense<0.000000e+00> : vector<16x512xf32>
    %626 = tpu.matmul %624, %4, %cst_265 {dimension_numbers = #tpu.dot_dimension_numbers<[1], [0], [0], [1], [0, 0, 1, 1], [], []>} : vector<16x128xf32>, vector<128x512xf32>, vector<16x512xf32> -> vector<16x512xf32>
    %627 = arith.addf %623, %626 : vector<16x512xf32>
    %628 = vector.extract_strided_slice %627 {offsets = [0, 0], sizes = [16, 128], strides = [1, 1]} : vector<16x512xf32> to vector<16x128xf32>
    %629 = arith.negf %628 : vector<16x128xf32>
    %630 = math.exp %629 : vector<16x128xf32>
    %cst_266 = arith.constant 1.000000e+00 : f32
    %631 = vector.broadcast %cst_266 : f32 to vector<16x128xf32>
    %632 = arith.addf %631, %630 : vector<16x128xf32>
    %633 = arith.divf %631, %632 : vector<16x128xf32>
    %634 = vector.extract_strided_slice %627 {offsets = [0, 128], sizes = [16, 128], strides = [1, 1]} : vector<16x512xf32> to vector<16x128xf32>
    %635 = arith.negf %634 : vector<16x128xf32>
    %636 = math.exp %635 : vector<16x128xf32>
    %cst_267 = arith.constant 1.000000e+00 : f32
    %637 = vector.broadcast %cst_267 : f32 to vector<16x128xf32>
    %638 = arith.addf %637, %636 : vector<16x128xf32>
    %639 = arith.divf %637, %638 : vector<16x128xf32>
    %640 = vector.extract_strided_slice %627 {offsets = [0, 256], sizes = [16, 128], strides = [1, 1]} : vector<16x512xf32> to vector<16x128xf32>
    %641 = math.tanh %640 : vector<16x128xf32>
    %642 = vector.extract_strided_slice %627 {offsets = [0, 384], sizes = [16, 128], strides = [1, 1]} : vector<16x512xf32> to vector<16x128xf32>
    %643 = arith.negf %642 : vector<16x128xf32>
    %644 = math.exp %643 : vector<16x128xf32>
    %cst_268 = arith.constant 1.000000e+00 : f32
    %645 = vector.broadcast %cst_268 : f32 to vector<16x128xf32>
    %646 = arith.addf %645, %644 : vector<16x128xf32>
    %647 = arith.divf %645, %646 : vector<16x128xf32>
    %648 = arith.mulf %639, %625 : vector<16x128xf32>
    %649 = arith.mulf %633, %641 : vector<16x128xf32>
    %650 = arith.addf %648, %649 : vector<16x128xf32>
    %651 = math.tanh %650 : vector<16x128xf32>
    %652 = arith.mulf %647, %651 : vector<16x128xf32>
    %c0_269 = arith.constant 0 : index
    %c0_270 = arith.constant 0 : index
    %653 = vector.load %arg9[%c0_269, %c0_270] : memref<16x128xf32, #tpu.memory_space<vmem>>, vector<16x128xf32>
    tpu.vector_store %arg9[%c0_269, %c0_270], %652 {strides = array<i32>} : memref<16x128xf32, #tpu.memory_space<vmem>>, vector<16x128xf32>,
    %c0_271 = arith.constant 0 : index
    %c0_272 = arith.constant 0 : index
    %654 = vector.load %arg10[%c0_271, %c0_272] : memref<16x128xf32, #tpu.memory_space<vmem>>, vector<16x128xf32>
    tpu.vector_store %arg10[%c0_271, %c0_272], %650 {strides = array<i32>} : memref<16x128xf32, #tpu.memory_space<vmem>>, vector<16x128xf32>,
    %655 = arith.truncf %652 : vector<16x128xf32> to vector<16x128xbf16>
    %c7_i32_273 = arith.constant 7 : i32
    %656 = arith.subi %c7_i32_273, %c7_i32_241 : i32
    %657 = arith.index_cast %656 : i32 to index
    %c0_274 = arith.constant 0 : index
    %c0_275 = arith.constant 0 : index
    %658 = vector.load %arg6[%657, %c0_274, %c0_275] : memref<8x16x128xbf16, #tpu.memory_space<vmem>>, vector<1x16x128xbf16>
    %659 = vector.shape_cast %658 : vector<1x16x128xbf16> to vector<16x128xbf16>
    %660 = vector.shape_cast %655 : vector<16x128xbf16> to vector<1x16x128xbf16>
    tpu.vector_store %arg6[%657, %c0_274, %c0_275], %660 {strides = array<i32>} : memref<8x16x128xbf16, #tpu.memory_space<vmem>>, vector<1x16x128xbf16>,
    %c8_i32 = arith.constant 8 : i32
    return
  }
  func.func @transform_0(%arg0: i32) -> (i32, i32, i32) {
    %c0_i32 = arith.constant 0 : i32
    %c0_i32_0 = arith.constant 0 : i32
    %c0_i32_1 = arith.constant 0 : i32
    return %arg0, %c0_i32, %c0_i32_0 : i32, i32, i32
  }
  func.func @transform_1(%arg0: i32) -> (i32, i32, i32) {
    %c0_i32 = arith.constant 0 : i32
    %0 = arith.subi %c0_i32, %arg0 : i32
    %c0_i32_0 = arith.constant 0 : i32
    %c1_i32 = arith.constant 1 : i32
    %c0_i32_1 = arith.constant 0 : i32
    return %0, %c0_i32_0, %c1_i32 : i32, i32, i32
  }
  func.func @transform_2(%arg0: i32) -> (i32, i32) {
    %c0_i32 = arith.constant 0 : i32
    %c0_i32_0 = arith.constant 0 : i32
    %c0_i32_1 = arith.constant 0 : i32
    return %c0_i32, %c0_i32_0 : i32, i32
  }
  func.func @transform_3(%arg0: i32) -> (i32, i32) {
    %c0_i32 = arith.constant 0 : i32
    %c0_i32_0 = arith.constant 0 : i32
    %c0_i32_1 = arith.constant 0 : i32
    return %c0_i32, %c0_i32_0 : i32, i32
  }
  func.func @transform_4(%arg0: i32) -> (i32, i32, i32) {
    %c0_i32 = arith.constant 0 : i32
    %c0_i32_0 = arith.constant 0 : i32
    %c0_i32_1 = arith.constant 0 : i32
    return %arg0, %c0_i32, %c0_i32_0 : i32, i32, i32
  }
  func.func @transform_5(%arg0: i32) -> (i32, i32, i32) {
    %c0_i32 = arith.constant 0 : i32
    %0 = arith.subi %c0_i32, %arg0 : i32
    %c0_i32_0 = arith.constant 0 : i32
    %c0_i32_1 = arith.constant 0 : i32
    %c0_i32_2 = arith.constant 0 : i32
    return %0, %c0_i32_0, %c0_i32_1 : i32, i32, i32
  }
}

module attributes {stable_mosaic.version = 11 : i64} {
  func.func @_dual_matmul_bias_kernel(%arg0: i32, %arg1: memref<128x128xbf16, #tpu.memory_space<vmem>>, %arg2: memref<128x128xbf16, #tpu.memory_space<vmem>>, %arg3: memref<128x128xbf16, #tpu.memory_space<vmem>>, %arg4: memref<128x128xbf16, #tpu.memory_space<vmem>>, %arg5: memref<1x128xf32, #tpu.memory_space<vmem>>, %arg6: memref<128x128xf32, #tpu.memory_space<vmem>>) attributes {dimension_semantics = [#tpu.dimension_semantics<parallel>], iteration_bounds = array<i64: 1>, scalar_prefetch = 0 : i64, scratch_operands = 0 : i64, tpu.core_type = #tpu.core_type<tc>, window_params = [{transform_indices = @transform_0, window_bounds = array<i64: 128, 128>}, {transform_indices = @transform_1, window_bounds = array<i64: 128, 128>}, {pipeline_mode = #tpu.pipeline_mode<synchronous>, transform_indices = @transform_2, window_bounds = array<i64: 128, 128>}, {pipeline_mode = #tpu.pipeline_mode<synchronous>, transform_indices = @transform_3, window_bounds = array<i64: 128, 128>}, {pipeline_mode = #tpu.pipeline_mode<synchronous>, transform_indices = @transform_4, window_bounds = array<i64: 1, 128>}, {transform_indices = @transform_5, window_bounds = array<i64: 128, 128>}]} {
    %c0 = arith.constant 0 : index
    %c0_0 = arith.constant 0 : index
    %0 = vector.load %arg1[%c0, %c0_0] : memref<128x128xbf16, #tpu.memory_space<vmem>>, vector<128x128xbf16>
    %c0_1 = arith.constant 0 : index
    %c0_2 = arith.constant 0 : index
    %1 = vector.load %arg3[%c0_1, %c0_2] : memref<128x128xbf16, #tpu.memory_space<vmem>>, vector<128x128xbf16>
    %cst = arith.constant dense<0.000000e+00> : vector<128x128xf32>
    %2 = tpu.matmul %0, %1, %cst {dimension_numbers = #tpu.dot_dimension_numbers<[1], [0], [0], [1], [0, 0, 1, 1], [], []>} : vector<128x128xbf16>, vector<128x128xbf16>, vector<128x128xf32> -> vector<128x128xf32>
    %c0_3 = arith.constant 0 : index
    %c0_4 = arith.constant 0 : index
    %3 = vector.load %arg2[%c0_3, %c0_4] : memref<128x128xbf16, #tpu.memory_space<vmem>>, vector<128x128xbf16>
    %c0_5 = arith.constant 0 : index
    %c0_6 = arith.constant 0 : index
    %4 = vector.load %arg4[%c0_5, %c0_6] : memref<128x128xbf16, #tpu.memory_space<vmem>>, vector<128x128xbf16>
    %cst_7 = arith.constant dense<0.000000e+00> : vector<128x128xf32>
    %5 = tpu.matmul %3, %4, %cst_7 {dimension_numbers = #tpu.dot_dimension_numbers<[1], [0], [0], [1], [0, 0, 1, 1], [], []>} : vector<128x128xbf16>, vector<128x128xbf16>, vector<128x128xf32> -> vector<128x128xf32>
    %6 = arith.addf %2, %5 : vector<128x128xf32>
    %c0_8 = arith.constant 0 : index
    %c0_9 = arith.constant 0 : index
    %7 = vector.load %arg5[%c0_8, %c0_9] : memref<1x128xf32, #tpu.memory_space<vmem>>, vector<1x128xf32>
    %8 = vector.broadcast %7 : vector<1x128xf32> to vector<128x128xf32>
    %9 = arith.addf %6, %8 : vector<128x128xf32>
    %c0_10 = arith.constant 0 : index
    %c0_11 = arith.constant 0 : index
    %10 = vector.load %arg6[%c0_10, %c0_11] : memref<128x128xf32, #tpu.memory_space<vmem>>, vector<128x128xf32>
    tpu.vector_store %arg6[%c0_10, %c0_11], %9 {strides = array<i32>} : memref<128x128xf32, #tpu.memory_space<vmem>>, vector<128x128xf32>,
    return
  }
  func.func @transform_0(%arg0: i32) -> (i32, i32) {
    %c0_i32 = arith.constant 0 : i32
    %c0_i32_0 = arith.constant 0 : i32
    return %arg0, %c0_i32 : i32, i32
  }
  func.func @transform_1(%arg0: i32) -> (i32, i32) {
    %c0_i32 = arith.constant 0 : i32
    %c0_i32_0 = arith.constant 0 : i32
    return %arg0, %c0_i32 : i32, i32
  }
  func.func @transform_2(%arg0: i32) -> (i32, i32) {
    %c0_i32 = arith.constant 0 : i32
    %c0_i32_0 = arith.constant 0 : i32
    %c0_i32_1 = arith.constant 0 : i32
    return %c0_i32, %c0_i32_0 : i32, i32
  }
  func.func @transform_3(%arg0: i32) -> (i32, i32) {
    %c0_i32 = arith.constant 0 : i32
    %c0_i32_0 = arith.constant 0 : i32
    %c0_i32_1 = arith.constant 0 : i32
    return %c0_i32, %c0_i32_0 : i32, i32
  }
  func.func @transform_4(%arg0: i32) -> (i32, i32) {
    %c0_i32 = arith.constant 0 : i32
    %c0_i32_0 = arith.constant 0 : i32
    %c0_i32_1 = arith.constant 0 : i32
    return %c0_i32, %c0_i32_0 : i32, i32
  }
  func.func @transform_5(%arg0: i32) -> (i32, i32) {
    %c0_i32 = arith.constant 0 : i32
    %c0_i32_0 = arith.constant 0 : i32
    return %arg0, %c0_i32 : i32, i32
  }
}

</mosaic_0001>

<bundles_post_ra>
// kernel: bidirectional_lstm_pallas.3
= control target key start
LH: loop header
LB: loop body
LE: loop exit
PB: predicated region body
PF: predicated region fallthrough
CT: control target
= control target key end

     0   :  { %s1280_s12 = smov 0   ;;  %s1282_s13 = smov 0   ;;  %s1572_s0 = inlined_call_operand.vmem [shape: bf16[128,32], index: 0, kind: input, shape index: {}]   ;;  %s1573_s1 = inlined_call_operand.vmem [shape: bf16[32,1024], index: 1, kind: input, shape index: {}]   ;;  %s1574_s2 = inlined_call_operand.vmem [shape: f32[1,1024], index: 2, kind: input, shape index: {}]   ;;  %s1575_s3 = inlined_call_operand.vmem [shape: bf16[128,1024], index: 3, kind: output, shape index: {}]  }
   0x1   :  { %s1284_s14 = smov 0   ;;  %s1286_s15 = smov 0  }
   0x2   :  { %s1288_s16 = smov 0  }
   0x3 LB: > { %s22_s17 = sadd.s32 1, %s1253_s15  ;;  %s1043_s18 = sadd.s32 4294967295, %s1257_s16   ;;  %s1257_s16 = sphi %s1288_s16, %s13_s16   ;;  %s1253_s15 = sphi %s1286_s15, %s1580_s15   ;;  %s1249_s14 = sphi %s1284_s14, %s1579_s14   ;;  %s1245_s13 = sphi %s1282_s13, %s1578_s13   ;;  %s1241_s12 = sphi %s1280_s12, %s1577_s12  }
   0x4   : > { %p23_p0 = scmp.ge.s32.totalorder %s22_s17, 2  ;;  %p65_p1 = scmp.ne.s32.totalorder %s1245_s13, %s1241_s12 }
   0x5   : > { %p66_p2 = scmp.eq.s32.totalorder %s1257_s16, 0  ;;  %p123_p4 = scmp.eq.s32.totalorder %s1043_s18, 1 }
   0x6   : > { %s1582_s17 = smov (%p23_p0, %s22_s17), 0  ;;  %s58_s20 = sadd.s32 1, %s1245_s13 }
   0x7   : > { %p67_p3 = por %p66_p2, %p65_p1  ;;  %s55_s19 = ssub.s32 %s1253_s15, %s1582_s17 }
   0x8   : > { %p56_p5 = scmp.eq.s32.totalorder %s55_s19, 0  ;;  %p1315_p6 = por %p123_p4, %p65_p1 }
   0x9   : > { %p1047_p7 = scmp.ge.s32.totalorder %s1257_s16, 2 }
   0xa   : > { %s1320_s22 = scalar_select %p56_p5, %s1245_s13, %s58_s20  }
   0xb   : > { %154 = sbr.rel (%p1047_p7) target bundleno = 26 (0x1a), region = 20 }
  0x12   : > { %157 = sbr.rel (!%p67_p3) target bundleno = 26 (0x1a), region = 24  ;;  %s159_s23 = sand.u32 (%p67_p3), 1, %s1245_s13  }
  0x13   : > { %s1124_s24 = sshll.u32 (%p67_p3), %s1253_s15, 4  ;;  %s1048_s25 = sshll.u32 (%p67_p3), %s159_s23, 6 }
  0x14   : > { %s164_s28 = scalar_lea.vmem (%p67_p3), %s1573_s1, %s1124_s24  ;;  %s161_s29 = scalar_lea.vmem (%p67_p3), [#allocation2], %s1048_s25 }
  0x15   : > { %v177_v0 = vld [vmem:[%s164_s28] sm:$0xff] (%p67_p3)  ;;  %v179_v1 = vld [vmem:[%s164_s28 + $0x8] sm:$0xff] (%p67_p3) }
  0x16   : > { %v181_v2 = vld [vmem:[%s164_s28 + $0x20] sm:$0xff] (%p67_p3)  ;;  %178 = vst [vmem:[%s161_s29] sm:$0xff] (%p67_p3), %v177_v0  ;;  %180 = vst [vmem:[%s161_s29 + $0x8] sm:$0xff] (%p67_p3), %v179_v1  ;;  %v183_v3 = vld [vmem:[%s164_s28 + $0x28] sm:$0xff] (%p67_p3) }
  0x17   : > { %182 = vst [vmem:[%s161_s29 + $0x10] sm:$0xff] (%p67_p3), %v181_v2  ;;  %v185_v4 = vld [vmem:[%s164_s28 + $0x40] sm:$0xff] (%p67_p3)  ;;  %v187_v5 = vld [vmem:[%s164_s28 + $0x48] sm:$0xff] (%p67_p3)  ;;  %184 = vst [vmem:[%s161_s29 + $0x18] sm:$0xff] (%p67_p3), %v183_v3 }
  0x18   : > { %186 = vst [vmem:[%s161_s29 + $0x20] sm:$0xff] (%p67_p3), %v185_v4  ;;  %188 = vst [vmem:[%s161_s29 + $0x28] sm:$0xff] (%p67_p3), %v187_v5  ;;  %v189_v6 = vld [vmem:[%s164_s28 + $0x60] sm:$0xff] (%p67_p3)  ;;  %v191_v7 = vld [vmem:[%s164_s28 + $0x68] sm:$0xff] (%p67_p3) }
  0x19   : > { %190 = vst [vmem:[%s161_s29 + $0x30] sm:$0xff] %v189_v6  ;;  %192 = vst [vmem:[%s161_s29 + $0x38] sm:$0xff] %v191_v7 }
  0x1a PF: > { %p1051_p8 = scmp.ge.s32.totalorder %s1257_s16, 1  ;;  %p205_p9 = scmp.lt.s32.totalorder %s1257_s16, 3 }
  0x1c   : > { %p206_p10 = pnand %p1051_p8, %p205_p9 }
  0x1d   : > { %s212_s30 = sand.u32 (!%p206_p10), 1, %s1241_s12   ;;  %v1259_v8 = vmov (!%p206_p10), 0   ;;  %v1211_v17 = vld [vmem:[%s1572_s0] sm:$0xff] (!%p206_p10)   ;;  %vm384_vm0 = vcmask (!%p206_p10), 261120   ;;  %v1212_v18 = vld [vmem:[%s1572_s0 + $0x8] sm:$0xff] (!%p206_p10)   ;;  %v1213_v19 = vld [vmem:[%s1572_s0 + $0x10] sm:$0xff] (!%p206_p10)   ;;  %v284_v25 = vlaneseq (!%p206_p10) }
  0x1e   : > { %209 = sbr.rel (%p206_p10) target bundleno = 325 (0x145), region = 51  ;;  %s1052_s4 = sshll.u32 (!%p206_p10), %s212_s30, 6  ;;  %441 = vmatprep.mubr.bf16.mxu0 (!%p206_p10), %v1259_v8  ;;  %554 = vmatprep.mubr.bf16.mxu1 (!%p206_p10), %v1259_v8  ;;  %v1214_v20 = vld [vmem:[%s1572_s0 + $0x18] sm:$0xff] (!%p206_p10)   ;;  %v1215_v21 = vld [vmem:[%s1572_s0 + $0x20] sm:$0xff] (!%p206_p10)   ;;  %v1216_v22 = vld [vmem:[%s1572_s0 + $0x28] sm:$0xff] (!%p206_p10)  }
  0x1f   : > { %s214_s5 = scalar_lea.vmem (!%p206_p10), [#allocation2], %s1052_s4  ;;  %v1217_v23 = vld [vmem:[%s1572_s0 + $0x30] sm:$0xff] (!%p206_p10)   ;;  %v1218_v24 = vld [vmem:[%s1572_s0 + $0x38] sm:$0xff] (!%p206_p10)   ;;  %s1054_s4 = sshll.u32 (!%p206_p10), %s1249_s14, 2  ;;  %v285_v26 = vshrl.u32 (!%p206_p10), %v284_v25, 7 }
  0x20   : > { %v1199_v9 = vld [vmem:[%s214_s5 + $0x4] ss:$16 sps:$4 sm:$0xff] (!%p206_p10)   ;;  %v1201_v10 = vld [vmem:[%s214_s5 + $0xc] ss:$16 sps:$4 sm:$0xff] (!%p206_p10)   ;;  %v1203_v11 = vld [vmem:[%s214_s5] ss:$16 sps:$4 sm:$0xff] (!%p206_p10)  }
  0x21   : > { %409 = vmatprep.subr.bf16.mxu0 (!%p206_p10), %v1199_v9  ;;  %v1204_v12 = vld [vmem:[%s214_s5 + $0x8] ss:$16 sps:$4 sm:$0xff] (!%p206_p10)   ;;  %522 = vmatprep.subr.bf16.mxu1 (!%p206_p10), %v1201_v10  ;;  %v1205_v13 = vld [vmem:[%s214_s5 + $0x24] ss:$16 sps:$4 sm:$0xff] (!%p206_p10)   ;;  %v1207_v14 = vld [vmem:[%s214_s5 + $0x2c] ss:$16 sps:$4 sm:$0xff] (!%p206_p10)  }
  0x22   : > { %410 = vmatpush1.bf16.msra.mxu0 (!%p206_p10), %v1203_v11  ;;  %523 = vmatpush1.bf16.msra.mxu1 (!%p206_p10), %v1204_v12  ;;  %v1209_v15 = vld [vmem:[%s214_s5 + $0x20] ss:$16 sps:$4 sm:$0xff] (!%p206_p10)   ;;  %v1210_v16 = vld [vmem:[%s214_s5 + $0x28] ss:$16 sps:$4 sm:$0xff] (!%p206_p10)   ;;  %p251_p11 = scmp.lt.s32.totalorder (!%p206_p10), %s1054_s4, 7  ;;  %v286_v27 = vsub.s32 (!%p206_p10), 0, %v285_v26 }
  0x23   : > { %411 = vmatprep.subr.bf16.mxu0 (!%p206_p10), %v1205_v13  ;;  %524 = vmatprep.subr.bf16.mxu1 (!%p206_p10), %v1207_v14  ;;  %v294_v28 = vsub.s32 (!%p206_p10), 2, %v285_v26  ;;  %v290_v30 = vsub.s32 (!%p206_p10), 1, %v285_v26  ;;  %v298_v31 = vsub.s32 (!%p206_p10), 3, %v285_v26  ;;  %s1053_s8 = sshll.u32 (!%p206_p10), %s212_s30, 8 }
  0x24   : > { %s1395_s12 = scalar_lea.vmem (!%p206_p10), [#allocation3], %s1053_s8 }
  0x25   : > { %s1584_s4 = smov (!%p251_p11, %s1054_s4), 7  ;;  %s1157_s30 = sshll.u32 (%p1315_p6), %s1249_s14, 4 }
  0x26   : > { %412 = vmatpush1.bf16.msra.mxu0 %v1209_v15  ;;  %525 = vmatpush1.bf16.msra.mxu1 %v1210_v16  ;;  %s253_s7 = scalar_lea.vmem %s1574_s2, %s1584_s4  ;;  %s1494_s11 = scalar_lea.vmem (%p1315_p6), %s1575_s3, %s1157_s30 }
  0x27   : > { %v282_v29 = vld [vmem:[%s253_s7] sm:$0xf] }
  0x28   : > { %v1377_v32 = vrot.slane %v282_v29, %v286_v27  ;;  %v1379_v33 = vrot.slane %v282_v29, %v294_v28  ;;  %v1381_v34 = vrot.slane %v282_v29, %v290_v30  ;;  %v1383_v35 = vrot.slane %v282_v29, %v298_v31 }
  0x29   : > { %1071 = vmatmul.mubr.msk.bf16.vlgmr.msra.gmra.mrb[0].mxu0 %vm384_vm0, %v1211_v17  ;;  %1079 = vmatmul.mubr.msk.bf16.vlgmr.msra.gmra.mrb[0].mxu1 %vm384_vm0, %v1211_v17 }
  0x2a   : > { %451 = vmatprep.mubr.bf16.mxu0 %v1259_v8  ;;  %564 = vmatprep.mubr.bf16.mxu1 %v1259_v8 }
  0x31   : > { %1072 = vmatmul.mubr.msk.bf16.gmra.mrb[4].mxu0 %vm384_vm0, %v1212_v18  ;;  %1080 = vmatmul.mubr.msk.bf16.gmra.mrb[4].mxu1 %vm384_vm0, %v1212_v18 }
  0x32   : > { %461 = vmatprep.mubr.bf16.mxu0 %v1259_v8  ;;  %574 = vmatprep.mubr.bf16.mxu1 %v1259_v8 }
  0x39   : > { %1073 = vmatmul.mubr.msk.bf16.gmra.mrb[8].mxu0 %vm384_vm0, %v1213_v19  ;;  %1081 = vmatmul.mubr.msk.bf16.gmra.mrb[8].mxu1 %vm384_vm0, %v1213_v19 }
  0x3a   : > { %471 = vmatprep.mubr.bf16.mxu0 %v1259_v8  ;;  %584 = vmatprep.mubr.bf16.mxu1 %v1259_v8 }
  0x41   : > { %1074 = vmatmul.mubr.msk.bf16.gmra.mrb[12].mxu0 %vm384_vm0, %v1214_v20  ;;  %1082 = vmatmul.mubr.msk.bf16.gmra.mrb[12].mxu1 %vm384_vm0, %v1214_v20 }
  0x42   : > { %481 = vmatprep.mubr.bf16.mxu0 %v1259_v8  ;;  %594 = vmatprep.mubr.bf16.mxu1 %v1259_v8 }
  0x49   : > { %1075 = vmatmul.mubr.msk.bf16.gmra.mrb[16].mxu0 %vm384_vm0, %v1215_v21  ;;  %1083 = vmatmul.mubr.msk.bf16.gmra.mrb[16].mxu1 %vm384_vm0, %v1215_v21 }
  0x4a   : > { %491 = vmatprep.mubr.bf16.mxu0 %v1259_v8  ;;  %604 = vmatprep.mubr.bf16.mxu1 %v1259_v8 }
  0x51   : > { %1076 = vmatmul.mubr.msk.bf16.gmra.mrb[20].mxu0 %vm384_vm0, %v1216_v22  ;;  %1084 = vmatmul.mubr.msk.bf16.gmra.mrb[20].mxu1 %vm384_vm0, %v1216_v22 }
  0x52   : > { %501 = vmatprep.mubr.bf16.mxu0 %v1259_v8  ;;  %614 = vmatprep.mubr.bf16.mxu1 %v1259_v8 }
  0x59   : > { %1077 = vmatmul.mubr.msk.bf16.gmra.mrb[24].mxu0 %vm384_vm0, %v1217_v23  ;;  %1085 = vmatmul.mubr.msk.bf16.gmra.mrb[24].mxu1 %vm384_vm0, %v1217_v23 }
  0x5a   : > { %511 = vmatprep.mubr.bf16.mxu0 %v1259_v8  ;;  %624 = vmatprep.mubr.bf16.mxu1 %v1259_v8 }
  0x61   : > { %1078 = vmatmul.mubr.msk.bf16.gmra.mrb[28].mxu0 %vm384_vm0, %v1218_v24  ;;  %1086 = vmatmul.mubr.msk.bf16.gmra.mrb[28].mxu1 %vm384_vm0, %v1218_v24 }
  0xfc   : > { %v443_v36 = vpop.f32.mrb[0].mxu0  ;;  %v556_v37 = vpop.f32.mrb[0].mxu1 }
  0xfd   : > { %v444_v38 = vadd.f32 %v443_v36, %v1377_v32  ;;  %v557_v39 = vadd.f32 %v556_v37, %v1379_v33  ;;  %v445_v40 = vpop.f32.mrb[1].mxu0  ;;  %v558_v41 = vpop.f32.mrb[1].mxu1 }
  0xfe   : > { %v446_v42 = vadd.f32 %v445_v40, %v1381_v34  ;;  %v559_v43 = vadd.f32 %v558_v41, %v1383_v35  ;;  %v447_v44 = vpop.f32.mrb[2].mxu0  ;;  %v560_v45 = vpop.f32.mrb[2].mxu1 }
  0xff   : > { %v448_v46 = vadd.f32 %v447_v44, %v1377_v32  ;;  %v561_v47 = vadd.f32 %v560_v45, %v1379_v33  ;;  %v449_v48 = vpop.f32.mrb[3].mxu0  ;;  %v562_v49 = vpop.f32.mrb[3].mxu1 }
 0x100   : > { %v1125_v50 = vpack.c.bf16 %v446_v42, %v444_v38  ;;  %v1126_v51 = vpack.c.bf16 %v559_v43, %v557_v39  ;;  %v450_v52 = vadd.f32 %v449_v48, %v1381_v34  ;;  %v563_v53 = vadd.f32 %v562_v49, %v1383_v35 }
 0x102   : > { %827 = vst [vmem:[%s1395_s12] sm:$0xff] %v1125_v50  ;;  %828 = vst [vmem:[%s1395_s12 + $0x8] sm:$0xff] %v1126_v51  ;;  %v1127_v54 = vpack.c.bf16 %v450_v52, %v448_v46  ;;  %v1128_v55 = vpack.c.bf16 %v563_v53, %v561_v47 }
 0x104   : > { %829 = vst [vmem:[%s1395_s12 + $0x10] sm:$0xff] %v1127_v54  ;;  %830 = vst [vmem:[%s1395_s12 + $0x18] sm:$0xff] %v1128_v55  ;;  %v453_v56 = vpop.f32.mrb[4].mxu0  ;;  %v566_v57 = vpop.f32.mrb[4].mxu1 }
 0x105   : > { %v454_v58 = vadd.f32 %v453_v56, %v1377_v32  ;;  %v567_v59 = vadd.f32 %v566_v57, %v1379_v33  ;;  %v455_v60 = vpop.f32.mrb[5].mxu0  ;;  %v568_v61 = vpop.f32.mrb[5].mxu1 }
 0x106   : > { %v456_v62 = vadd.f32 %v455_v60, %v1381_v34  ;;  %v569_v63 = vadd.f32 %v568_v61, %v1383_v35  ;;  %v457_v0 = vpop.f32.mrb[6].mxu0  ;;  %v570_v1 = vpop.f32.mrb[6].mxu1 }
 0x107   : > { %v458_v2 = vadd.f32 %v457_v0, %v1377_v32  ;;  %v571_v3 = vadd.f32 %v570_v1, %v1379_v33  ;;  %v459_v4 = vpop.f32.mrb[7].mxu0  ;;  %v572_v5 = vpop.f32.mrb[7].mxu1 }
 0x108   : > { %v1129_v6 = vpack.c.bf16 %v456_v62, %v454_v58  ;;  %v1130_v7 = vpack.c.bf16 %v569_v63, %v567_v59  ;;  %v460_v8 = vadd.f32 %v459_v4, %v1381_v34  ;;  %v573_v9 = vadd.f32 %v572_v5, %v1383_v35 }
 0x10a   : > { %831 = vst [vmem:[%s1395_s12 + $0x20] sm:$0xff] %v1129_v6  ;;  %832 = vst [vmem:[%s1395_s12 + $0x28] sm:$0xff] %v1130_v7  ;;  %v1131_v10 = vpack.c.bf16 %v460_v8, %v458_v2  ;;  %v1132_v11 = vpack.c.bf16 %v573_v9, %v571_v3 }
 0x10c   : > { %833 = vst [vmem:[%s1395_s12 + $0x30] sm:$0xff] %v1131_v10  ;;  %834 = vst [vmem:[%s1395_s12 + $0x38] sm:$0xff] %v1132_v11  ;;  %v463_v12 = vpop.f32.mrb[8].mxu0  ;;  %v576_v13 = vpop.f32.mrb[8].mxu1 }
 0x10d   : > { %v464_v14 = vadd.f32 %v463_v12, %v1377_v32  ;;  %v577_v15 = vadd.f32 %v576_v13, %v1379_v33  ;;  %v465_v16 = vpop.f32.mrb[9].mxu0  ;;  %v578_v17 = vpop.f32.mrb[9].mxu1 }
 0x10e   : > { %v466_v18 = vadd.f32 %v465_v16, %v1381_v34  ;;  %v579_v19 = vadd.f32 %v578_v17, %v1383_v35  ;;  %v467_v20 = vpop.f32.mrb[10].mxu0  ;;  %v580_v21 = vpop.f32.mrb[10].mxu1 }
 0x10f   : > { %v468_v22 = vadd.f32 %v467_v20, %v1377_v32  ;;  %v581_v23 = vadd.f32 %v580_v21, %v1379_v33  ;;  %v469_v24 = vpop.f32.mrb[11].mxu0  ;;  %v582_v25 = vpop.f32.mrb[11].mxu1 }
 0x110   : > { %v1133_v26 = vpack.c.bf16 %v466_v18, %v464_v14  ;;  %v1134_v27 = vpack.c.bf16 %v579_v19, %v577_v15  ;;  %v470_v28 = vadd.f32 %v469_v24, %v1381_v34  ;;  %v583_v29 = vadd.f32 %v582_v25, %v1383_v35 }
 0x112   : > { %835 = vst [vmem:[%s1395_s12 + $0x40] sm:$0xff] %v1133_v26  ;;  %836 = vst [vmem:[%s1395_s12 + $0x48] sm:$0xff] %v1134_v27  ;;  %v1135_v30 = vpack.c.bf16 %v470_v28, %v468_v22  ;;  %v1136_v31 = vpack.c.bf16 %v583_v29, %v581_v23 }
 0x114   : > { %837 = vst [vmem:[%s1395_s12 + $0x50] sm:$0xff] %v1135_v30  ;;  %838 = vst [vmem:[%s1395_s12 + $0x58] sm:$0xff] %v1136_v31  ;;  %v473_v36 = vpop.f32.mrb[12].mxu0  ;;  %v586_v37 = vpop.f32.mrb[12].mxu1 }
 0x115   : > { %v474_v38 = vadd.f32 %v473_v36, %v1377_v32  ;;  %v587_v39 = vadd.f32 %v586_v37, %v1379_v33  ;;  %v475_v40 = vpop.f32.mrb[13].mxu0  ;;  %v588_v41 = vpop.f32.mrb[13].mxu1 }
 0x116   : > { %v476_v42 = vadd.f32 %v475_v40, %v1381_v34  ;;  %v589_v43 = vadd.f32 %v588_v41, %v1383_v35  ;;  %v477_v44 = vpop.f32.mrb[14].mxu0  ;;  %v590_v45 = vpop.f32.mrb[14].mxu1 }
 0x117   : > { %v478_v46 = vadd.f32 %v477_v44, %v1377_v32  ;;  %v591_v47 = vadd.f32 %v590_v45, %v1379_v33  ;;  %v479_v48 = vpop.f32.mrb[15].mxu0  ;;  %v592_v49 = vpop.f32.mrb[15].mxu1 }
 0x118   : > { %v1137_v50 = vpack.c.bf16 %v476_v42, %v474_v38  ;;  %v1138_v51 = vpack.c.bf16 %v589_v43, %v587_v39  ;;  %v480_v52 = vadd.f32 %v479_v48, %v1381_v34  ;;  %v593_v53 = vadd.f32 %v592_v49, %v1383_v35 }
 0x11a   : > { %839 = vst [vmem:[%s1395_s12 + $0x60] sm:$0xff] %v1137_v50  ;;  %840 = vst [vmem:[%s1395_s12 + $0x68] sm:$0xff] %v1138_v51  ;;  %v1139_v54 = vpack.c.bf16 %v480_v52, %v478_v46  ;;  %v1140_v55 = vpack.c.bf16 %v593_v53, %v591_v47 }
 0x11c   : > { %841 = vst [vmem:[%s1395_s12 + $0x70] sm:$0xff] %v1139_v54  ;;  %842 = vst [vmem:[%s1395_s12 + $0x78] sm:$0xff] %v1140_v55  ;;  %v483_v56 = vpop.f32.mrb[16].mxu0  ;;  %v596_v57 = vpop.f32.mrb[16].mxu1 }
 0x11d   : > { %v484_v58 = vadd.f32 %v483_v56, %v1377_v32  ;;  %v597_v59 = vadd.f32 %v596_v57, %v1379_v33  ;;  %v485_v60 = vpop.f32.mrb[17].mxu0  ;;  %v598_v61 = vpop.f32.mrb[17].mxu1 }
 0x11e   : > { %v486_v62 = vadd.f32 %v485_v60, %v1381_v34  ;;  %v599_v63 = vadd.f32 %v598_v61, %v1383_v35  ;;  %v487_v0 = vpop.f32.mrb[18].mxu0  ;;  %v600_v1 = vpop.f32.mrb[18].mxu1 }
 0x11f   : > { %v488_v2 = vadd.f32 %v487_v0, %v1377_v32  ;;  %v601_v3 = vadd.f32 %v600_v1, %v1379_v33  ;;  %v489_v4 = vpop.f32.mrb[19].mxu0  ;;  %v602_v5 = vpop.f32.mrb[19].mxu1 }
 0x120   : > { %v1141_v6 = vpack.c.bf16 %v486_v62, %v484_v58  ;;  %v1142_v7 = vpack.c.bf16 %v599_v63, %v597_v59  ;;  %v490_v8 = vadd.f32 %v489_v4, %v1381_v34  ;;  %v603_v9 = vadd.f32 %v602_v5, %v1383_v35 }
 0x122   : > { %843 = vst [vmem:[%s1395_s12 + $0x80] sm:$0xff] %v1141_v6  ;;  %844 = vst [vmem:[%s1395_s12 + $0x88] sm:$0xff] %v1142_v7  ;;  %v1143_v10 = vpack.c.bf16 %v490_v8, %v488_v2  ;;  %v1144_v11 = vpack.c.bf16 %v603_v9, %v601_v3 }
 0x124   : > { %845 = vst [vmem:[%s1395_s12 + $0x90] sm:$0xff] %v1143_v10  ;;  %846 = vst [vmem:[%s1395_s12 + $0x98] sm:$0xff] %v1144_v11  ;;  %v493_v12 = vpop.f32.mrb[20].mxu0  ;;  %v606_v13 = vpop.f32.mrb[20].mxu1 }
 0x125   : > { %v494_v14 = vadd.f32 %v493_v12, %v1377_v32  ;;  %v607_v15 = vadd.f32 %v606_v13, %v1379_v33  ;;  %v495_v16 = vpop.f32.mrb[21].mxu0  ;;  %v608_v17 = vpop.f32.mrb[21].mxu1  ;;  %v892_v12 = vld [vmem:[%s1395_s12 + $0x20] sm:$0xff] (%p1315_p6)  ;;  %v894_v13 = vld [vmem:[%s1395_s12 + $0x28] sm:$0xff] (%p1315_p6) }
 0x126   : > { %v496_v18 = vadd.f32 %v495_v16, %v1381_v34  ;;  %v609_v19 = vadd.f32 %v608_v17, %v1383_v35  ;;  %v497_v20 = vpop.f32.mrb[22].mxu0  ;;  %v610_v21 = vpop.f32.mrb[22].mxu1  ;;  %893 = vst [vmem:[%s1494_s11 + $0x40] sm:$0xff] (%p1315_p6), %v892_v12  ;;  %895 = vst [vmem:[%s1494_s11 + $0x48] sm:$0xff] (%p1315_p6), %v894_v13  ;;  %v900_v16 = vld [vmem:[%s1395_s12 + $0x40] sm:$0xff] (%p1315_p6)  ;;  %v902_v17 = vld [vmem:[%s1395_s12 + $0x48] sm:$0xff] (%p1315_p6) }
 0x127   : > { %v498_v22 = vadd.f32 %v497_v20, %v1377_v32  ;;  %v611_v23 = vadd.f32 %v610_v21, %v1379_v33  ;;  %v499_v24 = vpop.f32.mrb[23].mxu0  ;;  %v612_v25 = vpop.f32.mrb[23].mxu1  ;;  %901 = vst [vmem:[%s1494_s11 + $0x80] sm:$0xff] (%p1315_p6), %v900_v16  ;;  %903 = vst [vmem:[%s1494_s11 + $0x88] sm:$0xff] (%p1315_p6), %v902_v17  ;;  %v908_v20 = vld [vmem:[%s1395_s12 + $0x60] sm:$0xff] (%p1315_p6)  ;;  %v910_v21 = vld [vmem:[%s1395_s12 + $0x68] sm:$0xff] (%p1315_p6) }
 0x128   : > { %v1145_v26 = vpack.c.bf16 %v496_v18, %v494_v14  ;;  %v1146_v27 = vpack.c.bf16 %v609_v19, %v607_v15  ;;  %v500_v28 = vadd.f32 %v499_v24, %v1381_v34  ;;  %v613_v29 = vadd.f32 %v612_v25, %v1383_v35  ;;  %v896_v14 = vld [vmem:[%s1395_s12 + $0x30] sm:$0xff] (%p1315_p6)  ;;  %v898_v15 = vld [vmem:[%s1395_s12 + $0x38] sm:$0xff] (%p1315_p6)  ;;  %909 = vst [vmem:[%s1494_s11 + $0xc0] sm:$0xff] (%p1315_p6), %v908_v20 }
 0x129   : > { %897 = vst [vmem:[%s1494_s11 + $0x60] sm:$0xff] (%p1315_p6), %v896_v14  ;;  %899 = vst [vmem:[%s1494_s11 + $0x68] sm:$0xff] (%p1315_p6), %v898_v15  ;;  %v904_v18 = vld [vmem:[%s1395_s12 + $0x50] sm:$0xff] (%p1315_p6)  ;;  %v906_v19 = vld [vmem:[%s1395_s12 + $0x58] sm:$0xff] (%p1315_p6) }
 0x12a   : > { %847 = vst [vmem:[%s1395_s12 + $0xa0] sm:$0xff] %v1145_v26  ;;  %848 = vst [vmem:[%s1395_s12 + $0xa8] sm:$0xff] %v1146_v27  ;;  %v1147_v30 = vpack.c.bf16 %v500_v28, %v498_v22  ;;  %v1148_v31 = vpack.c.bf16 %v613_v29, %v611_v23  ;;  %v912_v22 = vld [vmem:[%s1395_s12 + $0x70] sm:$0xff] (%p1315_p6)  ;;  %v914_v23 = vld [vmem:[%s1395_s12 + $0x78] sm:$0xff] (%p1315_p6) }
 0x12b   : > { %905 = vst [vmem:[%s1494_s11 + $0xa0] sm:$0xff] (%p1315_p6), %v904_v18  ;;  %907 = vst [vmem:[%s1494_s11 + $0xa8] sm:$0xff] (%p1315_p6), %v906_v19  ;;  %v916_v24 = vld [vmem:[%s1395_s12 + $0x80] sm:$0xff] (%p1315_p6)  ;;  %v918_v25 = vld [vmem:[%s1395_s12 + $0x88] sm:$0xff] (%p1315_p6) }
 0x12c   : > { %849 = vst [vmem:[%s1395_s12 + $0xb0] sm:$0xff] %v1147_v30  ;;  %850 = vst [vmem:[%s1395_s12 + $0xb8] sm:$0xff] %v1148_v31  ;;  %v503_v36 = vpop.f32.mrb[24].mxu0  ;;  %v616_v37 = vpop.f32.mrb[24].mxu1  ;;  %v920_v26 = vld [vmem:[%s1395_s12 + $0x90] sm:$0xff] (%p1315_p6)  ;;  %v922_v27 = vld [vmem:[%s1395_s12 + $0x98] sm:$0xff] (%p1315_p6) }
 0x12d   : > { %v504_v38 = vadd.f32 %v503_v36, %v1377_v32  ;;  %v617_v39 = vadd.f32 %v616_v37, %v1379_v33  ;;  %v505_v40 = vpop.f32.mrb[25].mxu0  ;;  %v618_v41 = vpop.f32.mrb[25].mxu1  ;;  %911 = vst [vmem:[%s1494_s11 + $0xc8] sm:$0xff] (%p1315_p6), %v910_v21  ;;  %913 = vst [vmem:[%s1494_s11 + $0xe0] sm:$0xff] (%p1315_p6), %v912_v22 }
 0x12e   : > { %v506_v42 = vadd.f32 %v505_v40, %v1381_v34  ;;  %v619_v43 = vadd.f32 %v618_v41, %v1383_v35  ;;  %v507_v44 = vpop.f32.mrb[26].mxu0  ;;  %v620_v45 = vpop.f32.mrb[26].mxu1  ;;  %915 = vst [vmem:[%s1494_s11 + $0xe8] sm:$0xff] (%p1315_p6), %v914_v23  ;;  %917 = vst [vmem:[%s1494_s11 + $0x100] sm:$0xff] (%p1315_p6), %v916_v24 }
 0x12f   : > { %v508_v46 = vadd.f32 %v507_v44, %v1377_v32  ;;  %v621_v47 = vadd.f32 %v620_v45, %v1379_v33  ;;  %v509_v48 = vpop.f32.mrb[27].mxu0  ;;  %v622_v49 = vpop.f32.mrb[27].mxu1  ;;  %919 = vst [vmem:[%s1494_s11 + $0x108] sm:$0xff] (%p1315_p6), %v918_v25  ;;  %921 = vst [vmem:[%s1494_s11 + $0x120] sm:$0xff] (%p1315_p6), %v920_v26 }
 0x130   : > { %v1149_v50 = vpack.c.bf16 %v506_v42, %v504_v38  ;;  %v1150_v51 = vpack.c.bf16 %v619_v43, %v617_v39  ;;  %v510_v52 = vadd.f32 %v509_v48, %v1381_v34  ;;  %v623_v53 = vadd.f32 %v622_v49, %v1383_v35  ;;  %923 = vst [vmem:[%s1494_s11 + $0x128] sm:$0xff] (%p1315_p6), %v922_v27 }
 0x131   : > { %v924_v28 = vld [vmem:[%s1395_s12 + $0xa0] sm:$0xff] (%p1315_p6)  ;;  %v926_v29 = vld [vmem:[%s1395_s12 + $0xa8] sm:$0xff] (%p1315_p6) }
 0x132   : > { %851 = vst [vmem:[%s1395_s12 + $0xc0] sm:$0xff] %v1149_v50  ;;  %852 = vst [vmem:[%s1395_s12 + $0xc8] sm:$0xff] %v1150_v51  ;;  %v1151_v54 = vpack.c.bf16 %v510_v52, %v508_v46  ;;  %v1152_v55 = vpack.c.bf16 %v623_v53, %v621_v47 }
 0x133   : > { %925 = vst [vmem:[%s1494_s11 + $0x140] sm:$0xff] (%p1315_p6), %v924_v28  ;;  %v928_v30 = vld [vmem:[%s1395_s12 + $0xb0] sm:$0xff] (%p1315_p6)  ;;  %v930_v31 = vld [vmem:[%s1395_s12 + $0xb8] sm:$0xff] (%p1315_p6)  ;;  %927 = vst [vmem:[%s1494_s11 + $0x148] sm:$0xff] (%p1315_p6), %v926_v29 }
 0x134   : > { %853 = vst [vmem:[%s1395_s12 + $0xd0] sm:$0xff] %v1151_v54  ;;  %854 = vst [vmem:[%s1395_s12 + $0xd8] sm:$0xff] %v1152_v55  ;;  %v513_v56 = vpop.f32.mrb[28].mxu0  ;;  %v626_v57 = vpop.f32.mrb[28].mxu1 }
 0x135   : > { %v514_v58 = vadd.f32 %v513_v56, %v1377_v32  ;;  %v627_v59 = vadd.f32 %v626_v57, %v1379_v33  ;;  %v515_v60 = vpop.f32.mrb[29].mxu0  ;;  %v628_v61 = vpop.f32.mrb[29].mxu1  ;;  %929 = vst [vmem:[%s1494_s11 + $0x160] sm:$0xff] (%p1315_p6), %v928_v30  ;;  %931 = vst [vmem:[%s1494_s11 + $0x168] sm:$0xff] (%p1315_p6), %v930_v31 }
 0x136   : > { %v516_v62 = vadd.f32 %v515_v60, %v1381_v34  ;;  %v629_v63 = vadd.f32 %v628_v61, %v1383_v35  ;;  %v517_v0 = vpop.f32.mrb[30].mxu0  ;;  %v630_v1 = vpop.f32.mrb[30].mxu1  ;;  %865 = sbr.rel (!%p1315_p6) target bundleno = 325 (0x145), region = 59 }
 0x137   : > { %v518_v2 = vadd.f32 %v517_v0, %v1377_v32  ;;  %v631_v3 = vadd.f32 %v630_v1, %v1379_v33  ;;  %v519_v4 = vpop.f32.mrb[31].mxu0  ;;  %v632_v5 = vpop.f32.mrb[31].mxu1  ;;  %v884_v32 = vld [vmem:[%s1395_s12] sm:$0xff] (%p1315_p6)  ;;  %v886_v33 = vld [vmem:[%s1395_s12 + $0x8] sm:$0xff] (%p1315_p6) }
 0x138   : > { %v1153_v6 = vpack.c.bf16 %v516_v62, %v514_v58  ;;  %v1154_v7 = vpack.c.bf16 %v629_v63, %v627_v59  ;;  %v520_v8 = vadd.f32 %v519_v4, %v1381_v34  ;;  %v633_v9 = vadd.f32 %v632_v5, %v1383_v35  ;;  %v888_v34 = vld [vmem:[%s1395_s12 + $0x10] sm:$0xff] (%p1315_p6)  ;;  %v890_v35 = vld [vmem:[%s1395_s12 + $0x18] sm:$0xff] (%p1315_p6)  ;;  %885 = vst [vmem:[%s1494_s11] sm:$0xff] (%p1315_p6), %v884_v32 }
 0x139   : > { %887 = vst [vmem:[%s1494_s11 + $0x8] sm:$0xff] (%p1315_p6), %v886_v33  ;;  %889 = vst [vmem:[%s1494_s11 + $0x20] sm:$0xff] (%p1315_p6), %v888_v34  ;;  %v932_v36 = vld [vmem:[%s1395_s12 + $0xc0] sm:$0xff] (%p1315_p6)  ;;  %v934_v37 = vld [vmem:[%s1395_s12 + $0xc8] sm:$0xff] (%p1315_p6) }
 0x13a   : > { %855 = vst [vmem:[%s1395_s12 + $0xe0] sm:$0xff] %v1153_v6  ;;  %856 = vst [vmem:[%s1395_s12 + $0xe8] sm:$0xff] %v1154_v7  ;;  %v1155_v10 = vpack.c.bf16 %v520_v8, %v518_v2  ;;  %v1156_v11 = vpack.c.bf16 %v633_v9, %v631_v3 }
 0x13b   : > { %891 = vst [vmem:[%s1494_s11 + $0x28] sm:$0xff] (%p1315_p6), %v890_v35  ;;  %v936_v38 = vld [vmem:[%s1395_s12 + $0xd0] sm:$0xff] (%p1315_p6)  ;;  %933 = vst [vmem:[%s1494_s11 + $0x180] sm:$0xff] (%p1315_p6), %v932_v36  ;;  %v938_v39 = vld [vmem:[%s1395_s12 + $0xd8] sm:$0xff] (%p1315_p6) }
 0x13c   : > { %857 = vst [vmem:[%s1395_s12 + $0xf0] sm:$0xff] %v1155_v10  ;;  %858 = vst [vmem:[%s1395_s12 + $0xf8] sm:$0xff] %v1156_v11 }
 0x13d   : > { %935 = vst [vmem:[%s1494_s11 + $0x188] sm:$0xff] %v934_v37  ;;  %937 = vst [vmem:[%s1494_s11 + $0x1a0] sm:$0xff] %v936_v38 }
 0x13e   : > { %939 = vst [vmem:[%s1494_s11 + $0x1a8] sm:$0xff] %v938_v39 }
 0x141   : > { %v940_v40 = vld [vmem:[%s1395_s12 + $0xe0] sm:$0xff]  ;;  %v942_v41 = vld [vmem:[%s1395_s12 + $0xe8] sm:$0xff] }
 0x142   : > { %941 = vst [vmem:[%s1494_s11 + $0x1c0] sm:$0xff] %v940_v40  ;;  %943 = vst [vmem:[%s1494_s11 + $0x1c8] sm:$0xff] %v942_v41 }
 0x143   : > { %v944_v42 = vld [vmem:[%s1395_s12 + $0xf0] sm:$0xff]  ;;  %v946_v43 = vld [vmem:[%s1395_s12 + $0xf8] sm:$0xff] }
 0x144   : > { %945 = vst [vmem:[%s1494_s11 + $0x1e0] sm:$0xff] %v944_v42  ;;  %947 = vst [vmem:[%s1494_s11 + $0x1e8] sm:$0xff] %v946_v43 }
 0x145 PF: > { %s13_s16 = sadd.s32 1, %s1257_s16   ;;  %s1577_s12 = smov %s1245_s13 }
 0x146   : > { %p10_p12 = scmp.ge.s32.totalorder %s13_s16, 4   ;;  %s1578_s13 = smov %s1320_s22 }
 0x147   : > { %s1579_s14 = smov %s1253_s15  ;;  %s1580_s15 = smov %s1582_s17 }
 0x148   :  { %12 = sbr.rel (!%p10_p12) target bundleno = 3 (0x3), region = 119 }

// kernel: bidirectional_lstm_pallas.5
= control target key start
LH: loop header
LB: loop body
LE: loop exit
PB: predicated region body
PF: predicated region fallthrough
CT: control target
= control target key end

     0   :  { %s886_s3 = inlined_call_operand.vmem [shape: bf16[128,128], index: 3, kind: input, shape index: {}]   ;;  %s887_s2 = inlined_call_operand.vmem [shape: bf16[128,128], index: 2, kind: input, shape index: {}]   ;;  %s888_s1 = inlined_call_operand.vmem [shape: bf16[128,128], index: 1, kind: input, shape index: {}]   ;;  %s889_s0 = inlined_call_operand.vmem [shape: bf16[128,128], index: 0, kind: input, shape index: {}]   ;;  %s890_s4 = inlined_call_operand.vmem [shape: f32[1,128], index: 4, kind: input, shape index: {}]   ;;  %s891_s5 = inlined_call_operand.vmem [shape: f32[128,128], index: 5, kind: output, shape index: {}]  }
   0x1   :  { %v659_v0 = vld [vmem:[%s886_s3] sm:$0xff]   ;;  %v661_v2 = vld [vmem:[%s886_s3 + $0x8] sm:$0xff]   ;;  %v663_v4 = vld [vmem:[%s886_s3 + $0x10] sm:$0xff]  }
   0x2   :  { %v660_v1 = vld [vmem:[%s887_s2] sm:$0xff]   ;;  %579 = vmatprep.subr.bf16.mxu1 %v659_v0  ;;  %v662_v3 = vld [vmem:[%s887_s2 + $0x8] sm:$0xff]   ;;  %v664_v5 = vld [vmem:[%s887_s2 + $0x10] sm:$0xff]  }
   0x3   :  { %611 = vmatprep.subr.bf16.mxu0 %v660_v1  ;;  %580 = vmatpush3.bf16.msra.mxu1 %v659_v0  ;;  %v665_v6 = vld [vmem:[%s886_s3 + $0x18] sm:$0xff]   ;;  %v667_v8 = vld [vmem:[%s886_s3 + $0x20] sm:$0xff]   ;;  %v669_v10 = vld [vmem:[%s886_s3 + $0x28] sm:$0xff]  }
   0x4   :  { %612 = vmatpush3.bf16.msra.mxu0 %v660_v1  ;;  %581 = vmatprep.subr.bf16.mxu1 %v661_v2  ;;  %v666_v7 = vld [vmem:[%s887_s2 + $0x18] sm:$0xff]   ;;  %v668_v9 = vld [vmem:[%s887_s2 + $0x20] sm:$0xff]   ;;  %v670_v11 = vld [vmem:[%s887_s2 + $0x28] sm:$0xff]  }
   0x5   :  { %613 = vmatprep.subr.bf16.mxu0 %v662_v3  ;;  %v675_v12 = vld [vmem:[%s888_s1] sm:$0xff]   ;;  %v671_v14 = vld [vmem:[%s886_s3 + $0x30] sm:$0xff]   ;;  %v673_v16 = vld [vmem:[%s886_s3 + $0x38] sm:$0xff]  }
   0x6   :  { %v676_v13 = vld [vmem:[%s889_s0] sm:$0xff]   ;;  %595 = vmatprep.mubr.bf16.mxu1 %v675_v12  ;;  %v672_v15 = vld [vmem:[%s887_s2 + $0x30] sm:$0xff]   ;;  %v674_v17 = vld [vmem:[%s887_s2 + $0x38] sm:$0xff]  }
   0x7   :  { %582 = vmatpush3.bf16.msra.mxu1 %v661_v2  ;;  %627 = vmatprep.mubr.bf16.mxu0 %v676_v13  ;;  %v677_v18 = vld [vmem:[%s888_s1 + $0x8] sm:$0xff]   ;;  %v679_v20 = vld [vmem:[%s888_s1 + $0x10] sm:$0xff]   ;;  %v681_v22 = vld [vmem:[%s888_s1 + $0x18] sm:$0xff]  }
   0x8   :  { %614 = vmatpush3.bf16.msra.mxu0 %v662_v3  ;;  %583 = vmatprep.subr.bf16.mxu1 %v663_v4  ;;  %v678_v19 = vld [vmem:[%s889_s0 + $0x8] sm:$0xff]   ;;  %v680_v21 = vld [vmem:[%s889_s0 + $0x10] sm:$0xff]   ;;  %v682_v23 = vld [vmem:[%s889_s0 + $0x18] sm:$0xff]  }
   0x9   :  { %615 = vmatprep.subr.bf16.mxu0 %v664_v5  ;;  %v683_v24 = vld [vmem:[%s888_s1 + $0x20] sm:$0xff]   ;;  %v685_v26 = vld [vmem:[%s888_s1 + $0x28] sm:$0xff]   ;;  %v687_v28 = vld [vmem:[%s888_s1 + $0x30] sm:$0xff]  }
   0xa   :  { %v684_v25 = vld [vmem:[%s889_s0 + $0x20] sm:$0xff]   ;;  %v686_v27 = vld [vmem:[%s889_s0 + $0x28] sm:$0xff]   ;;  %v688_v29 = vld [vmem:[%s889_s0 + $0x30] sm:$0xff]  }
   0xb   :  { %584 = vmatpush3.bf16.msra.mxu1 %v663_v4  ;;  %v689_v30 = vld [vmem:[%s888_s1 + $0x38] sm:$0xff]   ;;  %v820_v34 = vld [vmem:[%s890_s4] ss:$0 sm:$0xff] }
   0xc   :  { %616 = vmatpush3.bf16.msra.mxu0 %v664_v5  ;;  %585 = vmatprep.subr.bf16.mxu1 %v665_v6  ;;  %v690_v31 = vld [vmem:[%s889_s0 + $0x38] sm:$0xff]  }
   0xd   :  { %617 = vmatprep.subr.bf16.mxu0 %v666_v7 }
   0xf   :  { %586 = vmatpush3.bf16.msra.mxu1 %v665_v6 }
  0x10   :  { %618 = vmatpush3.bf16.msra.mxu0 %v666_v7  ;;  %587 = vmatprep.subr.bf16.mxu1 %v667_v8 }
  0x11   :  { %619 = vmatprep.subr.bf16.mxu0 %v668_v9 }
  0x13   :  { %588 = vmatpush3.bf16.msra.mxu1 %v667_v8 }
  0x14   :  { %620 = vmatpush3.bf16.msra.mxu0 %v668_v9  ;;  %589 = vmatprep.subr.bf16.mxu1 %v669_v10 }
  0x15   :  { %621 = vmatprep.subr.bf16.mxu0 %v670_v11 }
  0x17   :  { %590 = vmatpush3.bf16.msra.mxu1 %v669_v10 }
  0x18   :  { %622 = vmatpush3.bf16.msra.mxu0 %v670_v11  ;;  %591 = vmatprep.subr.bf16.mxu1 %v671_v14 }
  0x19   :  { %623 = vmatprep.subr.bf16.mxu0 %v672_v15 }
  0x1b   :  { %592 = vmatpush3.bf16.msra.mxu1 %v671_v14 }
  0x1c   :  { %624 = vmatpush3.bf16.msra.mxu0 %v672_v15  ;;  %593 = vmatprep.subr.bf16.mxu1 %v673_v16 }
  0x1d   :  { %625 = vmatprep.subr.bf16.mxu0 %v674_v17 }
  0x1f   :  { %594 = vmatpush3.bf16.msra.mxu1 %v673_v16 }
  0x20   :  { %626 = vmatpush3.bf16.msra.mxu0 %v674_v17 }
  0x22   :  { %596 = vmatmul.mubr.bf16.vlgmr.msra.gmra.mrb[0].mxu1 %v677_v18 }
  0x23   :  { %628 = vmatmul.mubr.bf16.vlgmr.msra.gmra.mrb[0].mxu0 %v678_v19  ;;  %599 = vmatprep.mubr.bf16.mxu1 %v679_v20 }
  0x24   :  { %631 = vmatprep.mubr.bf16.mxu0 %v680_v21 }
  0x2a   :  { %600 = vmatmul.mubr.bf16.gmra.mrb[4].mxu1 %v681_v22 }
  0x2b   :  { %632 = vmatmul.mubr.bf16.gmra.mrb[4].mxu0 %v682_v23  ;;  %603 = vmatprep.mubr.bf16.mxu1 %v683_v24 }
  0x2c   :  { %635 = vmatprep.mubr.bf16.mxu0 %v684_v25 }
  0x32   :  { %604 = vmatmul.mubr.bf16.gmra.mrb[8].mxu1 %v685_v26 }
  0x33   :  { %636 = vmatmul.mubr.bf16.gmra.mrb[8].mxu0 %v686_v27  ;;  %607 = vmatprep.mubr.bf16.mxu1 %v687_v28 }
  0x34   :  { %639 = vmatprep.mubr.bf16.mxu0 %v688_v29 }
  0x3a   :  { %608 = vmatmul.mubr.bf16.gmra.mrb[12].mxu1 %v689_v30 }
  0x3b   :  { %640 = vmatmul.mubr.bf16.gmra.mrb[12].mxu0 %v690_v31 }
  0xf5   :  { %v597_v32 = vpop.f32.mrb[0].mxu1 }
  0xf6   :  { %v629_v33 = vpop.f32.mrb[0].mxu0  ;;  %v215_v35 = vpop.f32.mrb[1].mxu1 }
  0xf7   :  { %v417_v36 = vadd.f32 %v629_v33, %v597_v32  ;;  %v408_v37 = vpop.f32.mrb[1].mxu0  ;;  %v598_v38 = vpop.f32.mrb[2].mxu1 }
  0xf8   :  { %v409_v39 = vadd.f32 %v408_v37, %v215_v35  ;;  %v630_v40 = vpop.f32.mrb[2].mxu0  ;;  %v218_v41 = vpop.f32.mrb[3].mxu1 }
  0xf9   :  { %v480_v42 = vadd.f32 %v820_v34, %v417_v36  ;;  %v420_v43 = vadd.f32 %v630_v40, %v598_v38  ;;  %v411_v44 = vpop.f32.mrb[3].mxu0 }
  0xfa   :  { %v478_v45 = vadd.f32 %v820_v34, %v409_v39  ;;  %v412_v46 = vadd.f32 %v411_v44, %v218_v41 }
  0xfb   :  { %496 = vst [vmem:[%s891_s5 + $0x10] sm:$0xff] %v480_v42  ;;  %v481_v47 = vadd.f32 %v820_v34, %v420_v43 }
  0xfc   :  { %494 = vst [vmem:[%s891_s5] sm:$0xff] %v478_v45  ;;  %v479_v48 = vadd.f32 %v820_v34, %v412_v46 }
  0xfd   :  { %497 = vst [vmem:[%s891_s5 + $0x18] sm:$0xff] %v481_v47  ;;  %v601_v49 = vpop.f32.mrb[4].mxu1 }
  0xfe   :  { %495 = vst [vmem:[%s891_s5 + $0x8] sm:$0xff] %v479_v48  ;;  %v633_v50 = vpop.f32.mrb[4].mxu0  ;;  %v231_v51 = vpop.f32.mrb[5].mxu1 }
  0xff   :  { %v433_v52 = vadd.f32 %v633_v50, %v601_v49  ;;  %v424_v53 = vpop.f32.mrb[5].mxu0  ;;  %v602_v54 = vpop.f32.mrb[6].mxu1 }
 0x100   :  { %v425_v55 = vadd.f32 %v424_v53, %v231_v51  ;;  %v634_v56 = vpop.f32.mrb[6].mxu0  ;;  %v234_v57 = vpop.f32.mrb[7].mxu1 }
 0x101   :  { %v484_v58 = vadd.f32 %v820_v34, %v433_v52  ;;  %v436_v59 = vadd.f32 %v634_v56, %v602_v54  ;;  %v427_v60 = vpop.f32.mrb[7].mxu0 }
 0x102   :  { %v482_v61 = vadd.f32 %v820_v34, %v425_v55  ;;  %v428_v62 = vadd.f32 %v427_v60, %v234_v57 }
 0x103   :  { %500 = vst [vmem:[%s891_s5 + $0x30] sm:$0xff] %v484_v58  ;;  %v485_v63 = vadd.f32 %v820_v34, %v436_v59 }
 0x104   :  { %498 = vst [vmem:[%s891_s5 + $0x20] sm:$0xff] %v482_v61  ;;  %v483_v0 = vadd.f32 %v820_v34, %v428_v62 }
 0x105   :  { %501 = vst [vmem:[%s891_s5 + $0x38] sm:$0xff] %v485_v63  ;;  %v605_v1 = vpop.f32.mrb[8].mxu1 }
 0x106   :  { %499 = vst [vmem:[%s891_s5 + $0x28] sm:$0xff] %v483_v0  ;;  %v637_v2 = vpop.f32.mrb[8].mxu0  ;;  %v247_v3 = vpop.f32.mrb[9].mxu1 }
 0x107   :  { %v449_v4 = vadd.f32 %v637_v2, %v605_v1  ;;  %v440_v5 = vpop.f32.mrb[9].mxu0  ;;  %v606_v6 = vpop.f32.mrb[10].mxu1 }
 0x108   :  { %v441_v7 = vadd.f32 %v440_v5, %v247_v3  ;;  %v638_v8 = vpop.f32.mrb[10].mxu0  ;;  %v250_v9 = vpop.f32.mrb[11].mxu1 }
 0x109   :  { %v488_v10 = vadd.f32 %v820_v34, %v449_v4  ;;  %v452_v11 = vadd.f32 %v638_v8, %v606_v6  ;;  %v443_v12 = vpop.f32.mrb[11].mxu0 }
 0x10a   :  { %v486_v13 = vadd.f32 %v820_v34, %v441_v7  ;;  %v444_v14 = vadd.f32 %v443_v12, %v250_v9 }
 0x10b   :  { %504 = vst [vmem:[%s891_s5 + $0x50] sm:$0xff] %v488_v10  ;;  %v489_v15 = vadd.f32 %v820_v34, %v452_v11 }
 0x10c   :  { %502 = vst [vmem:[%s891_s5 + $0x40] sm:$0xff] %v486_v13  ;;  %v487_v16 = vadd.f32 %v820_v34, %v444_v14 }
 0x10d   :  { %505 = vst [vmem:[%s891_s5 + $0x58] sm:$0xff] %v489_v15  ;;  %v609_v17 = vpop.f32.mrb[12].mxu1 }
 0x10e   :  { %503 = vst [vmem:[%s891_s5 + $0x48] sm:$0xff] %v487_v16  ;;  %v641_v18 = vpop.f32.mrb[12].mxu0  ;;  %v263_v19 = vpop.f32.mrb[13].mxu1 }
 0x10f   :  { %v465_v20 = vadd.f32 %v641_v18, %v609_v17  ;;  %v456_v21 = vpop.f32.mrb[13].mxu0  ;;  %v610_v22 = vpop.f32.mrb[14].mxu1 }
 0x110   :  { %v457_v23 = vadd.f32 %v456_v21, %v263_v19  ;;  %v642_v24 = vpop.f32.mrb[14].mxu0  ;;  %v266_v25 = vpop.f32.mrb[15].mxu1 }
 0x111   :  { %v492_v26 = vadd.f32 %v820_v34, %v465_v20  ;;  %v468_v27 = vadd.f32 %v642_v24, %v610_v22  ;;  %v459_v28 = vpop.f32.mrb[15].mxu0 }
 0x112   :  { %v490_v29 = vadd.f32 %v820_v34, %v457_v23  ;;  %v460_v30 = vadd.f32 %v459_v28, %v266_v25 }
 0x113   :  { %508 = vst [vmem:[%s891_s5 + $0x70] sm:$0xff] %v492_v26  ;;  %v493_v31 = vadd.f32 %v820_v34, %v468_v27 }
 0x114   :  { %506 = vst [vmem:[%s891_s5 + $0x60] sm:$0xff] %v490_v29  ;;  %v491_v32 = vadd.f32 %v820_v34, %v460_v30 }
 0x115   :  { %509 = vst [vmem:[%s891_s5 + $0x78] sm:$0xff] %v493_v31 }
 0x116   :  { %507 = vst [vmem:[%s891_s5 + $0x68] sm:$0xff] %v491_v32 }

// kernel: bidirectional_lstm_pallas.4
= control target key start
LH: loop header
LB: loop body
LE: loop exit
PB: predicated region body
PF: predicated region fallthrough
CT: control target
= control target key end

     0   :  { %v7593_v7 = vmov 0.0   ;;  %s7587_s0 = inlined_call_operand.vmem [shape: bf16[8,16,1024], index: 0, kind: input, shape index: {}, may-alias: {0,1}]   ;;  %s7588_s1 = inlined_call_operand.vmem [shape: bf16[8,16,1024], index: 1, kind: input, shape index: {}, may-alias: {0,1}]   ;;  %s7589_s2 = inlined_call_operand.vmem [shape: f32[128,512], index: 2, kind: input, shape index: {}]   ;;  %s7590_s3 = inlined_call_operand.vmem [shape: f32[128,512], index: 3, kind: input, shape index: {}]   ;;  %s7591_s4 = inlined_call_operand.vmem [shape: bf16[8,16,128], index: 4, kind: output, shape index: {0}]   ;;  %s7592_s5 = inlined_call_operand.vmem [shape: bf16[8,16,128], index: 5, kind: output, shape index: {1}]  }
   0x1   :  { %v218_v0 = vld [vmem:[%s7589_s2 + $0x8] sm:$0xff]  ;;  %v217_v2 = vld [vmem:[%s7589_s2] sm:$0xff]  ;;  %425 = vmatprep.mubr.f32.mxu0 %v7593_v7  ;;  %502 = vmatprep.mubr.f32.mxu1 %v7593_v7  ;;  %v220_v19 = vld [vmem:[%s7589_s2 + $0x18] sm:$0xff] }
   0x2   :  { %v222_v1 = vld [vmem:[%s7589_s2 + $0x28] sm:$0xff]  ;;  %v221_v4 = vld [vmem:[%s7589_s2 + $0x20] sm:$0xff]  ;;  %v224_v20 = vld [vmem:[%s7589_s2 + $0x38] sm:$0xff] }
   0x3   :  { %v6148_v3 = vpack.c.bf16 %v222_v1, %v218_v0  ;;  %v226_v5 = vld [vmem:[%s7589_s2 + $0x48] sm:$0xff]  ;;  %v6161_v8 = vpack.c.bf16 %v221_v4, %v217_v2  ;;  %v225_v10 = vld [vmem:[%s7589_s2 + $0x40] sm:$0xff]  ;;  %v6202_v22 = vpack.c.bf16 %v224_v20, %v220_v19  ;;  %v219_v23 = vld [vmem:[%s7589_s2 + $0x10] sm:$0xff] }
   0x4   :  { %v230_v6 = vld [vmem:[%s7589_s2 + $0x68] sm:$0xff]  ;;  %v229_v11 = vld [vmem:[%s7589_s2 + $0x60] sm:$0xff]  ;;  %v223_v24 = vld [vmem:[%s7589_s2 + $0x30] sm:$0xff] }
   0x5   :  { %7679 = vst [vmem:[#allocation8_spill] sm:$0xff] %v6161_v8  ;;  %v6163_v9 = vpack.c.bf16 %v230_v6, %v226_v5  ;;  %v234_v12 = vld [vmem:[%s7589_s2 + $0x88] sm:$0xff]  ;;  %4572 = vmatprep.subr.bf16.mxu0 %v6148_v3  ;;  %v6179_v14 = vpack.c.bf16 %v229_v11, %v225_v10  ;;  %v233_v15 = vld [vmem:[%s7589_s2 + $0x80] sm:$0xff]  ;;  %v6210_v25 = vpack.c.bf16 %v223_v24, %v219_v23  ;;  %v228_v27 = vld [vmem:[%s7589_s2 + $0x58] sm:$0xff] }
   0x6   :  { %v238_v13 = vld [vmem:[%s7589_s2 + $0xa8] sm:$0xff]  ;;  %4574 = vmatpush1.bf16.msra.mxu0 %v6161_v8  ;;  %v237_v16 = vld [vmem:[%s7589_s2 + $0xa0] sm:$0xff]  ;;  %4604 = vmatprep.subr.bf16.mxu1 %v6202_v22  ;;  %v232_v28 = vld [vmem:[%s7589_s2 + $0x78] sm:$0xff] }
   0x7   :  { %7680 = vst [vmem:[#allocation9_spill] sm:$0xff] %v6163_v9  ;;  %7681 = vst [vmem:[#allocation10_spill] sm:$0xff] %v6179_v14  ;;  %4576 = vmatprep.subr.bf16.mxu0 %v6163_v9  ;;  %v6188_v17 = vpack.c.bf16 %v238_v13, %v234_v12  ;;  %v242_v18 = vld [vmem:[%s7589_s2 + $0xc8] sm:$0xff]  ;;  %v6213_v26 = vpack.c.bf16 %v237_v16, %v233_v15  ;;  %v227_v29 = vld [vmem:[%s7589_s2 + $0x50] sm:$0xff]  ;;  %4606 = vmatpush1.bf16.msra.mxu1 %v6210_v25 }
   0x8   :  { %v246_v21 = vld [vmem:[%s7589_s2 + $0xe8] sm:$0xff]  ;;  %7683 = vst [vmem:[#allocation12_spill] sm:$0xff] %v6210_v25  ;;  %v241_v31 = vld [vmem:[%s7589_s2 + $0xc0] sm:$0xff]  ;;  %v6235_v33 = vpack.c.bf16 %v232_v28, %v228_v27  ;;  %v231_v34 = vld [vmem:[%s7589_s2 + $0x70] sm:$0xff] }
   0x9   :  { %7682 = vst [vmem:[#allocation11_spill] sm:$0xff] %v6188_v17  ;;  %7684 = vst [vmem:[#allocation13_spill] sm:$0xff] %v6213_v26  ;;  %v6226_v30 = vpack.c.bf16 %v246_v21, %v242_v18  ;;  %v245_v32 = vld [vmem:[%s7589_s2 + $0xe0] sm:$0xff]  ;;  %v250_v35 = vld [vmem:[%s7589_s2 + $0x108] sm:$0xff]  ;;  %v6246_v37 = vpack.c.bf16 %v231_v34, %v227_v29 }
   0xa   :  { %4578 = vmatpush1.bf16.msra.mxu0 %v6179_v14  ;;  %7686 = vst [vmem:[#allocation15_spill] sm:$0xff] %v6235_v33  ;;  %v254_v36 = vld [vmem:[%s7589_s2 + $0x128] sm:$0xff]  ;;  %v236_v38 = vld [vmem:[%s7589_s2 + $0x98] sm:$0xff]  ;;  %4608 = vmatprep.subr.bf16.mxu1 %v6235_v33  ;;  %v235_v40 = vld [vmem:[%s7589_s2 + $0x90] sm:$0xff]  ;;  %v6262_v42 = vpack.c.bf16 %v245_v32, %v241_v31 }
   0xb   :  { %4580 = vmatprep.subr.bf16.mxu0 %v6188_v17  ;;  %7685 = vst [vmem:[#allocation14_spill] sm:$0xff] %v6226_v30  ;;  %7687 = vst [vmem:[#allocation16_spill] sm:$0xff] %v6246_v37  ;;  %v240_v39 = vld [vmem:[%s7589_s2 + $0xb8] sm:$0xff]  ;;  %v239_v41 = vld [vmem:[%s7589_s2 + $0xb0] sm:$0xff]  ;;  %v6273_v46 = vpack.c.bf16 %v254_v36, %v250_v35  ;;  %4610 = vmatpush1.bf16.msra.mxu1 %v6246_v37 }
   0xc   :  { %7688 = vst [vmem:[#allocation17_spill] sm:$0xff] %v6262_v42  ;;  %v249_v43 = vld [vmem:[%s7589_s2 + $0x100] sm:$0xff]  ;;  %v6270_v45 = vpack.c.bf16 %v240_v39, %v236_v38  ;;  %v258_v47 = vld [vmem:[%s7589_s2 + $0x148] sm:$0xff]  ;;  %v6279_v48 = vpack.c.bf16 %v239_v41, %v235_v40  ;;  %v244_v49 = vld [vmem:[%s7589_s2 + $0xd8] sm:$0xff] }
   0xd   :  { %v253_v44 = vld [vmem:[%s7589_s2 + $0x120] sm:$0xff]  ;;  %7690 = vst [vmem:[#allocation19_spill] sm:$0xff] %v6273_v46  ;;  %v248_v50 = vld [vmem:[%s7589_s2 + $0xf8] sm:$0xff]  ;;  %v262_v51 = vld [vmem:[%s7589_s2 + $0x168] sm:$0xff] }
   0xe   :  { %4582 = vmatpush1.bf16.msra.mxu0 %v6213_v26  ;;  %7689 = vst [vmem:[#allocation18_spill] sm:$0xff] %v6270_v45  ;;  %7691 = vst [vmem:[#allocation20_spill] sm:$0xff] %v6279_v48  ;;  %4612 = vmatprep.subr.bf16.mxu1 %v6270_v45  ;;  %v6291_v52 = vpack.c.bf16 %v248_v50, %v244_v49  ;;  %v243_v53 = vld [vmem:[%s7589_s2 + $0xd0] sm:$0xff]  ;;  %v6300_v55 = vpack.c.bf16 %v253_v44, %v249_v43  ;;  %v252_v56 = vld [vmem:[%s7589_s2 + $0x118] sm:$0xff] }
   0xf   :  { %4584 = vmatprep.subr.bf16.mxu0 %v6226_v30  ;;  %v247_v54 = vld [vmem:[%s7589_s2 + $0xf0] sm:$0xff]  ;;  %v256_v57 = vld [vmem:[%s7589_s2 + $0x138] sm:$0xff]  ;;  %v6309_v58 = vpack.c.bf16 %v262_v51, %v258_v47  ;;  %v257_v59 = vld [vmem:[%s7589_s2 + $0x140] sm:$0xff]  ;;  %4614 = vmatpush1.bf16.msra.mxu1 %v6279_v48 }
  0x10   :  { %7692 = vst [vmem:[#allocation21_spill] sm:$0xff] %v6291_v52  ;;  %7693 = vst [vmem:[#allocation22_spill] sm:$0xff] %v6300_v55  ;;  %v261_v60 = vld [vmem:[%s7589_s2 + $0x160] sm:$0xff]  ;;  %v266_v61 = vld [vmem:[%s7589_s2 + $0x188] sm:$0xff]  ;;  %v6321_v62 = vpack.c.bf16 %v247_v54, %v243_v53  ;;  %4616 = vmatprep.subr.bf16.mxu1 %v6291_v52  ;;  %v6327_v0 = vpack.c.bf16 %v256_v57, %v252_v56 }
  0x11   :  { %7694 = vst [vmem:[#allocation23_spill] sm:$0xff] %v6309_v58  ;;  %v270_v63 = vld [vmem:[%s7589_s2 + $0x1a8] sm:$0xff]  ;;  %v251_v1 = vld [vmem:[%s7589_s2 + $0x110] sm:$0xff]  ;;  %v260_v4 = vld [vmem:[%s7589_s2 + $0x158] sm:$0xff]  ;;  %v6342_v6 = vpack.c.bf16 %v261_v60, %v257_v59 }
  0x12   :  { %4586 = vmatpush1.bf16.msra.mxu0 %v6262_v42  ;;  %7695 = vst [vmem:[#allocation24_spill] sm:$0xff] %v6321_v62  ;;  %7696 = vst [vmem:[#allocation25_spill] sm:$0xff] %v6327_v0  ;;  %v255_v2 = vld [vmem:[%s7589_s2 + $0x130] sm:$0xff]  ;;  %v264_v5 = vld [vmem:[%s7589_s2 + $0x178] sm:$0xff]  ;;  %v6345_v10 = vpack.c.bf16 %v270_v63, %v266_v61 }
  0x13   :  { %4588 = vmatprep.subr.bf16.mxu0 %v6273_v46  ;;  %7697 = vst [vmem:[#allocation26_spill] sm:$0xff] %v6342_v6  ;;  %v265_v11 = vld [vmem:[%s7589_s2 + $0x180] sm:$0xff]  ;;  %4618 = vmatpush1.bf16.msra.mxu1 %v6321_v62  ;;  %v274_v13 = vld [vmem:[%s7589_s2 + $0x1c8] sm:$0xff]  ;;  %v6357_v15 = vpack.c.bf16 %v255_v2, %v251_v1  ;;  %v6363_v18 = vpack.c.bf16 %v264_v5, %v260_v4  ;;  %v259_v19 = vld [vmem:[%s7589_s2 + $0x150] sm:$0xff] }
  0x14   :  { %7698 = vst [vmem:[#allocation27_spill] sm:$0xff] %v6345_v10  ;;  %v269_v12 = vld [vmem:[%s7589_s2 + $0x1a0] sm:$0xff]  ;;  %v278_v16 = vld [vmem:[%s7589_s2 + $0x1e8] sm:$0xff]  ;;  %4620 = vmatprep.subr.bf16.mxu1 %v6327_v0  ;;  %v263_v20 = vld [vmem:[%s7589_s2 + $0x170] sm:$0xff] }
  0x15   :  { %7699 = vst [vmem:[#allocation28_spill] sm:$0xff] %v6357_v15  ;;  %7700 = vst [vmem:[#allocation29_spill] sm:$0xff] %v6363_v18  ;;  %v268_v21 = vld [vmem:[%s7589_s2 + $0x198] sm:$0xff]  ;;  %v6378_v24 = vpack.c.bf16 %v269_v12, %v265_v11  ;;  %v6381_v27 = vpack.c.bf16 %v278_v16, %v274_v13  ;;  %v273_v28 = vld [vmem:[%s7589_s2 + $0x1c0] sm:$0xff]  ;;  %v6393_v32 = vpack.c.bf16 %v263_v20, %v259_v19 }
  0x16   :  { %4590 = vmatpush1.bf16.msra.mxu0 %v6300_v55  ;;  %v272_v23 = vld [vmem:[%s7589_s2 + $0x1b8] sm:$0xff]  ;;  %v277_v29 = vld [vmem:[%s7589_s2 + $0x1e0] sm:$0xff]  ;;  %v282_v31 = vld [vmem:[%s7590_s3 + $0x8] sm:$0xff] }
  0x17   :  { %4592 = vmatprep.subr.bf16.mxu0 %v6309_v58  ;;  %7701 = vst [vmem:[#allocation30_spill] sm:$0xff] %v6378_v24  ;;  %7702 = vst [vmem:[#allocation31_spill] sm:$0xff] %v6381_v27  ;;  %4622 = vmatpush1.bf16.msra.mxu1 %v6357_v15  ;;  %v286_v34 = vld [vmem:[%s7590_s3 + $0x28] sm:$0xff]  ;;  %v6399_v35 = vpack.c.bf16 %v272_v23, %v268_v21  ;;  %v267_v36 = vld [vmem:[%s7589_s2 + $0x190] sm:$0xff]  ;;  %v6414_v41 = vpack.c.bf16 %v277_v29, %v273_v28 }
  0x18   :  { %7703 = vst [vmem:[#allocation32_spill] sm:$0xff] %v6393_v32  ;;  %4624 = vmatprep.subr.bf16.mxu1 %v6363_v18  ;;  %v271_v38 = vld [vmem:[%s7589_s2 + $0x1b0] sm:$0xff]  ;;  %v276_v39 = vld [vmem:[%s7589_s2 + $0x1d8] sm:$0xff]  ;;  %v6417_v43 = vpack.c.bf16 %v286_v34, %v282_v31  ;;  %v281_v44 = vld [vmem:[%s7590_s3] sm:$0xff] }
  0x19   :  { %7704 = vst [vmem:[#allocation33_spill] sm:$0xff] %v6399_v35  ;;  %v280_v40 = vld [vmem:[%s7589_s2 + $0x1f8] sm:$0xff]  ;;  %7705 = vst [vmem:[#allocation34_spill] sm:$0xff] %v6414_v41  ;;  %v285_v47 = vld [vmem:[%s7590_s3 + $0x20] sm:$0xff]  ;;  %v6429_v50 = vpack.c.bf16 %v271_v38, %v267_v36 }
  0x1a   :  { %4594 = vmatpush1.bf16.msra.mxu0 %v6342_v6  ;;  %7706 = vst [vmem:[#allocation35_spill] sm:$0xff] %v6417_v43  ;;  %v290_v49 = vld [vmem:[%s7590_s3 + $0x48] sm:$0xff]  ;;  %v6435_v53 = vpack.c.bf16 %v280_v40, %v276_v39  ;;  %v275_v54 = vld [vmem:[%s7589_s2 + $0x1d0] sm:$0xff]  ;;  %v284_v57 = vld [vmem:[%s7590_s3 + $0x18] sm:$0xff]  ;;  %v6450_v60 = vpack.c.bf16 %v285_v47, %v281_v44 }
  0x1b   :  { %4596 = vmatprep.subr.bf16.mxu0 %v6345_v10  ;;  %4626 = vmatpush1.bf16.msra.mxu1 %v6393_v32  ;;  %7707 = vst [vmem:[#allocation36_spill] sm:$0xff] %v6429_v50  ;;  %v294_v51 = vld [vmem:[%s7590_s3 + $0x68] sm:$0xff]  ;;  %v279_v56 = vld [vmem:[%s7589_s2 + $0x1f0] sm:$0xff]  ;;  %v288_v59 = vld [vmem:[%s7590_s3 + $0x38] sm:$0xff] }
  0x1c   :  { %4628 = vmatprep.subr.bf16.mxu1 %v6399_v35  ;;  %7708 = vst [vmem:[#allocation37_spill] sm:$0xff] %v6435_v53  ;;  %v6453_v61 = vpack.c.bf16 %v294_v51, %v290_v49  ;;  %v289_v63 = vld [vmem:[%s7590_s3 + $0x40] sm:$0xff]  ;;  %v298_v2 = vld [vmem:[%s7590_s3 + $0x88] sm:$0xff]  ;;  %v6465_v4 = vpack.c.bf16 %v279_v56, %v275_v54  ;;  %v6471_v11 = vpack.c.bf16 %v288_v59, %v284_v57  ;;  %v283_v12 = vld [vmem:[%s7590_s3 + $0x10] sm:$0xff] }
  0x1d   :  { %v293_v1 = vld [vmem:[%s7590_s3 + $0x60] sm:$0xff]  ;;  %v302_v5 = vld [vmem:[%s7590_s3 + $0xa8] sm:$0xff]  ;;  %v287_v13 = vld [vmem:[%s7590_s3 + $0x30] sm:$0xff] }
  0x1e   :  { %4598 = vmatpush1.bf16.msra.mxu0 %v6378_v24  ;;  %7709 = vst [vmem:[#allocation38_spill] sm:$0xff] %v6465_v4  ;;  %7710 = vst [vmem:[#allocation39_spill] sm:$0xff] %v6471_v11  ;;  %v292_v16 = vld [vmem:[%s7590_s3 + $0x58] sm:$0xff]  ;;  %v6488_v20 = vpack.c.bf16 %v293_v1, %v289_v63  ;;  %v6491_v21 = vpack.c.bf16 %v302_v5, %v298_v2  ;;  %v297_v23 = vld [vmem:[%s7590_s3 + $0x80] sm:$0xff]  ;;  %v6503_v31 = vpack.c.bf16 %v287_v13, %v283_v12 }
  0x1f   :  { %4600 = vmatprep.subr.bf16.mxu0 %v6381_v27  ;;  %4630 = vmatpush1.bf16.msra.mxu1 %v6429_v50  ;;  %v296_v19 = vld [vmem:[%s7590_s3 + $0x78] sm:$0xff]  ;;  %v301_v28 = vld [vmem:[%s7590_s3 + $0xa0] sm:$0xff]  ;;  %v306_v29 = vld [vmem:[%s7590_s3 + $0xc8] sm:$0xff] }
  0x20   :  { %4632 = vmatprep.subr.bf16.mxu1 %v6435_v53  ;;  %v310_v34 = vld [vmem:[%s7590_s3 + $0xe8] sm:$0xff]  ;;  %v6509_v36 = vpack.c.bf16 %v296_v19, %v292_v16  ;;  %v291_v38 = vld [vmem:[%s7590_s3 + $0x50] sm:$0xff]  ;;  %v300_v40 = vld [vmem:[%s7590_s3 + $0x98] sm:$0xff]  ;;  %v6525_v47 = vpack.c.bf16 %v301_v28, %v297_v23 }
  0x21   :  { %v295_v39 = vld [vmem:[%s7590_s3 + $0x70] sm:$0xff]  ;;  %v304_v44 = vld [vmem:[%s7590_s3 + $0xb8] sm:$0xff]  ;;  %v6529_v49 = vpack.c.bf16 %v310_v34, %v306_v29  ;;  %v305_v51 = vld [vmem:[%s7590_s3 + $0xc0] sm:$0xff] }
  0x22   :  { %4602 = vmatpush1.bf16.msra.mxu0 %v6414_v41  ;;  %v309_v54 = vld [vmem:[%s7590_s3 + $0xe0] sm:$0xff]  ;;  %v314_v56 = vld [vmem:[%s7590_s3 + $0x108] sm:$0xff]  ;;  %v6541_v57 = vpack.c.bf16 %v295_v39, %v291_v38  ;;  %v6548_v63 = vpack.c.bf16 %v304_v44, %v300_v40  ;;  %v299_v1 = vld [vmem:[%s7590_s3 + $0x90] sm:$0xff] }
  0x23   :  { %4636 = vmatprep.subr.bf16.mxu0 %v6417_v43  ;;  %4634 = vmatpush1.bf16.msra.mxu1 %v6465_v4  ;;  %v318_v59 = vld [vmem:[%s7590_s3 + $0x128] sm:$0xff]  ;;  %v303_v2 = vld [vmem:[%s7590_s3 + $0xb0] sm:$0xff]  ;;  %v308_v5 = vld [vmem:[%s7590_s3 + $0xd8] sm:$0xff]  ;;  %v6564_v13 = vpack.c.bf16 %v309_v54, %v305_v51 }
  0x24   :  { %4668 = vmatprep.subr.bf16.mxu1 %v6471_v11  ;;  %v312_v12 = vld [vmem:[%s7590_s3 + $0xf8] sm:$0xff]  ;;  %v6568_v16 = vpack.c.bf16 %v318_v59, %v314_v56  ;;  %v313_v19 = vld [vmem:[%s7590_s3 + $0x100] sm:$0xff]  ;;  %v322_v28 = vld [vmem:[%s7590_s3 + $0x148] sm:$0xff]  ;;  %v6580_v29 = vpack.c.bf16 %v303_v2, %v299_v1 }
  0x25   :  { %426 = vmatmul.mubr.f32.vlgmr.msra.gmra.mrb[0].mxu0 %v7593_v7  ;;  %7711 = vst [vmem:[#allocation40_spill] sm:$0xff] %v6564_v13  ;;  %v317_v23 = vld [vmem:[%s7590_s3 + $0x120] sm:$0xff]  ;;  %v326_v34 = vld [vmem:[%s7590_s3 + $0x168] sm:$0xff]  ;;  %v6586_v38 = vpack.c.bf16 %v312_v12, %v308_v5  ;;  %v307_v39 = vld [vmem:[%s7590_s3 + $0xd0] sm:$0xff] }
  0x26   :  { %4638 = vmatpush1.bf16.msra.mxu0 %v6450_v60  ;;  %431 = vmatprep.mubr.f32.mxu0 %v7593_v7  ;;  %7712 = vst [vmem:[#allocation41_spill] sm:$0xff] %v6568_v16  ;;  %v311_v40 = vld [vmem:[%s7590_s3 + $0xf0] sm:$0xff]  ;;  %v316_v44 = vld [vmem:[%s7590_s3 + $0x118] sm:$0xff]  ;;  %v6602_v54 = vpack.c.bf16 %v317_v23, %v313_v19  ;;  %v6605_v56 = vpack.c.bf16 %v326_v34, %v322_v28  ;;  %v321_v59 = vld [vmem:[%s7590_s3 + $0x140] sm:$0xff] }
  0x27   :  { %4640 = vmatprep.subr.bf16.mxu0 %v6453_v61  ;;  %503 = vmatmul.mubr.f32.vlgmr.msra.gmra.mrb[0].mxu1 %v7593_v7  ;;  %v320_v51 = vld [vmem:[%s7590_s3 + $0x138] sm:$0xff]  ;;  %v325_v1 = vld [vmem:[%s7590_s3 + $0x160] sm:$0xff]  ;;  %v330_v2 = vld [vmem:[%s7590_s3 + $0x188] sm:$0xff]  ;;  %v6617_v5 = vpack.c.bf16 %v311_v40, %v307_v39 }
  0x28   :  { %4670 = vmatpush1.bf16.msra.mxu1 %v6503_v31  ;;  %508 = vmatprep.mubr.f32.mxu1 %v7593_v7  ;;  %7713 = vst [vmem:[#allocation42_spill] sm:$0xff] %v6602_v54  ;;  %7714 = vst [vmem:[#allocation43_spill] sm:$0xff] %v6605_v56  ;;  %v334_v12 = vld [vmem:[%s7590_s3 + $0x1a8] sm:$0xff]  ;;  %v6623_v19 = vpack.c.bf16 %v320_v51, %v316_v44  ;;  %v315_v23 = vld [vmem:[%s7590_s3 + $0x110] sm:$0xff]  ;;  %v6638_v40 = vpack.c.bf16 %v325_v1, %v321_v59 }
  0x29   :  { %432 = vmatmul.mubr.f32.gmra.mrb[2].mxu0 %v7593_v7  ;;  %4672 = vmatprep.subr.bf16.mxu1 %v6509_v36  ;;  %v319_v28 = vld [vmem:[%s7590_s3 + $0x130] sm:$0xff]  ;;  %v324_v34 = vld [vmem:[%s7590_s3 + $0x158] sm:$0xff]  ;;  %v6641_v44 = vpack.c.bf16 %v334_v12, %v330_v2  ;;  %v329_v51 = vld [vmem:[%s7590_s3 + $0x180] sm:$0xff] }
  0x2a   :  { %4642 = vmatpush1.bf16.msra.mxu0 %v6488_v20  ;;  %666 = vmatprep.mubr.f32.mxu0 %v7593_v7  ;;  %7715 = vst [vmem:[#allocation44_spill] sm:$0xff] %v6623_v19  ;;  %v328_v39 = vld [vmem:[%s7590_s3 + $0x178] sm:$0xff]  ;;  %v6653_v59 = vpack.c.bf16 %v319_v28, %v315_v23  ;;  %v342_v1 = vld [vmem:[%s7590_s3 + $0x1e8] sm:$0xff]  ;;  %v323_v12 = vld [vmem:[%s7590_s3 + $0x150] sm:$0xff] }
  0x2b   :  { %4644 = vmatprep.subr.bf16.mxu0 %v6491_v21  ;;  %509 = vmatmul.mubr.f32.gmra.mrb[2].mxu1 %v7593_v7  ;;  %7716 = vst [vmem:[#allocation45_spill] sm:$0xff] %v6641_v44  ;;  %v6659_v2 = vpack.c.bf16 %v328_v39, %v324_v34  ;;  %v332_v23 = vld [vmem:[%s7590_s3 + $0x198] sm:$0xff] }
  0x2c   :  { %4674 = vmatpush1.bf16.msra.mxu1 %v6541_v57  ;;  %743 = vmatprep.mubr.f32.mxu1 %v7593_v7  ;;  %v333_v7 = vld [vmem:[%s7590_s3 + $0x1a0] sm:$0xff]  ;;  %v336_v28 = vld [vmem:[%s7590_s3 + $0x1b8] sm:$0xff] }
  0x2d   :  { %4676 = vmatprep.subr.bf16.mxu1 %v6548_v63  ;;  %v6674_v34 = vpack.c.bf16 %v333_v7, %v329_v51  ;;  %v6689_v7 = vpack.c.bf16 %v336_v28, %v332_v23  ;;  %v335_v51 = vld [vmem:[%s7590_s3 + $0x1b0] sm:$0xff] }
  0x2e   :  { %4646 = vmatpush1.bf16.msra.mxu0 %v6525_v47 }
  0x2f   :  { %4648 = vmatprep.subr.bf16.mxu0 %v6529_v49  ;;  %7717 = vst [vmem:[#allocation46_spill] sm:$0xff] %v6674_v34 }
  0x30   :  { %4678 = vmatpush1.bf16.msra.mxu1 %v6580_v29 }
  0x31   :  { %4680 = vmatprep.subr.bf16.mxu1 %v6586_v38 }
  0x32   :  { %4650 = vmatpush1.bf16.msra.mxu0 %v6564_v13 }
  0x33   :  { %4652 = vmatprep.subr.bf16.mxu0 %v6568_v16  ;;  %v337_v16 = vld [vmem:[%s7590_s3 + $0x1c0] sm:$0xff] }
  0x34   :  { %4682 = vmatpush1.bf16.msra.mxu1 %v6617_v5 }
  0x35   :  { %4684 = vmatprep.subr.bf16.mxu1 %v6623_v19  ;;  %v341_v19 = vld [vmem:[%s7590_s3 + $0x1e0] sm:$0xff] }
  0x36   :  { %4654 = vmatpush1.bf16.msra.mxu0 %v6602_v54  ;;  %v338_v54 = vld [vmem:[%s7590_s3 + $0x1c8] sm:$0xff] }
  0x37   :  { %4656 = vmatprep.subr.bf16.mxu0 %v6605_v56  ;;  %v327_v56 = vld [vmem:[%s7590_s3 + $0x170] sm:$0xff]  ;;  %v6677_v39 = vpack.c.bf16 %v342_v1, %v338_v54  ;;  %v340_v1 = vld [vmem:[%s7590_s3 + $0x1d8] sm:$0xff] }
  0x38   :  { %4686 = vmatpush1.bf16.msra.mxu1 %v6653_v59  ;;  %v6686_v13 = vpack.c.bf16 %v327_v56, %v323_v12  ;;  %v331_v54 = vld [vmem:[%s7590_s3 + $0x190] sm:$0xff]  ;;  %v344_v56 = vld [vmem:[%s7590_s3 + $0x1f8] sm:$0xff]  ;;  %v6704_v12 = vpack.c.bf16 %v341_v19, %v337_v16  ;;  %v7718_v19 = vmov 0.0  }
  0x39   :  { %4688 = vmatprep.subr.bf16.mxu1 %v6659_v2  ;;  %v6708_v23 = vpack.c.bf16 %v335_v51, %v331_v54  ;;  %v6711_v28 = vpack.c.bf16 %v344_v56, %v340_v1  ;;  %v29_v51 = vld [vmem:[%s7587_s0 + $0x20] sm:$0xff]  ;;  %v27_v56 = vld [vmem:[%s7587_s0 + $0x8] sm:$0xff] }
  0x3a   :  { %4658 = vmatpush1.bf16.msra.mxu0 %v6638_v40 }
  0x3b   :  { %4660 = vmatprep.subr.bf16.mxu0 %v6641_v44  ;;  %v339_v44 = vld [vmem:[%s7590_s3 + $0x1d0] sm:$0xff] }
  0x3c   :  { %4690 = vmatpush1.bf16.msra.mxu1 %v6686_v13 }
  0x3d   :  { %4692 = vmatprep.subr.bf16.mxu1 %v6689_v7 }
  0x3e   :  { %4662 = vmatpush1.bf16.msra.mxu0 %v6674_v34  ;;  %v343_v34 = vld [vmem:[%s7590_s3 + $0x1f0] sm:$0xff] }
  0x3f   :  { %4664 = vmatprep.subr.bf16.mxu0 %v6677_v39  ;;  %v6721_v16 = vpack.c.bf16 %v343_v34, %v339_v44  ;;  %v25_v44 = vld [vmem:[%s7587_s0] sm:$0xff] }
  0x40   :  { %4694 = vmatpush1.bf16.msra.mxu1 %v6708_v23  ;;  %v349_v34 = vunpack.c.l.bf16 %v25_v44  ;;  %v350_v54 = vunpack.c.h.bf16 %v25_v44  ;;  %v31_v44 = vld [vmem:[%s7587_s0 + $0x28] sm:$0xff] }
  0x41   :  { %4696 = vmatprep.subr.bf16.mxu1 %v6711_v28 }
  0x42   :  { %4666 = vmatpush1.bf16.msra.mxu0 %v6704_v12 }
  0x43   :  { %4700 = vmatprep.subr.bf16.mxu0 %v6148_v3 }
  0x44   :  { %4698 = vmatpush1.bf16.msra.mxu1 %v6721_v16 }
  0x45   :  { %667 = vmatmul.mubr.f32.vlgmr.msra.gmra.mrb[4].mxu0 %v7718_v19  ;;  %4732 = vmatprep.subr.bf16.mxu1 %v6202_v22 }
  0x46   :  { %672 = vmatprep.mubr.f32.mxu0 %v7718_v19  ;;  %4702 = vmatpush1.bf16.msra.mxu0 %v6161_v8 }
  0x47   :  { %4704 = vmatprep.subr.bf16.mxu0 %v6163_v9  ;;  %744 = vmatmul.mubr.f32.vlgmr.msra.gmra.mrb[4].mxu1 %v7718_v19 }
  0x48   :  { %749 = vmatprep.mubr.f32.mxu1 %v7718_v19  ;;  %4734 = vmatpush1.bf16.msra.mxu1 %v6210_v25 }
  0x49   :  { %673 = vmatmul.mubr.f32.gmra.mrb[6].mxu0 %v7718_v19  ;;  %4736 = vmatprep.subr.bf16.mxu1 %v6235_v33 }
  0x4a   :  { %4706 = vmatpush1.bf16.msra.mxu0 %v6179_v14  ;;  %908 = vmatprep.mubr.f32.mxu0 %v7718_v19 }
  0x4b   :  { %4708 = vmatprep.subr.bf16.mxu0 %v6188_v17  ;;  %750 = vmatmul.mubr.f32.gmra.mrb[6].mxu1 %v7718_v19 }
  0x4c   :  { %4738 = vmatpush1.bf16.msra.mxu1 %v6246_v37  ;;  %985 = vmatprep.mubr.f32.mxu1 %v7718_v19 }
  0x4d   :  { %4740 = vmatprep.subr.bf16.mxu1 %v6270_v45 }
  0x4e   :  { %4710 = vmatpush1.bf16.msra.mxu0 %v6213_v26 }
  0x4f   :  { %4712 = vmatprep.subr.bf16.mxu0 %v6226_v30 }
  0x50   :  { %4742 = vmatpush1.bf16.msra.mxu1 %v6279_v48 }
  0x51   :  { %4744 = vmatprep.subr.bf16.mxu1 %v6291_v52 }
  0x52   :  { %4714 = vmatpush1.bf16.msra.mxu0 %v6262_v42 }
  0x53   :  { %4716 = vmatprep.subr.bf16.mxu0 %v6273_v46  ;;  %v355_v46 = vunpack.c.l.bf16 %v31_v44 }
  0x54   :  { %4746 = vmatpush1.bf16.msra.mxu1 %v6321_v62 }
  0x55   :  { %4748 = vmatprep.subr.bf16.mxu1 %v6327_v0 }
  0x56   :  { %4718 = vmatpush1.bf16.msra.mxu0 %v6300_v55 }
  0x57   :  { %4720 = vmatprep.subr.bf16.mxu0 %v6309_v58 }
  0x58   :  { %4750 = vmatpush1.bf16.msra.mxu1 %v6357_v15  ;;  %v356_v15 = vunpack.c.h.bf16 %v31_v44 }
  0x59   :  { %4752 = vmatprep.subr.bf16.mxu1 %v6363_v18 }
  0x5a   :  { %4722 = vmatpush1.bf16.msra.mxu0 %v6342_v6 }
  0x5b   :  { %4724 = vmatprep.subr.bf16.mxu0 %v6345_v10 }
  0x5c   :  { %4754 = vmatpush1.bf16.msra.mxu1 %v6393_v32 }
  0x5d   :  { %4756 = vmatprep.subr.bf16.mxu1 %v6399_v35 }
  0x5e   :  { %4726 = vmatpush1.bf16.msra.mxu0 %v6378_v24 }
  0x5f   :  { %4728 = vmatprep.subr.bf16.mxu0 %v6381_v27 }
  0x60   :  { %4758 = vmatpush1.bf16.msra.mxu1 %v6429_v50  ;;  %v352_v50 = vunpack.c.h.bf16 %v27_v56 }
  0x61   :  { %4760 = vmatprep.subr.bf16.mxu1 %v6435_v53 }
  0x62   :  { %4730 = vmatpush1.bf16.msra.mxu0 %v6414_v41 }
  0x63   :  { %4764 = vmatprep.subr.bf16.mxu0 %v6417_v43 }
  0x64   :  { %4762 = vmatpush1.bf16.msra.mxu1 %v6465_v4  ;;  %v353_v4 = vunpack.c.l.bf16 %v29_v51 }
  0x65   :  { %4796 = vmatprep.subr.bf16.mxu1 %v6471_v11  ;;  %v354_v11 = vunpack.c.h.bf16 %v29_v51 }
  0xf8   :  { %v427_v1 = vpop.f32.mrb[0].mxu0 }
  0xf9   :  { %v515_v43 = vadd.f32 %v427_v1, %v349_v34  ;;  %v429_v41 = vpop.f32.mrb[1].mxu0 }
  0xfa   :  { %v516_v53 = vadd.f32 %v429_v41, %v350_v54  ;;  %v504_v6 = vpop.f32.mrb[0].mxu1  ;;  %v351_v54 = vunpack.c.l.bf16 %v27_v56 }
  0xfb   :  { %v4289_v27 = vmul.f32 -1.442695, %v515_v43  ;;  %v506_v58 = vpop.f32.mrb[1].mxu1 }
  0xfc   :  { %v4291_v24 = vmul.f32 -1.442695, %v516_v53  ;;  %v433_v35 = vpop.f32.mrb[2].mxu0  ;;  %v518_v1 = vadd.f32 %v506_v58, %v352_v50  ;;  %v517_v0 = vadd.f32 %v504_v6, %v351_v54 }
  0xfd   :  { %5596 = vpow2.f32 %v4289_v27  ;;  %v519_v10 = vadd.f32 %v433_v35, %v353_v4  ;;  %v435_v32 = vpop.f32.mrb[3].mxu0 }
  0xfe   :  { %5598 = vpow2.f32 %v4291_v24  ;;  %v520_v18 = vadd.f32 %v435_v32, %v354_v11  ;;  %v510_v43 = vpop.f32.mrb[2].mxu1  ;;  %v4293_v51 = vmul.f32 -1.442695, %v518_v1 }
  0xff   :  { %v4290_v34 = vmul.f32 -1.442695, %v519_v10  ;;  %v512_v53 = vpop.f32.mrb[3].mxu1  ;;  %v521_v32 = vadd.f32 %v510_v43, %v355_v46 }
 0x100   :  { %v4292_v41 = vmul.f32 -1.442695, %v520_v18  ;;  %v522_v55 = vadd.f32 %v512_v53, %v356_v15  ;;  %v4287_v53 = vld [vmem:[%s7588_s1 + $0x1f0] sm:$0xff] }
 0x101   :  { %5600 = vpow2.f32 %v4290_v34 }
 0x102   :  { %5602 = vpow2.f32 %v4292_v41  ;;  %v4294_v27 = vmul.f32 -1.442695, %v522_v55  ;;  %v4285_v55 = vld [vmem:[%s7588_s1 + $0x1d0] sm:$0xff] }
 0x103   :  { %5604 = vpow2.f32 %v4293_v51  ;;  %v590_v1 = vunpack.c.l.bf16 %v4285_v55  ;;  %v591_v43 = vunpack.c.h.bf16 %v4285_v55 }
 0x104   :  { %5606 = vtanh.f32 %v517_v0 }
 0x105   :  { %5608 = vpow2.f32 %v4294_v27 }
 0x107   :  { %v5597_v35 = vpop.eup %5596 }
 0x108   :  { %v5599_v4 = vpop.eup %5598  ;;  %v529_v24 = vadd.f32 1.0, %v5597_v35 }
 0x109   :  { %v541_v10 = vadd.f32 1.0, %v5599_v4 }
 0x10a   :  { %5610 = vrcp.f32 %v529_v24  ;;  %v4286_v24 = vld [vmem:[%s7588_s1 + $0x1d8] sm:$0xff] }
 0x10b   :  { %v5601_v58 = vpop.eup %5600  ;;  %5612 = vrcp.f32 %v541_v10 }
 0x10c   :  { %v5603_v18 = vpop.eup %5602  ;;  %v530_v50 = vadd.f32 1.0, %v5601_v58  ;;  %5614 = vtanh.f32 %v521_v32 }
 0x10d   :  { %v542_v11 = vadd.f32 1.0, %v5603_v18  ;;  %v5605_v6 = vpop.eup %5604 }
 0x10e   :  { %5616 = vrcp.f32 %v530_v50  ;;  %v5607_v15 = vpop.eup %5606  ;;  %v555_v46 = vadd.f32 1.0, %v5605_v6  ;;  %v594_v50 = vunpack.c.l.bf16 %v4287_v53 }
 0x10f   :  { %5618 = vrcp.f32 %v542_v11  ;;  %v5609_v56 = vpop.eup %5608 }
 0x110   :  { %5620 = vrcp.f32 %v555_v46  ;;  %v556_v35 = vadd.f32 1.0, %v5609_v56 }
 0x114   :  { %v5611_v0 = vpop.eup %5610 }
 0x115   :  { %v5613_v44 = vpop.eup %5612  ;;  %v563_v34 = vmul.f32 %v5611_v0, %v5607_v15  ;;  %v595_v15 = vunpack.c.h.bf16 %v4287_v53  ;;  %v593_v0 = vunpack.c.h.bf16 %v4286_v24 }
 0x116   :  { %v5615_v41 = vpop.eup %5614  ;;  %v561_v54 = vmul.f32 0.0, %v5613_v44 }
 0x118   :  { %v5617_v51 = vpop.eup %5616  ;;  %v6785_v27 = vadd.f32 %v563_v34, %v561_v54  ;;  %v668_v4 = vpop.f32.mrb[4].mxu0  ;;  %v4288_v34 = vld [vmem:[%s7588_s1 + $0x1f8] sm:$0xff] }
 0x119   :  { %v5619_v32 = vpop.eup %5618  ;;  %v564_v10 = vmul.f32 %v5617_v51, %v5615_v41  ;;  %v756_v58 = vadd.f32 %v668_v4, %v590_v1  ;;  %v670_v18 = vpop.f32.mrb[5].mxu0 }
 0x11a   :  { %7719 = vst [vmem:[#allocation47_spill] sm:$0xff] %v6785_v27  ;;  %v562_v11 = vmul.f32 0.0, %v5619_v32  ;;  %5622 = vtanh.f32 %v6785_v27  ;;  %v757_v6 = vadd.f32 %v670_v18, %v591_v43  ;;  %v745_v54 = vpop.f32.mrb[4].mxu1  ;;  %v597_v32 = vunpack.c.h.bf16 %v4288_v34  ;;  %v5621_v18 = vpop.eup %5620 }
 0x11b   :  { %v4297_v55 = vmul.f32 -1.442695, %v756_v58  ;;  %5624 = vrcp.f32 %v556_v35  ;;  %v747_v4 = vpop.f32.mrb[5].mxu1  ;;  %v592_v35 = vunpack.c.l.bf16 %v4286_v24  ;;  %v596_v27 = vunpack.c.l.bf16 %v4288_v34 }
 0x11c   :  { %v6791_v44 = vadd.f32 %v564_v10, %v562_v11  ;;  %v4299_v56 = vmul.f32 -1.442695, %v757_v6  ;;  %v674_v46 = vpop.f32.mrb[6].mxu0  ;;  %v759_v53 = vadd.f32 %v747_v4, %v593_v0 }
 0x11d   :  { %5626 = vpow2.f32 %v4297_v55  ;;  %v760_v1 = vadd.f32 %v674_v46, %v594_v50  ;;  %v676_v41 = vpop.f32.mrb[7].mxu0  ;;  %v758_v46 = vadd.f32 %v745_v54, %v592_v35 }
 0x11e   :  { %5628 = vpow2.f32 %v4299_v56  ;;  %v761_v51 = vadd.f32 %v676_v41, %v595_v15  ;;  %v751_v58 = vpop.f32.mrb[6].mxu1  ;;  %v4301_v6 = vmul.f32 -1.442695, %v759_v53 }
 0x11f   :  { %v4298_v43 = vmul.f32 -1.442695, %v760_v1  ;;  %5630 = vtanh.f32 %v6791_v44  ;;  %v753_v11 = vpop.f32.mrb[7].mxu1  ;;  %v762_v24 = vadd.f32 %v751_v58, %v596_v27 }
 0x120   :  { %v4300_v10 = vmul.f32 -1.442695, %v761_v51  ;;  %v763_v55 = vadd.f32 %v753_v11, %v597_v32 }
 0x121   :  { %5632 = vpow2.f32 %v4298_v43 }
 0x122   :  { %5634 = vpow2.f32 %v4300_v10  ;;  %v4302_v15 = vmul.f32 -1.442695, %v763_v55 }
 0x123   :  { %5636 = vpow2.f32 %v4301_v6 }
 0x124   :  { %v5623_v50 = vpop.eup %5622  ;;  %5638 = vtanh.f32 %v758_v46  ;;  %v7720_v46 = vld [vmem:[#allocation40_spill] sm:$0xff] }
 0x125   :  { %v569_v56 = vmul.f32 %v5623_v50, %v5621_v18  ;;  %v5625_v41 = vpop.eup %5624  ;;  %5640 = vpow2.f32 %v4302_v15 }
 0x127   :  { %v5627_v1 = vpop.eup %5626  ;;  %909 = vmatmul.mubr.f32.vlgmr.msra.gmra.mrb[8].mxu0 %v569_v56  ;;  %986 = vmatmul.mubr.f32.vlgmr.msra.gmra.mrb[8].mxu1 %v569_v56 }
 0x128   :  { %v5629_v0 = vpop.eup %5628  ;;  %v770_v51 = vadd.f32 1.0, %v5627_v1  ;;  %4766 = vmatpush1.bf16.msra.mxu0 %v6450_v60  ;;  %4798 = vmatpush1.bf16.msra.mxu1 %v6503_v31  ;;  %v7722_v1 = vld [vmem:[#allocation41_spill] sm:$0xff] }
 0x129   :  { %v5631_v4 = vpop.eup %5630  ;;  %v782_v43 = vadd.f32 1.0, %v5629_v0  ;;  %914 = vmatprep.mubr.f32.mxu0 %v7718_v19  ;;  %4768 = vmatprep.subr.bf16.mxu0 %v6453_v61 }
 0x12a   :  { %5642 = vrcp.f32 %v770_v51  ;;  %v570_v34 = vmul.f32 %v5631_v4, %v5625_v41  ;;  %4800 = vmatprep.subr.bf16.mxu1 %v6509_v36  ;;  %991 = vmatprep.mubr.f32.mxu1 %v7718_v19 }
 0x12b   :  { %v5633_v54 = vpop.eup %5632  ;;  %5644 = vrcp.f32 %v782_v43 }
 0x12c   :  { %v5635_v53 = vpop.eup %5634  ;;  %v771_v32 = vadd.f32 1.0, %v5633_v54  ;;  %5646 = vtanh.f32 %v762_v24  ;;  %v4480_v10 = vpack.c.bf16 %v570_v34, %v569_v56  ;;  %915 = vmatmul.mubr.f32.gmra.mrb[10].mxu0 %v570_v34  ;;  %4802 = vmatpush1.bf16.msra.mxu1 %v6541_v57  ;;  %v7721_v56 = vld [vmem:[#allocation44_spill] sm:$0xff] }
 0x12d   :  { %v783_v27 = vadd.f32 1.0, %v5635_v53  ;;  %4770 = vmatpush1.bf16.msra.mxu0 %v6488_v20  ;;  %4804 = vmatprep.subr.bf16.mxu1 %v6548_v63  ;;  %v5637_v35 = vpop.eup %5636  ;;  %v7724_v53 = vld [vmem:[#allocation43_spill] sm:$0xff] }
 0x12e   :  { %5648 = vrcp.f32 %v771_v32  ;;  %4481 = vst [vmem:[%s7591_s4] sm:$0xff] %v4480_v10   ;;  %4772 = vmatprep.subr.bf16.mxu0 %v6491_v21  ;;  %992 = vmatmul.mubr.f32.gmra.mrb[10].mxu1 %v570_v34  ;;  %v5639_v58 = vpop.eup %5638  ;;  %v796_v6 = vadd.f32 1.0, %v5637_v35  ;;  %v7723_v34 = vld [vmem:[#allocation42_spill] sm:$0xff]  ;;  %v7725_v10 = vld [vmem:[#allocation45_spill] sm:$0xff] }
 0x12f   :  { %5650 = vrcp.f32 %v783_v27  ;;  %1150 = vmatprep.mubr.f32.mxu0 %v7718_v19  ;;  %1227 = vmatprep.mubr.f32.mxu1 %v7718_v19  ;;  %v5641_v18 = vpop.eup %5640  ;;  %v7726_v27 = vld [vmem:[#allocation46_spill] sm:$0xff] }
 0x130   :  { %4806 = vmatpush1.bf16.msra.mxu1 %v6580_v29  ;;  %5652 = vrcp.f32 %v796_v6  ;;  %v797_v24 = vadd.f32 1.0, %v5641_v18 }
 0x131   :  { %4774 = vmatpush1.bf16.msra.mxu0 %v6525_v47  ;;  %4808 = vmatprep.subr.bf16.mxu1 %v6586_v38 }
 0x132   :  { %4776 = vmatprep.subr.bf16.mxu0 %v6529_v49 }
 0x134   :  { %v5643_v11 = vpop.eup %5642  ;;  %4810 = vmatpush1.bf16.msra.mxu1 %v6617_v5 }
 0x135   :  { %v5645_v55 = vpop.eup %5644  ;;  %v804_v50 = vmul.f32 %v5643_v11, %v5639_v58  ;;  %4778 = vmatpush1.bf16.msra.mxu0 %v7720_v46  ;;  %4812 = vmatprep.subr.bf16.mxu1 %v7721_v56 }
 0x136   :  { %v5647_v15 = vpop.eup %5646  ;;  %v802_v41 = vmul.f32 0.0, %v5645_v55  ;;  %4780 = vmatprep.subr.bf16.mxu0 %v7722_v1 }
 0x138   :  { %v5649_v0 = vpop.eup %5648  ;;  %v6820_v51 = vadd.f32 %v804_v50, %v802_v41  ;;  %4814 = vmatpush1.bf16.msra.mxu1 %v6653_v59  ;;  %v7728_v41 = vld [vmem:[#allocation25_spill] sm:$0xff] }
 0x139   :  { %v5651_v4 = vpop.eup %5650  ;;  %v805_v43 = vmul.f32 %v5649_v0, %v5647_v15  ;;  %4782 = vmatpush1.bf16.msra.mxu0 %v7723_v34  ;;  %4816 = vmatprep.subr.bf16.mxu1 %v6659_v2  ;;  %v7727_v15 = vld [vmem:[#allocation19_spill] sm:$0xff]  ;;  %v7729_v0 = vld [vmem:[#allocation22_spill] sm:$0xff] }
 0x13a   :  { %v803_v54 = vmul.f32 0.0, %v5651_v4  ;;  %5654 = vtanh.f32 %v6820_v51  ;;  %4784 = vmatprep.subr.bf16.mxu0 %v7724_v53  ;;  %v5653_v35 = vpop.eup %5652  ;;  %v7731_v4 = vld [vmem:[#allocation23_spill] sm:$0xff] }
 0x13b   :  { %5656 = vrcp.f32 %v797_v24  ;;  %v7730_v24 = vld [vmem:[#allocation28_spill] sm:$0xff] }
 0x13c   :  { %v6827_v32 = vadd.f32 %v805_v43, %v803_v54  ;;  %4818 = vmatpush1.bf16.msra.mxu1 %v6686_v13  ;;  %v7732_v43 = vld [vmem:[#allocation29_spill] sm:$0xff]  ;;  %v7733_v54 = vld [vmem:[#allocation26_spill] sm:$0xff] }
 0x13d   :  { %4786 = vmatpush1.bf16.msra.mxu0 %v6638_v40  ;;  %4820 = vmatprep.subr.bf16.mxu1 %v6689_v7 }
 0x13e   :  { %4788 = vmatprep.subr.bf16.mxu0 %v7725_v10  ;;  %5658 = vtanh.f32 %v6827_v32 }
 0x140   :  { %4822 = vmatpush1.bf16.msra.mxu1 %v6708_v23 }
 0x141   :  { %4790 = vmatpush1.bf16.msra.mxu0 %v7726_v27  ;;  %4824 = vmatprep.subr.bf16.mxu1 %v6711_v28 }
 0x142   :  { %4792 = vmatprep.subr.bf16.mxu0 %v6677_v39 }
 0x144   :  { %v5655_v58 = vpop.eup %5654  ;;  %4826 = vmatpush1.bf16.msra.mxu1 %v6721_v16 }
 0x145   :  { %4794 = vmatpush1.bf16.msra.mxu0 %v6704_v12  ;;  %v810_v18 = vmul.f32 %v5655_v58, %v5653_v35  ;;  %4860 = vmatprep.subr.bf16.mxu1 %v6202_v22  ;;  %v5657_v11 = vpop.eup %5656  ;;  %v7734_v35 = vld [vmem:[#allocation32_spill] sm:$0xff]  ;;  %v7735_v58 = vld [vmem:[#allocation27_spill] sm:$0xff] }
 0x146   :  { %4828 = vmatprep.subr.bf16.mxu0 %v6148_v3 }
 0x147   :  { %1228 = vmatmul.mubr.f32.vlgmr.msra.gmra.mrb[12].mxu1 %v810_v18 }
 0x148   :  { %v5659_v6 = vpop.eup %5658  ;;  %1151 = vmatmul.mubr.f32.vlgmr.msra.gmra.mrb[12].mxu0 %v810_v18  ;;  %1233 = vmatprep.mubr.f32.mxu1 %v7718_v19 }
 0x149   :  { %1156 = vmatprep.mubr.f32.mxu0 %v7718_v19  ;;  %v811_v55 = vmul.f32 %v5659_v6, %v5657_v11  ;;  %4830 = vmatpush1.bf16.msra.mxu0 %v6161_v8  ;;  %v7737_v11 = vld [vmem:[#allocation30_spill] sm:$0xff]  ;;  %v7738_v6 = vld [vmem:[#allocation36_spill] sm:$0xff] }
 0x14a   :  { %4862 = vmatpush1.bf16.msra.mxu1 %v6210_v25  ;;  %4832 = vmatprep.subr.bf16.mxu0 %v6163_v9 }
 0x14b   :  { %v4485_v50 = vpack.c.bf16 %v811_v55, %v810_v18  ;;  %1234 = vmatmul.mubr.f32.gmra.mrb[14].mxu1 %v811_v55  ;;  %4864 = vmatprep.subr.bf16.mxu1 %v6235_v33  ;;  %v7736_v18 = vld [vmem:[#allocation33_spill] sm:$0xff] }
 0x14c   :  { %1157 = vmatmul.mubr.f32.gmra.mrb[14].mxu0 %v811_v55  ;;  %1469 = vmatprep.mubr.f32.mxu1 %v7718_v19  ;;  %v7739_v55 = vld [vmem:[#allocation31_spill] sm:$0xff] }
 0x14d   :  { %4557 = vst [vmem:[%s7592_s5 + $0x38] sm:$0xff] %v4485_v50   ;;  %4834 = vmatpush1.bf16.msra.mxu0 %v6179_v14  ;;  %1392 = vmatprep.mubr.f32.mxu0 %v7718_v19  ;;  %v7740_v50 = vld [vmem:[#allocation37_spill] sm:$0xff] }
 0x14e   :  { %4866 = vmatpush1.bf16.msra.mxu1 %v6246_v37  ;;  %4836 = vmatprep.subr.bf16.mxu0 %v6188_v17 }
 0x14f   :  { %4868 = vmatprep.subr.bf16.mxu1 %v6270_v45 }
 0x151   :  { %4838 = vmatpush1.bf16.msra.mxu0 %v6213_v26 }
 0x152   :  { %4870 = vmatpush1.bf16.msra.mxu1 %v6279_v48  ;;  %4840 = vmatprep.subr.bf16.mxu0 %v6226_v30 }
 0x153   :  { %4872 = vmatprep.subr.bf16.mxu1 %v6291_v52 }
 0x155   :  { %4842 = vmatpush1.bf16.msra.mxu0 %v6262_v42 }
 0x156   :  { %4874 = vmatpush1.bf16.msra.mxu1 %v6321_v62  ;;  %4844 = vmatprep.subr.bf16.mxu0 %v7727_v15 }
 0x157   :  { %4876 = vmatprep.subr.bf16.mxu1 %v7728_v41 }
 0x159   :  { %4846 = vmatpush1.bf16.msra.mxu0 %v7729_v0 }
 0x15a   :  { %4878 = vmatpush1.bf16.msra.mxu1 %v7730_v24  ;;  %4848 = vmatprep.subr.bf16.mxu0 %v7731_v4  ;;  %v7741_v24 = vld [vmem:[#allocation34_spill] sm:$0xff] }
 0x15b   :  { %4880 = vmatprep.subr.bf16.mxu1 %v7732_v43  ;;  %v7742_v4 = vld [vmem:[#allocation38_spill] sm:$0xff]  ;;  %v7743_v43 = vld [vmem:[#allocation35_spill] sm:$0xff] }
 0x15d   :  { %4850 = vmatpush1.bf16.msra.mxu0 %v7733_v54  ;;  %v7744_v54 = vld [vmem:[#allocation39_spill] sm:$0xff] }
 0x15e   :  { %4882 = vmatpush1.bf16.msra.mxu1 %v7734_v35  ;;  %4852 = vmatprep.subr.bf16.mxu0 %v7735_v58 }
 0x15f   :  { %4884 = vmatprep.subr.bf16.mxu1 %v7736_v18  ;;  %v33_v18 = vld [vmem:[%s7587_s0 + $0x40] sm:$0xff] }
 0x160   :  { %v832_v58 = vunpack.c.l.bf16 %v33_v18 }
 0x161   :  { %4854 = vmatpush1.bf16.msra.mxu0 %v7737_v11  ;;  %v833_v11 = vunpack.c.h.bf16 %v33_v18 }
 0x162   :  { %4886 = vmatpush1.bf16.msra.mxu1 %v7738_v6  ;;  %4856 = vmatprep.subr.bf16.mxu0 %v7739_v55  ;;  %v37_v55 = vld [vmem:[%s7587_s0 + $0x60] sm:$0xff] }
 0x163   :  { %4888 = vmatprep.subr.bf16.mxu1 %v7740_v50  ;;  %v836_v0 = vunpack.c.l.bf16 %v37_v55  ;;  %v837_v15 = vunpack.c.h.bf16 %v37_v55 }
 0x165   :  { %4858 = vmatpush1.bf16.msra.mxu0 %v7741_v24 }
 0x166   :  { %4890 = vmatpush1.bf16.msra.mxu1 %v7742_v4  ;;  %4892 = vmatprep.subr.bf16.mxu0 %v7743_v43  ;;  %v35_v4 = vld [vmem:[%s7587_s0 + $0x48] sm:$0xff] }
 0x167   :  { %4924 = vmatprep.subr.bf16.mxu1 %v7744_v54  ;;  %v835_v42 = vunpack.c.h.bf16 %v35_v4 }
 0x1fa   :  { %v910_v6 = vpop.f32.mrb[8].mxu0  ;;  %v987_v50 = vpop.f32.mrb[8].mxu1 }
 0x1fb   :  { %v998_v35 = vadd.f32 %v910_v6, %v832_v58  ;;  %v912_v43 = vpop.f32.mrb[9].mxu0  ;;  %v989_v24 = vpop.f32.mrb[9].mxu1  ;;  %v39_v58 = vld [vmem:[%s7587_s0 + $0x68] sm:$0xff] }
 0x1fc   :  { %v999_v54 = vadd.f32 %v912_v43, %v833_v11  ;;  %v1001_v26 = vadd.f32 %v989_v24, %v835_v42  ;;  %v834_v43 = vunpack.c.l.bf16 %v35_v4  ;;  %v838_v55 = vunpack.c.l.bf16 %v39_v58  ;;  %v4281_v4 = vld [vmem:[%s7588_s1 + $0x190] sm:$0xff] }
 0x1fd   :  { %v4307_v41 = vmul.f32 -1.442695, %v998_v35  ;;  %v839_v35 = vunpack.c.h.bf16 %v39_v58 }
 0x1fe   :  { %v4309_v62 = vmul.f32 -1.442695, %v999_v54  ;;  %v4311_v54 = vmul.f32 -1.442695, %v1001_v26 }
 0x1ff   :  { %5660 = vpow2.f32 %v4307_v41  ;;  %v916_v18 = vpop.f32.mrb[10].mxu0  ;;  %v1000_v41 = vadd.f32 %v987_v50, %v834_v43 }
 0x200   :  { %5662 = vpow2.f32 %v4309_v62  ;;  %v1002_v52 = vadd.f32 %v916_v18, %v836_v0  ;;  %v918_v30 = vpop.f32.mrb[11].mxu0 }
 0x201   :  { %v1003_v48 = vadd.f32 %v918_v30, %v837_v15  ;;  %v993_v6 = vpop.f32.mrb[10].mxu1 }
 0x202   :  { %v4308_v45 = vmul.f32 -1.442695, %v1002_v52  ;;  %v995_v17 = vpop.f32.mrb[11].mxu1  ;;  %v1004_v37 = vadd.f32 %v993_v6, %v838_v55  ;;  %v1075_v55 = vunpack.c.h.bf16 %v4281_v4 }
 0x203   :  { %v4310_v11 = vmul.f32 -1.442695, %v1003_v48  ;;  %v1005_v62 = vadd.f32 %v995_v17, %v839_v35 }
 0x204   :  { %5664 = vpow2.f32 %v4308_v45 }
 0x205   :  { %5666 = vpow2.f32 %v4310_v11  ;;  %v4312_v42 = vmul.f32 -1.442695, %v1005_v62  ;;  %v7745_v11 = vld [vmem:[#allocation47_spill] sm:$0xff] }
 0x206   :  { %5668 = vpow2.f32 %v4311_v54  ;;  %v1074_v54 = vunpack.c.l.bf16 %v4281_v4 }
 0x207   :  { %5670 = vtanh.f32 %v1000_v41 }
 0x209   :  { %v5661_v0 = vpop.eup %5660 }
 0x20a   :  { %v5663_v18 = vpop.eup %5662  ;;  %v1012_v30 = vadd.f32 1.0, %v5661_v0 }
 0x20b   :  { %v1024_v15 = vadd.f32 1.0, %v5663_v18 }
 0x20c   :  { %5672 = vrcp.f32 %v1012_v30 }
 0x20d   :  { %5674 = vrcp.f32 %v1024_v15 }
 0x20e   :  { %v5665_v52 = vpop.eup %5664  ;;  %5676 = vtanh.f32 %v1004_v37  ;;  %v4283_v37 = vld [vmem:[%s7588_s1 + $0x1b0] sm:$0xff] }
 0x20f   :  { %v5667_v24 = vpop.eup %5666  ;;  %v1013_v48 = vadd.f32 1.0, %v5665_v52  ;;  %5678 = vpow2.f32 %v4312_v42 }
 0x210   :  { %v1025_v45 = vadd.f32 1.0, %v5667_v24  ;;  %v5669_v26 = vpop.eup %5668 }
 0x211   :  { %5680 = vrcp.f32 %v1013_v48  ;;  %v5671_v17 = vpop.eup %5670  ;;  %v1038_v43 = vadd.f32 1.0, %v5669_v26 }
 0x212   :  { %5682 = vrcp.f32 %v1025_v45  ;;  %v4282_v45 = vld [vmem:[%s7588_s1 + $0x198] sm:$0xff] }
 0x213   :  { %5684 = vrcp.f32 %v1038_v43  ;;  %v1077_v33 = vunpack.c.h.bf16 %v4282_v45 }
 0x216   :  { %v5673_v50 = vpop.eup %5672 }
 0x217   :  { %v5675_v58 = vpop.eup %5674  ;;  %v1046_v6 = vmul.f32 %v5673_v50, %v5671_v17  ;;  %v1078_v17 = vunpack.c.l.bf16 %v4283_v37 }
 0x218   :  { %v1044_v35 = vmul.f32 %v5675_v58, %v7745_v11  ;;  %v5677_v41 = vpop.eup %5676  ;;  %v1079_v58 = vunpack.c.h.bf16 %v4283_v37 }
 0x219   :  { %v5679_v62 = vpop.eup %5678 }
 0x21a   :  { %v6900_v0 = vadd.f32 %v1046_v6, %v1044_v35  ;;  %v1229_v18 = vpop.f32.mrb[12].mxu1  ;;  %v1039_v35 = vadd.f32 1.0, %v5679_v62 }
 0x21b   :  { %v5681_v30 = vpop.eup %5680  ;;  %v1152_v15 = vpop.f32.mrb[12].mxu0 }
 0x21c   :  { %7746 = vst [vmem:[#allocation40_spill] sm:$0xff] %v6900_v0  ;;  %v1231_v42 = vpop.f32.mrb[13].mxu1  ;;  %v5683_v52 = vpop.eup %5682  ;;  %5686 = vtanh.f32 %v6900_v0  ;;  %v1047_v24 = vmul.f32 %v5681_v30, %v5677_v41  ;;  %v1240_v48 = vadd.f32 %v1152_v15, %v1074_v54  ;;  %v4284_v30 = vld [vmem:[%s7588_s1 + $0x1b8] sm:$0xff] }
 0x21d   :  { %v1154_v26 = vpop.f32.mrb[13].mxu0  ;;  %v1045_v4 = vmul.f32 %v5683_v52, %v6791_v44  ;;  %v1243_v37 = vadd.f32 %v1231_v42, %v1077_v33  ;;  %v5685_v62 = vpop.eup %5684 }
 0x21e   :  { %v1241_v50 = vadd.f32 %v1154_v26, %v1075_v55  ;;  %v4317_v6 = vmul.f32 -1.442695, %v1240_v48  ;;  %v1235_v11 = vpop.f32.mrb[14].mxu1  ;;  %v1076_v48 = vunpack.c.l.bf16 %v4282_v45 }
 0x21f   :  { %v6907_v43 = vadd.f32 %v1047_v24, %v1045_v4  ;;  %v1158_v0 = vpop.f32.mrb[14].mxu0  ;;  %v1237_v41 = vpop.f32.mrb[15].mxu1  ;;  %v1081_v24 = vunpack.c.h.bf16 %v4284_v30  ;;  %v4321_v4 = vmul.f32 -1.442695, %v1243_v37 }
 0x220   :  { %v4319_v14 = vmul.f32 -1.442695, %v1241_v50  ;;  %5688 = vpow2.f32 %v4317_v6  ;;  %v1244_v54 = vadd.f32 %v1158_v0, %v1078_v17  ;;  %v1160_v15 = vpop.f32.mrb[15].mxu0  ;;  %v1242_v17 = vadd.f32 %v1229_v18, %v1076_v48 }
 0x221   :  { %v1245_v44 = vadd.f32 %v1160_v15, %v1079_v58  ;;  %v1247_v50 = vadd.f32 %v1237_v41, %v1081_v24  ;;  %v1080_v6 = vunpack.c.l.bf16 %v4284_v30 }
 0x222   :  { %5690 = vpow2.f32 %v4319_v14  ;;  %v4318_v55 = vmul.f32 -1.442695, %v1244_v54 }
 0x223   :  { %5692 = vrcp.f32 %v1039_v35  ;;  %v4320_v52 = vmul.f32 -1.442695, %v1245_v44  ;;  %v4322_v45 = vmul.f32 -1.442695, %v1247_v50  ;;  %v1246_v35 = vadd.f32 %v1235_v11, %v1080_v6 }
 0x224   :  { %5694 = vpow2.f32 %v4318_v55 }
 0x225   :  { %5696 = vpow2.f32 %v4320_v52 }
 0x226   :  { %v5687_v26 = vpop.eup %5686  ;;  %5698 = vtanh.f32 %v6907_v43 }
 0x227   :  { %v1052_v0 = vmul.f32 %v5687_v26, %v5685_v62  ;;  %5700 = vpow2.f32 %v4321_v4 }
 0x228   :  { %5702 = vtanh.f32 %v1242_v17 }
 0x229   :  { %1393 = vmatmul.mubr.f32.vlgmr.msra.gmra.mrb[16].mxu0 %v1052_v0  ;;  %1470 = vmatmul.mubr.f32.vlgmr.msra.gmra.mrb[16].mxu1 %v1052_v0 }
 0x22a   :  { %v5689_v14 = vpop.eup %5688  ;;  %4894 = vmatpush1.bf16.msra.mxu0 %v6450_v60  ;;  %4926 = vmatpush1.bf16.msra.mxu1 %v6503_v31 }
 0x22b   :  { %v1254_v42 = vadd.f32 1.0, %v5689_v14  ;;  %1398 = vmatprep.mubr.f32.mxu0 %v7718_v19  ;;  %1475 = vmatprep.mubr.f32.mxu1 %v7718_v19 }
 0x22c   :  { %v5691_v33 = vpop.eup %5690  ;;  %4896 = vmatprep.subr.bf16.mxu0 %v6453_v61  ;;  %4928 = vmatprep.subr.bf16.mxu1 %v6509_v36 }
 0x22d   :  { %v1266_v58 = vadd.f32 1.0, %v5691_v33  ;;  %v5693_v18 = vpop.eup %5692  ;;  %5704 = vrcp.f32 %v1254_v42 }
 0x22e   :  { %v5695_v41 = vpop.eup %5694  ;;  %4898 = vmatpush1.bf16.msra.mxu0 %v6488_v20  ;;  %4930 = vmatpush1.bf16.msra.mxu1 %v6541_v57 }
 0x22f   :  { %5706 = vrcp.f32 %v1266_v58  ;;  %v5697_v54 = vpop.eup %5696  ;;  %v1255_v30 = vadd.f32 1.0, %v5695_v41  ;;  %4900 = vmatprep.subr.bf16.mxu0 %v6491_v21  ;;  %4932 = vmatprep.subr.bf16.mxu1 %v6548_v63 }
 0x230   :  { %5708 = vpow2.f32 %v4322_v45  ;;  %v1267_v11 = vadd.f32 1.0, %v5697_v54  ;;  %v5699_v15 = vpop.eup %5698 }
 0x231   :  { %5710 = vtanh.f32 %v1246_v35  ;;  %v1053_v44 = vmul.f32 %v5699_v15, %v5693_v18  ;;  %v5701_v37 = vpop.eup %5700  ;;  %v7748_v15 = vld [vmem:[#allocation10_spill] sm:$0xff] }
 0x232   :  { %5712 = vrcp.f32 %v1255_v30  ;;  %4902 = vmatpush1.bf16.msra.mxu0 %v6525_v47  ;;  %4934 = vmatpush1.bf16.msra.mxu1 %v6580_v29  ;;  %v5703_v52 = vpop.eup %5702  ;;  %v1280_v26 = vadd.f32 1.0, %v5701_v37  ;;  %v7747_v30 = vld [vmem:[#allocation15_spill] sm:$0xff]  ;;  %v7751_v37 = vld [vmem:[#allocation18_spill] sm:$0xff] }
 0x233   :  { %5714 = vrcp.f32 %v1267_v11  ;;  %4904 = vmatprep.subr.bf16.mxu0 %v6529_v49  ;;  %4936 = vmatprep.subr.bf16.mxu1 %v6586_v38  ;;  %v4490_v55 = vpack.c.bf16 %v1053_v44, %v1052_v0 }
 0x234   :  { %1399 = vmatmul.mubr.f32.gmra.mrb[18].mxu0 %v1053_v44  ;;  %1476 = vmatmul.mubr.f32.gmra.mrb[18].mxu1 %v1053_v44  ;;  %5716 = vrcp.f32 %v1280_v26  ;;  %v7749_v44 = vld [vmem:[#allocation16_spill] sm:$0xff]  ;;  %v7756_v26 = vld [vmem:[#allocation17_spill] sm:$0xff] }
 0x235   :  { %1634 = vmatprep.mubr.f32.mxu0 %v7718_v19  ;;  %1711 = vmatprep.mubr.f32.mxu1 %v7718_v19  ;;  %4558 = vst [vmem:[%s7591_s4 + $0x8] sm:$0xff] %v4490_v55   ;;  %v7750_v55 = vld [vmem:[#allocation11_spill] sm:$0xff] }
 0x236   :  { %4906 = vmatpush1.bf16.msra.mxu0 %v7720_v46  ;;  %4938 = vmatpush1.bf16.msra.mxu1 %v6617_v5 }
 0x237   :  { %v5705_v24 = vpop.eup %5704  ;;  %4908 = vmatprep.subr.bf16.mxu0 %v7722_v1  ;;  %4940 = vmatprep.subr.bf16.mxu1 %v7721_v56 }
 0x238   :  { %v1288_v62 = vmul.f32 %v5705_v24, %v5703_v52  ;;  %v7752_v52 = vld [vmem:[#allocation13_spill] sm:$0xff]  ;;  %v7753_v24 = vld [vmem:[#allocation20_spill] sm:$0xff] }
 0x239   :  { %v5707_v48 = vpop.eup %5706 }
 0x23a   :  { %v5709_v4 = vpop.eup %5708  ;;  %v1286_v50 = vmul.f32 %v5707_v48, %v6820_v51  ;;  %4910 = vmatpush1.bf16.msra.mxu0 %v7723_v34  ;;  %4942 = vmatpush1.bf16.msra.mxu1 %v6653_v59  ;;  %v7754_v48 = vld [vmem:[#allocation14_spill] sm:$0xff] }
 0x23b   :  { %v5711_v0 = vpop.eup %5710  ;;  %4912 = vmatprep.subr.bf16.mxu0 %v7724_v53  ;;  %4944 = vmatprep.subr.bf16.mxu1 %v6659_v2  ;;  %v1281_v42 = vadd.f32 1.0, %v5709_v4  ;;  %v7757_v4 = vld [vmem:[#allocation24_spill] sm:$0xff] }
 0x23c   :  { %v5713_v17 = vpop.eup %5712  ;;  %v6939_v6 = vadd.f32 %v1288_v62, %v1286_v50  ;;  %v7755_v62 = vld [vmem:[#allocation21_spill] sm:$0xff]  ;;  %v7758_v50 = vld [vmem:[#allocation19_spill] sm:$0xff] }
 0x23d   :  { %v5715_v14 = vpop.eup %5714  ;;  %v1289_v33 = vmul.f32 %v5713_v17, %v5711_v0  ;;  %v7759_v0 = vld [vmem:[#allocation25_spill] sm:$0xff]  ;;  %v7760_v17 = vld [vmem:[#allocation22_spill] sm:$0xff] }
 0x23e   :  { %5718 = vtanh.f32 %v6939_v6  ;;  %v1287_v51 = vmul.f32 %v5715_v14, %v6827_v32  ;;  %4914 = vmatpush1.bf16.msra.mxu0 %v6638_v40  ;;  %4946 = vmatpush1.bf16.msra.mxu1 %v6686_v13  ;;  %v5717_v32 = vpop.eup %5716  ;;  %v7761_v14 = vld [vmem:[#allocation28_spill] sm:$0xff] }
 0x23f   :  { %4916 = vmatprep.subr.bf16.mxu0 %v7725_v10  ;;  %4948 = vmatprep.subr.bf16.mxu1 %v6689_v7  ;;  %5720 = vrcp.f32 %v1281_v42  ;;  %v7763_v42 = vld [vmem:[#allocation29_spill] sm:$0xff] }
 0x240   :  { %v6949_v45 = vadd.f32 %v1289_v33, %v1287_v51  ;;  %v7762_v33 = vld [vmem:[#allocation23_spill] sm:$0xff]  ;;  %v7764_v51 = vld [vmem:[#allocation26_spill] sm:$0xff] }
 0x242   :  { %5722 = vtanh.f32 %v6949_v45  ;;  %4918 = vmatpush1.bf16.msra.mxu0 %v7726_v27  ;;  %4950 = vmatpush1.bf16.msra.mxu1 %v6708_v23 }
 0x243   :  { %4920 = vmatprep.subr.bf16.mxu0 %v6677_v39  ;;  %4952 = vmatprep.subr.bf16.mxu1 %v6711_v28 }
 0x246   :  { %4922 = vmatpush1.bf16.msra.mxu0 %v6704_v12  ;;  %4954 = vmatpush1.bf16.msra.mxu1 %v6721_v16 }
 0x247   :  { %4956 = vmatprep.subr.bf16.mxu0 %v6148_v3  ;;  %4988 = vmatprep.subr.bf16.mxu1 %v6202_v22 }
 0x248   :  { %v5719_v58 = vpop.eup %5718 }
 0x249   :  { %v1294_v35 = vmul.f32 %v5719_v58, %v5717_v32  ;;  %v5721_v18 = vpop.eup %5720  ;;  %v7765_v32 = vld [vmem:[#allocation32_spill] sm:$0xff]  ;;  %v7766_v58 = vld [vmem:[#allocation27_spill] sm:$0xff] }
 0x24b   :  { %1635 = vmatmul.mubr.f32.vlgmr.msra.gmra.mrb[20].mxu0 %v1294_v35  ;;  %1712 = vmatmul.mubr.f32.vlgmr.msra.gmra.mrb[20].mxu1 %v1294_v35 }
 0x24c   :  { %v5723_v41 = vpop.eup %5722  ;;  %1640 = vmatprep.mubr.f32.mxu0 %v7718_v19  ;;  %1717 = vmatprep.mubr.f32.mxu1 %v7718_v19 }
 0x24d   :  { %v1295_v54 = vmul.f32 %v5723_v41, %v5721_v18  ;;  %4958 = vmatpush1.bf16.msra.mxu0 %v6161_v8  ;;  %4990 = vmatpush1.bf16.msra.mxu1 %v6210_v25  ;;  %v7768_v18 = vld [vmem:[#allocation30_spill] sm:$0xff]  ;;  %v7769_v41 = vld [vmem:[#allocation36_spill] sm:$0xff] }
 0x24e   :  { %4960 = vmatprep.subr.bf16.mxu0 %v6163_v9  ;;  %4992 = vmatprep.subr.bf16.mxu1 %v7747_v30 }
 0x24f   :  { %v4495_v11 = vpack.c.bf16 %v1295_v54, %v1294_v35  ;;  %1641 = vmatmul.mubr.f32.gmra.mrb[22].mxu0 %v1295_v54  ;;  %1718 = vmatmul.mubr.f32.gmra.mrb[22].mxu1 %v1295_v54  ;;  %v7767_v35 = vld [vmem:[#allocation33_spill] sm:$0xff]  ;;  %v7770_v54 = vld [vmem:[#allocation31_spill] sm:$0xff] }
 0x250   :  { %1876 = vmatprep.mubr.f32.mxu0 %v7718_v19  ;;  %1953 = vmatprep.mubr.f32.mxu1 %v7718_v19 }
 0x251   :  { %4559 = vst [vmem:[%s7592_s5 + $0x30] sm:$0xff] %v4495_v11   ;;  %4962 = vmatpush1.bf16.msra.mxu0 %v7748_v15  ;;  %4994 = vmatpush1.bf16.msra.mxu1 %v7749_v44  ;;  %v7771_v11 = vld [vmem:[#allocation37_spill] sm:$0xff] }
 0x252   :  { %4964 = vmatprep.subr.bf16.mxu0 %v7750_v55  ;;  %4996 = vmatprep.subr.bf16.mxu1 %v7751_v37 }
 0x255   :  { %4966 = vmatpush1.bf16.msra.mxu0 %v7752_v52  ;;  %4998 = vmatpush1.bf16.msra.mxu1 %v7753_v24 }
 0x256   :  { %4968 = vmatprep.subr.bf16.mxu0 %v7754_v48  ;;  %5000 = vmatprep.subr.bf16.mxu1 %v7755_v62 }
 0x259   :  { %4970 = vmatpush1.bf16.msra.mxu0 %v7756_v26  ;;  %5002 = vmatpush1.bf16.msra.mxu1 %v7757_v4 }
 0x25a   :  { %4972 = vmatprep.subr.bf16.mxu0 %v7758_v50  ;;  %5004 = vmatprep.subr.bf16.mxu1 %v7759_v0 }
 0x25d   :  { %4974 = vmatpush1.bf16.msra.mxu0 %v7760_v17  ;;  %5006 = vmatpush1.bf16.msra.mxu1 %v7761_v14  ;;  %v7772_v14 = vld [vmem:[#allocation34_spill] sm:$0xff] }
 0x25e   :  { %4976 = vmatprep.subr.bf16.mxu0 %v7762_v33  ;;  %5008 = vmatprep.subr.bf16.mxu1 %v7763_v42  ;;  %v7773_v33 = vld [vmem:[#allocation38_spill] sm:$0xff]  ;;  %v7774_v42 = vld [vmem:[#allocation35_spill] sm:$0xff] }
 0x261   :  { %4978 = vmatpush1.bf16.msra.mxu0 %v7764_v51  ;;  %5010 = vmatpush1.bf16.msra.mxu1 %v7765_v32  ;;  %v7775_v51 = vld [vmem:[#allocation39_spill] sm:$0xff] }
 0x262   :  { %4980 = vmatprep.subr.bf16.mxu0 %v7766_v58  ;;  %5012 = vmatprep.subr.bf16.mxu1 %v7767_v35  ;;  %v41_v35 = vld [vmem:[%s7587_s0 + $0x80] sm:$0xff] }
 0x263   :  { %v1316_v58 = vunpack.c.l.bf16 %v41_v35 }
 0x265   :  { %4982 = vmatpush1.bf16.msra.mxu0 %v7768_v18  ;;  %5014 = vmatpush1.bf16.msra.mxu1 %v7769_v41  ;;  %v1317_v18 = vunpack.c.h.bf16 %v41_v35 }
 0x266   :  { %4984 = vmatprep.subr.bf16.mxu0 %v7770_v54  ;;  %5016 = vmatprep.subr.bf16.mxu1 %v7771_v11  ;;  %v43_v54 = vld [vmem:[%s7587_s0 + $0x88] sm:$0xff] }
 0x267   :  { %v1318_v4 = vunpack.c.l.bf16 %v43_v54 }
 0x269   :  { %4986 = vmatpush1.bf16.msra.mxu0 %v7772_v14  ;;  %5018 = vmatpush1.bf16.msra.mxu1 %v7773_v33 }
 0x26a   :  { %5020 = vmatprep.subr.bf16.mxu0 %v7774_v42  ;;  %5052 = vmatprep.subr.bf16.mxu1 %v7775_v51  ;;  %v1319_v42 = vunpack.c.h.bf16 %v43_v54  ;;  %v45_v51 = vld [vmem:[%s7587_s0 + $0xa0] sm:$0xff] }
 0x26b   :  { %v1320_v26 = vunpack.c.l.bf16 %v45_v51  ;;  %v1321_v62 = vunpack.c.h.bf16 %v45_v51 }
 0x2fc   :  { %v1394_v32 = vpop.f32.mrb[16].mxu0  ;;  %v1471_v11 = vpop.f32.mrb[16].mxu1 }
 0x2fd   :  { %v1482_v41 = vadd.f32 %v1394_v32, %v1316_v58  ;;  %v1396_v14 = vpop.f32.mrb[17].mxu0  ;;  %v1473_v17 = vpop.f32.mrb[17].mxu1  ;;  %v1484_v48 = vadd.f32 %v1471_v11, %v1318_v4 }
 0x2fe   :  { %v1483_v33 = vadd.f32 %v1396_v14, %v1317_v18  ;;  %v1485_v35 = vadd.f32 %v1473_v17, %v1319_v42  ;;  %v47_v14 = vld [vmem:[%s7587_s0 + $0xa8] sm:$0xff] }
 0x2ff   :  { %v4327_v0 = vmul.f32 -1.442695, %v1482_v41  ;;  %v1323_v17 = vunpack.c.h.bf16 %v47_v14 }
 0x300   :  { %v4329_v50 = vmul.f32 -1.442695, %v1483_v33  ;;  %v4331_v24 = vmul.f32 -1.442695, %v1485_v35 }
 0x301   :  { %5724 = vpow2.f32 %v4327_v0 }
 0x302   :  { %5726 = vpow2.f32 %v4329_v50 }
 0x303   :  { %5728 = vtanh.f32 %v1484_v48 }
 0x304   :  { %5730 = vpow2.f32 %v4331_v24  ;;  %v4277_v24 = vld [vmem:[%s7588_s1 + $0x150] sm:$0xff] }
 0x307   :  { %v1400_v52 = vpop.f32.mrb[18].mxu0  ;;  %v1477_v32 = vpop.f32.mrb[18].mxu1 }
 0x308   :  { %v1486_v58 = vadd.f32 %v1400_v52, %v1320_v26  ;;  %v1402_v33 = vpop.f32.mrb[19].mxu0  ;;  %v1479_v0 = vpop.f32.mrb[19].mxu1  ;;  %v1322_v26 = vunpack.c.l.bf16 %v47_v14  ;;  %v7776_v14 = vld [vmem:[#allocation40_spill] sm:$0xff] }
 0x309   :  { %v1487_v18 = vadd.f32 %v1402_v33, %v1321_v62  ;;  %v1489_v52 = vadd.f32 %v1479_v0, %v1323_v17  ;;  %v1559_v17 = vunpack.c.h.bf16 %v4277_v24 }
 0x30a   :  { %v4328_v41 = vmul.f32 -1.442695, %v1486_v58  ;;  %v1488_v35 = vadd.f32 %v1477_v32, %v1322_v26  ;;  %v1558_v32 = vunpack.c.l.bf16 %v4277_v24 }
 0x30b   :  { %v5725_v37 = vpop.eup %5724  ;;  %v4330_v50 = vmul.f32 -1.442695, %v1487_v18  ;;  %v4332_v54 = vmul.f32 -1.442695, %v1489_v52 }
 0x30c   :  { %v5727_v42 = vpop.eup %5726  ;;  %v1496_v51 = vadd.f32 1.0, %v5725_v37  ;;  %5732 = vpow2.f32 %v4328_v41 }
 0x30d   :  { %v1508_v4 = vadd.f32 1.0, %v5727_v42  ;;  %5734 = vpow2.f32 %v4330_v50  ;;  %v5729_v11 = vpop.eup %5728  ;;  %v4279_v42 = vld [vmem:[%s7588_s1 + $0x170] sm:$0xff] }
 0x30e   :  { %5736 = vrcp.f32 %v1496_v51  ;;  %v5731_v55 = vpop.eup %5730 }
 0x30f   :  { %5738 = vrcp.f32 %v1508_v4  ;;  %v1522_v50 = vadd.f32 1.0, %v5731_v55  ;;  %v4278_v55 = vld [vmem:[%s7588_s1 + $0x158] sm:$0xff] }
 0x310   :  { %5740 = vpow2.f32 %v4332_v54 }
 0x311   :  { %5742 = vtanh.f32 %v1488_v35  ;;  %v1562_v35 = vunpack.c.l.bf16 %v4279_v42 }
 0x316   :  { %v5733_v62 = vpop.eup %5732 }
 0x317   :  { %v5735_v48 = vpop.eup %5734  ;;  %v1497_v58 = vadd.f32 1.0, %v5733_v62 }
 0x318   :  { %v5737_v37 = vpop.eup %5736  ;;  %v1509_v33 = vadd.f32 1.0, %v5735_v48  ;;  %v1563_v48 = vunpack.c.h.bf16 %v4279_v42 }
 0x319   :  { %v5739_v18 = vpop.eup %5738  ;;  %v1530_v41 = vmul.f32 %v5737_v37, %v5729_v11  ;;  %5744 = vrcp.f32 %v1497_v58 }
 0x31a   :  { %v1528_v0 = vmul.f32 %v5739_v18, %v7776_v14  ;;  %5746 = vrcp.f32 %v1509_v33  ;;  %v5741_v24 = vpop.eup %5740  ;;  %v1561_v33 = vunpack.c.h.bf16 %v4278_v55 }
 0x31b   :  { %5748 = vrcp.f32 %v1522_v50  ;;  %v5743_v50 = vpop.eup %5742 }
 0x31c   :  { %v7018_v51 = vadd.f32 %v1530_v41, %v1528_v0  ;;  %v4280_v0 = vld [vmem:[%s7588_s1 + $0x178] sm:$0xff] }
 0x31d   :  { %v1565_v9 = vunpack.c.h.bf16 %v4280_v0 }
 0x31e   :  { %7777 = vst [vmem:[#allocation44_spill] sm:$0xff] %v7018_v51  ;;  %v1636_v4 = vpop.f32.mrb[20].mxu0  ;;  %v1713_v52 = vpop.f32.mrb[20].mxu1  ;;  %5750 = vtanh.f32 %v7018_v51 }
 0x31f   :  { %v1724_v26 = vadd.f32 %v1636_v4, %v1558_v32  ;;  %v1638_v54 = vpop.f32.mrb[21].mxu0  ;;  %v1715_v11 = vpop.f32.mrb[21].mxu1 }
 0x320   :  { %v1725_v62 = vadd.f32 %v1638_v54, %v1559_v17  ;;  %v1727_v15 = vadd.f32 %v1715_v11, %v1561_v33 }
 0x321   :  { %v4337_v58 = vmul.f32 -1.442695, %v1724_v26  ;;  %v1523_v26 = vadd.f32 1.0, %v5741_v24  ;;  %v1564_v24 = vunpack.c.l.bf16 %v4280_v0 }
 0x322   :  { %v4339_v37 = vmul.f32 -1.442695, %v1725_v62  ;;  %v1642_v18 = vpop.f32.mrb[22].mxu0  ;;  %v1719_v41 = vpop.f32.mrb[22].mxu1  ;;  %v4341_v8 = vmul.f32 -1.442695, %v1727_v15 }
 0x323   :  { %5752 = vpow2.f32 %v4337_v58  ;;  %v1728_v14 = vadd.f32 %v1642_v18, %v1562_v35  ;;  %v1644_v32 = vpop.f32.mrb[23].mxu0  ;;  %v1721_v4 = vpop.f32.mrb[23].mxu1  ;;  %v1560_v58 = vunpack.c.l.bf16 %v4278_v55 }
 0x324   :  { %v5745_v51 = vpop.eup %5744  ;;  %5754 = vpow2.f32 %v4339_v37  ;;  %v1729_v44 = vadd.f32 %v1644_v32, %v1563_v48  ;;  %v1731_v37 = vadd.f32 %v1721_v4, %v1565_v9 }
 0x325   :  { %v5747_v17 = vpop.eup %5746  ;;  %v1531_v42 = vmul.f32 %v5745_v51, %v5743_v50  ;;  %v4338_v54 = vmul.f32 -1.442695, %v1728_v14  ;;  %v1726_v51 = vadd.f32 %v1713_v52, %v1560_v58 }
 0x326   :  { %v1529_v62 = vmul.f32 %v5747_v17, %v6907_v43  ;;  %v4340_v30 = vmul.f32 -1.442695, %v1729_v44  ;;  %v5749_v35 = vpop.eup %5748  ;;  %v4342_v55 = vmul.f32 -1.442695, %v1731_v37 }
 0x327   :  { %5756 = vpow2.f32 %v4338_v54 }
 0x328   :  { %5758 = vpow2.f32 %v4340_v30  ;;  %v7028_v18 = vadd.f32 %v1531_v42, %v1529_v62  ;;  %v5751_v25 = vpop.eup %5750 }
 0x329   :  { %5760 = vrcp.f32 %v1523_v26  ;;  %v1536_v48 = vmul.f32 %v5751_v25, %v5749_v35  ;;  %v1730_v25 = vadd.f32 %v1719_v41, %v1564_v24 }
 0x32a   :  { %5762 = vtanh.f32 %v7028_v18 }
 0x32b   :  { %1877 = vmatmul.mubr.f32.vlgmr.msra.gmra.mrb[24].mxu0 %v1536_v48  ;;  %1954 = vmatmul.mubr.f32.vlgmr.msra.gmra.mrb[24].mxu1 %v1536_v48  ;;  %5764 = vpow2.f32 %v4341_v8 }
 0x32c   :  { %5022 = vmatpush1.bf16.msra.mxu0 %v6450_v60  ;;  %5054 = vmatpush1.bf16.msra.mxu1 %v6503_v31  ;;  %5766 = vtanh.f32 %v1726_v51 }
 0x32d   :  { %v5753_v43 = vpop.eup %5752  ;;  %1882 = vmatprep.mubr.f32.mxu0 %v7718_v19  ;;  %1959 = vmatprep.mubr.f32.mxu1 %v7718_v19 }
 0x32e   :  { %v5755_v44 = vpop.eup %5754  ;;  %v1738_v30 = vadd.f32 1.0, %v5753_v43  ;;  %5024 = vmatprep.subr.bf16.mxu0 %v6453_v61  ;;  %5056 = vmatprep.subr.bf16.mxu1 %v6509_v36 }
 0x32f   :  { %v1750_v9 = vadd.f32 1.0, %v5755_v44 }
 0x330   :  { %5768 = vrcp.f32 %v1738_v30  ;;  %5026 = vmatpush1.bf16.msra.mxu0 %v6488_v20  ;;  %5058 = vmatpush1.bf16.msra.mxu1 %v6541_v57 }
 0x331   :  { %v5757_v15 = vpop.eup %5756  ;;  %5770 = vrcp.f32 %v1750_v9  ;;  %5028 = vmatprep.subr.bf16.mxu0 %v6491_v21  ;;  %5060 = vmatprep.subr.bf16.mxu1 %v6548_v63 }
 0x332   :  { %v5759_v8 = vpop.eup %5758  ;;  %v1739_v52 = vadd.f32 1.0, %v5757_v15  ;;  %5772 = vpow2.f32 %v4342_v55  ;;  %v7778_v15 = vld [vmem:[#allocation8_spill] sm:$0xff] }
 0x333   :  { %v5761_v11 = vpop.eup %5760  ;;  %5774 = vtanh.f32 %v1730_v25  ;;  %v1751_v33 = vadd.f32 1.0, %v5759_v8  ;;  %v7779_v8 = vld [vmem:[#allocation12_spill] sm:$0xff] }
 0x334   :  { %v5763_v41 = vpop.eup %5762  ;;  %5776 = vrcp.f32 %v1739_v52  ;;  %5030 = vmatpush1.bf16.msra.mxu0 %v6525_v47  ;;  %5062 = vmatpush1.bf16.msra.mxu1 %v6580_v29  ;;  %v7780_v52 = vld [vmem:[#allocation9_spill] sm:$0xff] }
 0x335   :  { %5778 = vrcp.f32 %v1751_v33  ;;  %v1537_v50 = vmul.f32 %v5763_v41, %v5761_v11  ;;  %5032 = vmatprep.subr.bf16.mxu0 %v6529_v49  ;;  %5064 = vmatprep.subr.bf16.mxu1 %v6586_v38  ;;  %v5765_v0 = vpop.eup %5764  ;;  %v7781_v11 = vld [vmem:[#allocation15_spill] sm:$0xff]  ;;  %v7782_v41 = vld [vmem:[#allocation10_spill] sm:$0xff] }
 0x336   :  { %v5767_v32 = vpop.eup %5766  ;;  %v1764_v26 = vadd.f32 1.0, %v5765_v0  ;;  %v7785_v0 = vld [vmem:[#allocation18_spill] sm:$0xff] }
 0x337   :  { %v4500_v14 = vpack.c.bf16 %v1537_v50, %v1536_v48  ;;  %1883 = vmatmul.mubr.f32.gmra.mrb[26].mxu0 %v1537_v50  ;;  %1960 = vmatmul.mubr.f32.gmra.mrb[26].mxu1 %v1537_v50  ;;  %v7783_v50 = vld [vmem:[#allocation16_spill] sm:$0xff] }
 0x338   :  { %2118 = vmatprep.mubr.f32.mxu0 %v7718_v19  ;;  %2195 = vmatprep.mubr.f32.mxu1 %v7718_v19  ;;  %5780 = vrcp.f32 %v1764_v26  ;;  %v7790_v26 = vld [vmem:[#allocation17_spill] sm:$0xff] }
 0x339   :  { %4560 = vst [vmem:[%s7591_s4 + $0x10] sm:$0xff] %v4500_v14   ;;  %5034 = vmatpush1.bf16.msra.mxu0 %v7720_v46  ;;  %5066 = vmatpush1.bf16.msra.mxu1 %v6617_v5  ;;  %v7784_v14 = vld [vmem:[#allocation11_spill] sm:$0xff] }
 0x33a   :  { %v5769_v4 = vpop.eup %5768  ;;  %5036 = vmatprep.subr.bf16.mxu0 %v7722_v1  ;;  %5068 = vmatprep.subr.bf16.mxu1 %v7721_v56 }
 0x33b   :  { %v5771_v17 = vpop.eup %5770  ;;  %v1772_v42 = vmul.f32 %v5769_v4, %v5767_v32  ;;  %v7786_v32 = vld [vmem:[#allocation13_spill] sm:$0xff]  ;;  %v7787_v4 = vld [vmem:[#allocation20_spill] sm:$0xff] }
 0x33c   :  { %v5773_v54 = vpop.eup %5772  ;;  %v1770_v62 = vmul.f32 %v5771_v17, %v6939_v6  ;;  %v7788_v17 = vld [vmem:[#allocation14_spill] sm:$0xff] }
 0x33d   :  { %v5775_v58 = vpop.eup %5774  ;;  %5038 = vmatpush1.bf16.msra.mxu0 %v7723_v34  ;;  %5070 = vmatpush1.bf16.msra.mxu1 %v6653_v59  ;;  %v1765_v24 = vadd.f32 1.0, %v5773_v54  ;;  %v7791_v54 = vld [vmem:[#allocation24_spill] sm:$0xff] }
 0x33e   :  { %v5777_v35 = vpop.eup %5776  ;;  %v7057_v37 = vadd.f32 %v1772_v42, %v1770_v62  ;;  %5040 = vmatprep.subr.bf16.mxu0 %v7724_v53  ;;  %5072 = vmatprep.subr.bf16.mxu1 %v6659_v2  ;;  %v7789_v42 = vld [vmem:[#allocation21_spill] sm:$0xff]  ;;  %v7792_v62 = vld [vmem:[#allocation19_spill] sm:$0xff] }
 0x33f   :  { %v5779_v48 = vpop.eup %5778  ;;  %v1773_v51 = vmul.f32 %v5777_v35, %v5775_v58  ;;  %v7793_v58 = vld [vmem:[#allocation25_spill] sm:$0xff]  ;;  %v7794_v35 = vld [vmem:[#allocation22_spill] sm:$0xff] }
 0x340   :  { %5782 = vtanh.f32 %v7057_v37  ;;  %v1771_v6 = vmul.f32 %v5779_v48, %v6949_v45  ;;  %v7795_v48 = vld [vmem:[#allocation28_spill] sm:$0xff] }
 0x341   :  { %5042 = vmatpush1.bf16.msra.mxu0 %v6638_v40  ;;  %5074 = vmatpush1.bf16.msra.mxu1 %v6686_v13  ;;  %5784 = vrcp.f32 %v1765_v24  ;;  %v7797_v24 = vld [vmem:[#allocation29_spill] sm:$0xff] }
 0x342   :  { %5044 = vmatprep.subr.bf16.mxu0 %v7725_v10  ;;  %5076 = vmatprep.subr.bf16.mxu1 %v6689_v7  ;;  %v7067_v43 = vadd.f32 %v1773_v51, %v1771_v6  ;;  %v5781_v45 = vpop.eup %5780  ;;  %v7796_v51 = vld [vmem:[#allocation23_spill] sm:$0xff]  ;;  %v7798_v6 = vld [vmem:[#allocation26_spill] sm:$0xff] }
 0x344   :  { %5786 = vtanh.f32 %v7067_v43 }
 0x345   :  { %5046 = vmatpush1.bf16.msra.mxu0 %v7726_v27  ;;  %5078 = vmatpush1.bf16.msra.mxu1 %v6708_v23 }
 0x346   :  { %5048 = vmatprep.subr.bf16.mxu0 %v6677_v39  ;;  %5080 = vmatprep.subr.bf16.mxu1 %v6711_v28 }
 0x349   :  { %5050 = vmatpush1.bf16.msra.mxu0 %v6704_v12  ;;  %5082 = vmatpush1.bf16.msra.mxu1 %v6721_v16 }
 0x34a   :  { %v5783_v44 = vpop.eup %5782  ;;  %5084 = vmatprep.subr.bf16.mxu0 %v6148_v3  ;;  %5116 = vmatprep.subr.bf16.mxu1 %v6202_v22 }
 0x34b   :  { %v1778_v30 = vmul.f32 %v5783_v44, %v5781_v45  ;;  %v5785_v55 = vpop.eup %5784  ;;  %v7799_v45 = vld [vmem:[#allocation32_spill] sm:$0xff]  ;;  %v7800_v44 = vld [vmem:[#allocation27_spill] sm:$0xff] }
 0x34d   :  { %2119 = vmatmul.mubr.f32.vlgmr.msra.gmra.mrb[28].mxu0 %v1778_v30  ;;  %2196 = vmatmul.mubr.f32.vlgmr.msra.gmra.mrb[28].mxu1 %v1778_v30 }
 0x34e   :  { %v5787_v9 = vpop.eup %5786  ;;  %2124 = vmatprep.mubr.f32.mxu0 %v7718_v19  ;;  %2201 = vmatprep.mubr.f32.mxu1 %v7718_v19 }
 0x34f   :  { %v1779_v25 = vmul.f32 %v5787_v9, %v5785_v55  ;;  %5086 = vmatpush1.bf16.msra.mxu0 %v7778_v15  ;;  %5118 = vmatpush1.bf16.msra.mxu1 %v7779_v8  ;;  %v7802_v55 = vld [vmem:[#allocation30_spill] sm:$0xff]  ;;  %v7803_v9 = vld [vmem:[#allocation36_spill] sm:$0xff] }
 0x350   :  { %5088 = vmatprep.subr.bf16.mxu0 %v7780_v52  ;;  %5120 = vmatprep.subr.bf16.mxu1 %v7781_v11 }
 0x351   :  { %v4505_v33 = vpack.c.bf16 %v1779_v25, %v1778_v30  ;;  %2125 = vmatmul.mubr.f32.gmra.mrb[30].mxu0 %v1779_v25  ;;  %2202 = vmatmul.mubr.f32.gmra.mrb[30].mxu1 %v1779_v25  ;;  %v7801_v30 = vld [vmem:[#allocation33_spill] sm:$0xff]  ;;  %v7804_v25 = vld [vmem:[#allocation31_spill] sm:$0xff] }
 0x352   :  { %2360 = vmatprep.mubr.f32.mxu0 %v7718_v19  ;;  %2437 = vmatprep.mubr.f32.mxu1 %v7718_v19 }
 0x353   :  { %4561 = vst [vmem:[%s7592_s5 + $0x28] sm:$0xff] %v4505_v33   ;;  %5090 = vmatpush1.bf16.msra.mxu0 %v7782_v41  ;;  %5122 = vmatpush1.bf16.msra.mxu1 %v7783_v50  ;;  %v7805_v33 = vld [vmem:[#allocation37_spill] sm:$0xff] }
 0x354   :  { %5092 = vmatprep.subr.bf16.mxu0 %v7784_v14  ;;  %5124 = vmatprep.subr.bf16.mxu1 %v7785_v0 }
 0x357   :  { %5094 = vmatpush1.bf16.msra.mxu0 %v7786_v32  ;;  %5126 = vmatpush1.bf16.msra.mxu1 %v7787_v4 }
 0x358   :  { %5096 = vmatprep.subr.bf16.mxu0 %v7788_v17  ;;  %5128 = vmatprep.subr.bf16.mxu1 %v7789_v42 }
 0x35b   :  { %5098 = vmatpush1.bf16.msra.mxu0 %v7790_v26  ;;  %5130 = vmatpush1.bf16.msra.mxu1 %v7791_v54 }
 0x35c   :  { %5100 = vmatprep.subr.bf16.mxu0 %v7792_v62  ;;  %5132 = vmatprep.subr.bf16.mxu1 %v7793_v58 }
 0x35f   :  { %5102 = vmatpush1.bf16.msra.mxu0 %v7794_v35  ;;  %5134 = vmatpush1.bf16.msra.mxu1 %v7795_v48  ;;  %v7806_v48 = vld [vmem:[#allocation34_spill] sm:$0xff] }
 0x360   :  { %5104 = vmatprep.subr.bf16.mxu0 %v7796_v51  ;;  %5136 = vmatprep.subr.bf16.mxu1 %v7797_v24  ;;  %v7807_v51 = vld [vmem:[#allocation38_spill] sm:$0xff]  ;;  %v7808_v24 = vld [vmem:[#allocation35_spill] sm:$0xff] }
 0x363   :  { %5106 = vmatpush1.bf16.msra.mxu0 %v7798_v6  ;;  %5138 = vmatpush1.bf16.msra.mxu1 %v7799_v45  ;;  %v7809_v6 = vld [vmem:[#allocation39_spill] sm:$0xff] }
 0x364   :  { %5108 = vmatprep.subr.bf16.mxu0 %v7800_v44  ;;  %5140 = vmatprep.subr.bf16.mxu1 %v7801_v30  ;;  %v49_v30 = vld [vmem:[%s7587_s0 + $0xc0] sm:$0xff] }
 0x365   :  { %v1800_v44 = vunpack.c.l.bf16 %v49_v30 }
 0x367   :  { %5110 = vmatpush1.bf16.msra.mxu0 %v7802_v55  ;;  %5142 = vmatpush1.bf16.msra.mxu1 %v7803_v9  ;;  %v1801_v55 = vunpack.c.h.bf16 %v49_v30 }
 0x368   :  { %5112 = vmatprep.subr.bf16.mxu0 %v7804_v25  ;;  %5144 = vmatprep.subr.bf16.mxu1 %v7805_v33  ;;  %v51_v25 = vld [vmem:[%s7587_s0 + $0xc8] sm:$0xff] }
 0x369   :  { %v1802_v54 = vunpack.c.l.bf16 %v51_v25 }
 0x36b   :  { %5114 = vmatpush1.bf16.msra.mxu0 %v7806_v48  ;;  %5146 = vmatpush1.bf16.msra.mxu1 %v7807_v51 }
 0x36c   :  { %5148 = vmatprep.subr.bf16.mxu0 %v7808_v24  ;;  %5180 = vmatprep.subr.bf16.mxu1 %v7809_v6  ;;  %v1803_v24 = vunpack.c.h.bf16 %v51_v25  ;;  %v53_v6 = vld [vmem:[%s7587_s0 + $0xe0] sm:$0xff] }
 0x36d   :  { %v1804_v26 = vunpack.c.l.bf16 %v53_v6  ;;  %v1805_v42 = vunpack.c.h.bf16 %v53_v6 }
 0x3fe   :  { %v1878_v45 = vpop.f32.mrb[24].mxu0  ;;  %v1955_v33 = vpop.f32.mrb[24].mxu1 }
 0x3ff   :  { %v1966_v9 = vadd.f32 %v1878_v45, %v1800_v44  ;;  %v1880_v48 = vpop.f32.mrb[25].mxu0  ;;  %v1957_v35 = vpop.f32.mrb[25].mxu1  ;;  %v1968_v17 = vadd.f32 %v1955_v33, %v1802_v54 }
 0x400   :  { %v1967_v51 = vadd.f32 %v1880_v48, %v1801_v55  ;;  %v1969_v30 = vadd.f32 %v1957_v35, %v1803_v24  ;;  %v55_v48 = vld [vmem:[%s7587_s0 + $0xe8] sm:$0xff] }
 0x401   :  { %v4347_v58 = vmul.f32 -1.442695, %v1966_v9  ;;  %v1807_v35 = vunpack.c.h.bf16 %v55_v48 }
 0x402   :  { %v4349_v62 = vmul.f32 -1.442695, %v1967_v51  ;;  %v4351_v4 = vmul.f32 -1.442695, %v1969_v30 }
 0x403   :  { %5788 = vpow2.f32 %v4347_v58 }
 0x404   :  { %5790 = vpow2.f32 %v4349_v62 }
 0x405   :  { %5792 = vtanh.f32 %v1968_v17 }
 0x406   :  { %5794 = vpow2.f32 %v4351_v4  ;;  %v4273_v4 = vld [vmem:[%s7588_s1 + $0x110] sm:$0xff] }
 0x40a   :  { %v1884_v32 = vpop.f32.mrb[26].mxu0  ;;  %v1961_v45 = vpop.f32.mrb[26].mxu1 }
 0x40b   :  { %v1970_v44 = vadd.f32 %v1884_v32, %v1804_v26  ;;  %v1886_v51 = vpop.f32.mrb[27].mxu0  ;;  %v1963_v58 = vpop.f32.mrb[27].mxu1  ;;  %v1806_v26 = vunpack.c.l.bf16 %v55_v48  ;;  %v7810_v48 = vld [vmem:[#allocation44_spill] sm:$0xff] }
 0x40c   :  { %v1971_v55 = vadd.f32 %v1886_v51, %v1805_v42  ;;  %v1973_v32 = vadd.f32 %v1963_v58, %v1807_v35  ;;  %v2043_v35 = vunpack.c.h.bf16 %v4273_v4 }
 0x40d   :  { %v4348_v9 = vmul.f32 -1.442695, %v1970_v44  ;;  %v5789_v0 = vpop.eup %5788  ;;  %v1972_v30 = vadd.f32 %v1961_v45, %v1806_v26  ;;  %v2042_v45 = vunpack.c.l.bf16 %v4273_v4 }
 0x40e   :  { %v4350_v62 = vmul.f32 -1.442695, %v1971_v55  ;;  %v5791_v24 = vpop.eup %5790  ;;  %v1980_v6 = vadd.f32 1.0, %v5789_v0  ;;  %v4352_v25 = vmul.f32 -1.442695, %v1973_v32 }
 0x40f   :  { %5796 = vpow2.f32 %v4348_v9  ;;  %v1992_v54 = vadd.f32 1.0, %v5791_v24  ;;  %v5793_v33 = vpop.eup %5792  ;;  %v4275_v24 = vld [vmem:[%s7588_s1 + $0x130] sm:$0xff] }
 0x410   :  { %5798 = vpow2.f32 %v4350_v62  ;;  %v5795_v14 = vpop.eup %5794 }
 0x411   :  { %5800 = vrcp.f32 %v1980_v6  ;;  %v2006_v62 = vadd.f32 1.0, %v5795_v14  ;;  %v4274_v14 = vld [vmem:[%s7588_s1 + $0x118] sm:$0xff] }
 0x412   :  { %5802 = vrcp.f32 %v1992_v54 }
 0x413   :  { %5804 = vpow2.f32 %v4352_v25 }
 0x414   :  { %5806 = vtanh.f32 %v1972_v30  ;;  %v2046_v30 = vunpack.c.l.bf16 %v4275_v24 }
 0x419   :  { %v5797_v42 = vpop.eup %5796 }
 0x41a   :  { %v5799_v17 = vpop.eup %5798  ;;  %v1981_v44 = vadd.f32 1.0, %v5797_v42 }
 0x41b   :  { %v5801_v0 = vpop.eup %5800  ;;  %v1993_v51 = vadd.f32 1.0, %v5799_v17  ;;  %v2047_v17 = vunpack.c.h.bf16 %v4275_v24 }
 0x41c   :  { %v5803_v55 = vpop.eup %5802  ;;  %v2014_v9 = vmul.f32 %v5801_v0, %v5793_v33  ;;  %5808 = vrcp.f32 %v1981_v44 }
 0x41d   :  { %v2012_v58 = vmul.f32 %v5803_v55, %v7810_v48  ;;  %5810 = vrcp.f32 %v1993_v51  ;;  %v5805_v4 = vpop.eup %5804  ;;  %v2045_v51 = vunpack.c.h.bf16 %v4274_v14 }
 0x41e   :  { %5812 = vrcp.f32 %v2006_v62  ;;  %v5807_v62 = vpop.eup %5806 }
 0x41f   :  { %v7136_v6 = vadd.f32 %v2014_v9, %v2012_v58  ;;  %v4276_v58 = vld [vmem:[%s7588_s1 + $0x138] sm:$0xff] }
 0x420   :  { %v2120_v54 = vpop.f32.mrb[28].mxu0  ;;  %v2197_v32 = vpop.f32.mrb[28].mxu1  ;;  %v2049_v52 = vunpack.c.h.bf16 %v4276_v58 }
 0x421   :  { %7811 = vst [vmem:[#allocation41_spill] sm:$0xff] %v7136_v6  ;;  %5814 = vtanh.f32 %v7136_v6  ;;  %v2208_v26 = vadd.f32 %v2120_v54, %v2042_v45  ;;  %v2122_v25 = vpop.f32.mrb[29].mxu0  ;;  %v2199_v33 = vpop.f32.mrb[29].mxu1 }
 0x422   :  { %v2209_v42 = vadd.f32 %v2122_v25, %v2043_v35  ;;  %v2211_v41 = vadd.f32 %v2199_v33, %v2045_v51 }
 0x423   :  { %v4357_v44 = vmul.f32 -1.442695, %v2208_v26  ;;  %v2007_v26 = vadd.f32 1.0, %v5805_v4  ;;  %v2048_v4 = vunpack.c.l.bf16 %v4276_v58 }
 0x424   :  { %v4359_v0 = vmul.f32 -1.442695, %v2209_v42  ;;  %v2126_v55 = vpop.f32.mrb[30].mxu0  ;;  %v2203_v9 = vpop.f32.mrb[30].mxu1  ;;  %v4361_v15 = vmul.f32 -1.442695, %v2211_v41 }
 0x425   :  { %5816 = vpow2.f32 %v4357_v44  ;;  %v2212_v48 = vadd.f32 %v2126_v55, %v2046_v30  ;;  %v2128_v45 = vpop.f32.mrb[31].mxu0  ;;  %v2205_v54 = vpop.f32.mrb[31].mxu1  ;;  %v2044_v44 = vunpack.c.l.bf16 %v4274_v14 }
 0x426   :  { %v5809_v6 = vpop.eup %5808  ;;  %5818 = vpow2.f32 %v4359_v0  ;;  %v2213_v50 = vadd.f32 %v2128_v45, %v2047_v17  ;;  %v2215_v0 = vadd.f32 %v2205_v54, %v2049_v52  ;;  %v2214_v52 = vadd.f32 %v2203_v9, %v2048_v4 }
 0x427   :  { %v5811_v35 = vpop.eup %5810  ;;  %v2015_v24 = vmul.f32 %v5809_v6, %v5807_v62  ;;  %v4358_v25 = vmul.f32 -1.442695, %v2212_v48  ;;  %v2210_v6 = vadd.f32 %v2197_v32, %v2044_v44 }
 0x428   :  { %v2013_v42 = vmul.f32 %v5811_v35, %v7028_v18  ;;  %v4360_v11 = vmul.f32 -1.442695, %v2213_v50  ;;  %v5813_v30 = vpop.eup %5812  ;;  %v4362_v14 = vmul.f32 -1.442695, %v2215_v0 }
 0x429   :  { %5820 = vpow2.f32 %v4358_v25 }
 0x42a   :  { %5822 = vpow2.f32 %v4360_v11  ;;  %v7146_v55 = vadd.f32 %v2015_v24, %v2013_v42 }
 0x42b   :  { %v5815_v8 = vpop.eup %5814  ;;  %5824 = vrcp.f32 %v2007_v26 }
 0x42c   :  { %v2020_v17 = vmul.f32 %v5815_v8, %v5813_v30  ;;  %5826 = vtanh.f32 %v7146_v55 }
 0x42d   :  { %5828 = vpow2.f32 %v4361_v15 }
 0x42e   :  { %2361 = vmatmul.mubr.f32.vlgmr.msra.gmra.mrb[32].mxu0 %v2020_v17  ;;  %2438 = vmatmul.mubr.f32.vlgmr.msra.gmra.mrb[32].mxu1 %v2020_v17  ;;  %5830 = vtanh.f32 %v2210_v6 }
 0x42f   :  { %v5817_v18 = vpop.eup %5816  ;;  %5150 = vmatpush1.bf16.msra.mxu0 %v6450_v60  ;;  %5182 = vmatpush1.bf16.msra.mxu1 %v6503_v31 }
 0x430   :  { %v5819_v50 = vpop.eup %5818  ;;  %v2222_v11 = vadd.f32 1.0, %v5817_v18  ;;  %2366 = vmatprep.mubr.f32.mxu0 %v7718_v19  ;;  %2443 = vmatprep.mubr.f32.mxu1 %v7718_v19 }
 0x431   :  { %v2234_v8 = vadd.f32 1.0, %v5819_v50  ;;  %5152 = vmatprep.subr.bf16.mxu0 %v6453_v61  ;;  %5184 = vmatprep.subr.bf16.mxu1 %v6509_v36 }
 0x432   :  { %5832 = vrcp.f32 %v2222_v11 }
 0x433   :  { %v5821_v41 = vpop.eup %5820  ;;  %5834 = vrcp.f32 %v2234_v8  ;;  %5154 = vmatpush1.bf16.msra.mxu0 %v6488_v20  ;;  %5186 = vmatpush1.bf16.msra.mxu1 %v6541_v57 }
 0x434   :  { %v5823_v15 = vpop.eup %5822  ;;  %v2223_v32 = vadd.f32 1.0, %v5821_v41  ;;  %5836 = vpow2.f32 %v4362_v14  ;;  %5156 = vmatprep.subr.bf16.mxu0 %v6491_v21  ;;  %5188 = vmatprep.subr.bf16.mxu1 %v6548_v63  ;;  %v7812_v41 = vld [vmem:[#allocation8_spill] sm:$0xff] }
 0x435   :  { %v5825_v33 = vpop.eup %5824  ;;  %5838 = vtanh.f32 %v2214_v52  ;;  %v2235_v51 = vadd.f32 1.0, %v5823_v15  ;;  %v7813_v15 = vld [vmem:[#allocation12_spill] sm:$0xff] }
 0x436   :  { %v5827_v9 = vpop.eup %5826  ;;  %5840 = vrcp.f32 %v2223_v32  ;;  %v7814_v32 = vld [vmem:[#allocation9_spill] sm:$0xff] }
 0x437   :  { %5842 = vrcp.f32 %v2235_v51  ;;  %v2021_v62 = vmul.f32 %v5827_v9, %v5825_v33  ;;  %5158 = vmatpush1.bf16.msra.mxu0 %v6525_v47  ;;  %5190 = vmatpush1.bf16.msra.mxu1 %v6580_v29  ;;  %v5829_v58 = vpop.eup %5828  ;;  %v7815_v33 = vld [vmem:[#allocation15_spill] sm:$0xff]  ;;  %v7816_v9 = vld [vmem:[#allocation10_spill] sm:$0xff] }
 0x438   :  { %5160 = vmatprep.subr.bf16.mxu0 %v6529_v49  ;;  %5192 = vmatprep.subr.bf16.mxu1 %v6586_v38  ;;  %v5831_v45 = vpop.eup %5830  ;;  %v2248_v26 = vadd.f32 1.0, %v5829_v58  ;;  %v7819_v58 = vld [vmem:[#allocation18_spill] sm:$0xff] }
 0x439   :  { %v4510_v48 = vpack.c.bf16 %v2021_v62, %v2020_v17  ;;  %2367 = vmatmul.mubr.f32.gmra.mrb[34].mxu0 %v2021_v62  ;;  %2444 = vmatmul.mubr.f32.gmra.mrb[34].mxu1 %v2021_v62  ;;  %v7817_v62 = vld [vmem:[#allocation16_spill] sm:$0xff] }
 0x43a   :  { %2602 = vmatprep.mubr.f32.mxu0 %v7718_v19  ;;  %2679 = vmatprep.mubr.f32.mxu1 %v7718_v19  ;;  %5844 = vrcp.f32 %v2248_v26  ;;  %v7824_v26 = vld [vmem:[#allocation17_spill] sm:$0xff] }
 0x43b   :  { %4562 = vst [vmem:[%s7591_s4 + $0x18] sm:$0xff] %v4510_v48   ;;  %5162 = vmatpush1.bf16.msra.mxu0 %v7720_v46  ;;  %5194 = vmatpush1.bf16.msra.mxu1 %v6617_v5  ;;  %v7818_v48 = vld [vmem:[#allocation11_spill] sm:$0xff] }
 0x43c   :  { %v5833_v54 = vpop.eup %5832  ;;  %5164 = vmatprep.subr.bf16.mxu0 %v7722_v1  ;;  %5196 = vmatprep.subr.bf16.mxu1 %v7721_v56 }
 0x43d   :  { %v5835_v35 = vpop.eup %5834  ;;  %v2256_v24 = vmul.f32 %v5833_v54, %v5831_v45  ;;  %v7820_v45 = vld [vmem:[#allocation13_spill] sm:$0xff]  ;;  %v7821_v54 = vld [vmem:[#allocation20_spill] sm:$0xff] }
 0x43e   :  { %v5837_v25 = vpop.eup %5836  ;;  %v2254_v42 = vmul.f32 %v5835_v35, %v7057_v37  ;;  %v7822_v35 = vld [vmem:[#allocation14_spill] sm:$0xff] }
 0x43f   :  { %v5839_v44 = vpop.eup %5838  ;;  %5166 = vmatpush1.bf16.msra.mxu0 %v7723_v34  ;;  %5198 = vmatpush1.bf16.msra.mxu1 %v6653_v59  ;;  %v2249_v4 = vadd.f32 1.0, %v5837_v25  ;;  %v7825_v25 = vld [vmem:[#allocation24_spill] sm:$0xff] }
 0x440   :  { %v5841_v30 = vpop.eup %5840  ;;  %v7175_v0 = vadd.f32 %v2256_v24, %v2254_v42  ;;  %5168 = vmatprep.subr.bf16.mxu0 %v7724_v53  ;;  %5200 = vmatprep.subr.bf16.mxu1 %v6659_v2  ;;  %v7823_v24 = vld [vmem:[#allocation21_spill] sm:$0xff]  ;;  %v7826_v42 = vld [vmem:[#allocation19_spill] sm:$0xff] }
 0x441   :  { %v5843_v17 = vpop.eup %5842  ;;  %v2257_v6 = vmul.f32 %v5841_v30, %v5839_v44  ;;  %v7827_v44 = vld [vmem:[#allocation25_spill] sm:$0xff]  ;;  %v7828_v30 = vld [vmem:[#allocation22_spill] sm:$0xff] }
 0x442   :  { %5846 = vtanh.f32 %v7175_v0  ;;  %v2255_v37 = vmul.f32 %v5843_v17, %v7067_v43  ;;  %v7829_v17 = vld [vmem:[#allocation28_spill] sm:$0xff] }
 0x443   :  { %5170 = vmatpush1.bf16.msra.mxu0 %v6638_v40  ;;  %5202 = vmatpush1.bf16.msra.mxu1 %v6686_v13  ;;  %5848 = vrcp.f32 %v2249_v4  ;;  %v7831_v4 = vld [vmem:[#allocation29_spill] sm:$0xff] }
 0x444   :  { %5172 = vmatprep.subr.bf16.mxu0 %v7725_v10  ;;  %5204 = vmatprep.subr.bf16.mxu1 %v6689_v7  ;;  %v7185_v18 = vadd.f32 %v2257_v6, %v2255_v37  ;;  %v5845_v43 = vpop.eup %5844  ;;  %v7830_v6 = vld [vmem:[#allocation23_spill] sm:$0xff]  ;;  %v7832_v37 = vld [vmem:[#allocation26_spill] sm:$0xff] }
 0x446   :  { %5850 = vtanh.f32 %v7185_v18 }
 0x447   :  { %5174 = vmatpush1.bf16.msra.mxu0 %v7726_v27  ;;  %5206 = vmatpush1.bf16.msra.mxu1 %v6708_v23 }
 0x448   :  { %5176 = vmatprep.subr.bf16.mxu0 %v6677_v39  ;;  %5208 = vmatprep.subr.bf16.mxu1 %v6711_v28 }
 0x44b   :  { %5178 = vmatpush1.bf16.msra.mxu0 %v6704_v12  ;;  %5210 = vmatpush1.bf16.msra.mxu1 %v6721_v16 }
 0x44c   :  { %v5847_v50 = vpop.eup %5846  ;;  %5212 = vmatprep.subr.bf16.mxu0 %v6148_v3  ;;  %5244 = vmatprep.subr.bf16.mxu1 %v6202_v22 }
 0x44d   :  { %v2262_v11 = vmul.f32 %v5847_v50, %v5845_v43  ;;  %v5849_v14 = vpop.eup %5848  ;;  %v7833_v43 = vld [vmem:[#allocation32_spill] sm:$0xff]  ;;  %v7834_v50 = vld [vmem:[#allocation27_spill] sm:$0xff] }
 0x44f   :  { %2603 = vmatmul.mubr.f32.vlgmr.msra.gmra.mrb[36].mxu0 %v2262_v11  ;;  %2680 = vmatmul.mubr.f32.vlgmr.msra.gmra.mrb[36].mxu1 %v2262_v11 }
 0x450   :  { %v5851_v8 = vpop.eup %5850  ;;  %2608 = vmatprep.mubr.f32.mxu0 %v7718_v19  ;;  %2685 = vmatprep.mubr.f32.mxu1 %v7718_v19 }
 0x451   :  { %v2263_v52 = vmul.f32 %v5851_v8, %v5849_v14  ;;  %5214 = vmatpush1.bf16.msra.mxu0 %v7812_v41  ;;  %5246 = vmatpush1.bf16.msra.mxu1 %v7813_v15  ;;  %v7836_v14 = vld [vmem:[#allocation30_spill] sm:$0xff]  ;;  %v7837_v8 = vld [vmem:[#allocation36_spill] sm:$0xff] }
 0x452   :  { %5216 = vmatprep.subr.bf16.mxu0 %v7814_v32  ;;  %5248 = vmatprep.subr.bf16.mxu1 %v7815_v33 }
 0x453   :  { %v4515_v51 = vpack.c.bf16 %v2263_v52, %v2262_v11  ;;  %2609 = vmatmul.mubr.f32.gmra.mrb[38].mxu0 %v2263_v52  ;;  %2686 = vmatmul.mubr.f32.gmra.mrb[38].mxu1 %v2263_v52  ;;  %v7835_v11 = vld [vmem:[#allocation33_spill] sm:$0xff]  ;;  %v7838_v52 = vld [vmem:[#allocation31_spill] sm:$0xff] }
 0x454   :  { %2844 = vmatprep.mubr.f32.mxu0 %v7718_v19  ;;  %2921 = vmatprep.mubr.f32.mxu1 %v7718_v19 }
 0x455   :  { %4563 = vst [vmem:[%s7592_s5 + $0x20] sm:$0xff] %v4515_v51   ;;  %5218 = vmatpush1.bf16.msra.mxu0 %v7816_v9  ;;  %5250 = vmatpush1.bf16.msra.mxu1 %v7817_v62  ;;  %v7839_v51 = vld [vmem:[#allocation37_spill] sm:$0xff] }
 0x456   :  { %5220 = vmatprep.subr.bf16.mxu0 %v7818_v48  ;;  %5252 = vmatprep.subr.bf16.mxu1 %v7819_v58 }
 0x459   :  { %5222 = vmatpush1.bf16.msra.mxu0 %v7820_v45  ;;  %5254 = vmatpush1.bf16.msra.mxu1 %v7821_v54 }
 0x45a   :  { %5224 = vmatprep.subr.bf16.mxu0 %v7822_v35  ;;  %5256 = vmatprep.subr.bf16.mxu1 %v7823_v24 }
 0x45d   :  { %5226 = vmatpush1.bf16.msra.mxu0 %v7824_v26  ;;  %5258 = vmatpush1.bf16.msra.mxu1 %v7825_v25 }
 0x45e   :  { %5228 = vmatprep.subr.bf16.mxu0 %v7826_v42  ;;  %5260 = vmatprep.subr.bf16.mxu1 %v7827_v44 }
 0x461   :  { %5230 = vmatpush1.bf16.msra.mxu0 %v7828_v30  ;;  %5262 = vmatpush1.bf16.msra.mxu1 %v7829_v17  ;;  %v7840_v17 = vld [vmem:[#allocation34_spill] sm:$0xff] }
 0x462   :  { %5232 = vmatprep.subr.bf16.mxu0 %v7830_v6  ;;  %5264 = vmatprep.subr.bf16.mxu1 %v7831_v4  ;;  %v7841_v6 = vld [vmem:[#allocation38_spill] sm:$0xff]  ;;  %v7842_v4 = vld [vmem:[#allocation35_spill] sm:$0xff] }
 0x465   :  { %5234 = vmatpush1.bf16.msra.mxu0 %v7832_v37  ;;  %5266 = vmatpush1.bf16.msra.mxu1 %v7833_v43  ;;  %v7843_v37 = vld [vmem:[#allocation39_spill] sm:$0xff] }
 0x466   :  { %5236 = vmatprep.subr.bf16.mxu0 %v7834_v50  ;;  %5268 = vmatprep.subr.bf16.mxu1 %v7835_v11  ;;  %v57_v11 = vld [vmem:[%s7587_s0 + $0x100] sm:$0xff] }
 0x467   :  { %v2284_v50 = vunpack.c.l.bf16 %v57_v11 }
 0x469   :  { %5238 = vmatpush1.bf16.msra.mxu0 %v7836_v14  ;;  %5270 = vmatpush1.bf16.msra.mxu1 %v7837_v8  ;;  %v2285_v14 = vunpack.c.h.bf16 %v57_v11 }
 0x46a   :  { %5240 = vmatprep.subr.bf16.mxu0 %v7838_v52  ;;  %5272 = vmatprep.subr.bf16.mxu1 %v7839_v51  ;;  %v59_v52 = vld [vmem:[%s7587_s0 + $0x108] sm:$0xff] }
 0x46b   :  { %v2286_v25 = vunpack.c.l.bf16 %v59_v52 }
 0x46d   :  { %5242 = vmatpush1.bf16.msra.mxu0 %v7840_v17  ;;  %5274 = vmatpush1.bf16.msra.mxu1 %v7841_v6 }
 0x46e   :  { %5276 = vmatprep.subr.bf16.mxu0 %v7842_v4  ;;  %5308 = vmatprep.subr.bf16.mxu1 %v7843_v37  ;;  %v2287_v4 = vunpack.c.h.bf16 %v59_v52  ;;  %v61_v37 = vld [vmem:[%s7587_s0 + $0x120] sm:$0xff] }
 0x46f   :  { %v2288_v26 = vunpack.c.l.bf16 %v61_v37  ;;  %v2289_v24 = vunpack.c.h.bf16 %v61_v37 }
 0x501   :  { %v2362_v43 = vpop.f32.mrb[32].mxu0  ;;  %v2439_v51 = vpop.f32.mrb[32].mxu1 }
 0x502   :  { %v2450_v8 = vadd.f32 %v2362_v43, %v2284_v50  ;;  %v2364_v17 = vpop.f32.mrb[33].mxu0  ;;  %v2441_v30 = vpop.f32.mrb[33].mxu1  ;;  %v2452_v35 = vadd.f32 %v2439_v51, %v2286_v25 }
 0x503   :  { %v2451_v6 = vadd.f32 %v2364_v17, %v2285_v14  ;;  %v2453_v11 = vadd.f32 %v2441_v30, %v2287_v4  ;;  %v63_v17 = vld [vmem:[%s7587_s0 + $0x128] sm:$0xff] }
 0x504   :  { %v4367_v44 = vmul.f32 -1.442695, %v2450_v8  ;;  %v2291_v30 = vunpack.c.h.bf16 %v63_v17 }
 0x505   :  { %v4369_v42 = vmul.f32 -1.442695, %v2451_v6  ;;  %v4371_v54 = vmul.f32 -1.442695, %v2453_v11 }
 0x506   :  { %5852 = vpow2.f32 %v4367_v44 }
 0x507   :  { %5854 = vpow2.f32 %v4369_v42 }
 0x508   :  { %5856 = vtanh.f32 %v2452_v35 }
 0x509   :  { %5858 = vpow2.f32 %v4371_v54  ;;  %v4269_v54 = vld [vmem:[%s7588_s1 + $0xd0] sm:$0xff] }
 0x50c   :  { %v2368_v45 = vpop.f32.mrb[34].mxu0  ;;  %v2445_v43 = vpop.f32.mrb[34].mxu1 }
 0x50d   :  { %v2454_v50 = vadd.f32 %v2368_v45, %v2288_v26  ;;  %v2370_v6 = vpop.f32.mrb[35].mxu0  ;;  %v2447_v44 = vpop.f32.mrb[35].mxu1  ;;  %v2290_v26 = vunpack.c.l.bf16 %v63_v17  ;;  %v7844_v17 = vld [vmem:[#allocation41_spill] sm:$0xff] }
 0x50e   :  { %v2455_v14 = vadd.f32 %v2370_v6, %v2289_v24  ;;  %v2457_v45 = vadd.f32 %v2447_v44, %v2291_v30  ;;  %v2527_v30 = vunpack.c.h.bf16 %v4269_v54 }
 0x50f   :  { %v4368_v8 = vmul.f32 -1.442695, %v2454_v50  ;;  %v2456_v11 = vadd.f32 %v2445_v43, %v2290_v26  ;;  %v2526_v43 = vunpack.c.l.bf16 %v4269_v54 }
 0x510   :  { %v5853_v58 = vpop.eup %5852  ;;  %v4370_v42 = vmul.f32 -1.442695, %v2455_v14  ;;  %v4372_v52 = vmul.f32 -1.442695, %v2457_v45 }
 0x511   :  { %v5855_v4 = vpop.eup %5854  ;;  %v2464_v37 = vadd.f32 1.0, %v5853_v58  ;;  %5860 = vpow2.f32 %v4368_v8 }
 0x512   :  { %v2476_v25 = vadd.f32 1.0, %v5855_v4  ;;  %5862 = vpow2.f32 %v4370_v42  ;;  %v5857_v51 = vpop.eup %5856  ;;  %v4271_v4 = vld [vmem:[%s7588_s1 + $0xf0] sm:$0xff] }
 0x513   :  { %5864 = vrcp.f32 %v2464_v37  ;;  %v5859_v48 = vpop.eup %5858 }
 0x514   :  { %5866 = vrcp.f32 %v2476_v25  ;;  %v2490_v42 = vadd.f32 1.0, %v5859_v48  ;;  %v4270_v48 = vld [vmem:[%s7588_s1 + $0xd8] sm:$0xff] }
 0x515   :  { %5868 = vpow2.f32 %v4372_v52 }
 0x516   :  { %5870 = vtanh.f32 %v2456_v11  ;;  %v2530_v11 = vunpack.c.l.bf16 %v4271_v4 }
 0x51b   :  { %v5861_v24 = vpop.eup %5860 }
 0x51c   :  { %v5863_v35 = vpop.eup %5862  ;;  %v2465_v50 = vadd.f32 1.0, %v5861_v24 }
 0x51d   :  { %v5865_v58 = vpop.eup %5864  ;;  %v2477_v6 = vadd.f32 1.0, %v5863_v35  ;;  %v2531_v35 = vunpack.c.h.bf16 %v4271_v4 }
 0x51e   :  { %v5867_v14 = vpop.eup %5866  ;;  %v2498_v8 = vmul.f32 %v5865_v58, %v5857_v51  ;;  %5872 = vrcp.f32 %v2465_v50 }
 0x51f   :  { %v2496_v44 = vmul.f32 %v5867_v14, %v7844_v17  ;;  %5874 = vrcp.f32 %v2477_v6  ;;  %v5869_v54 = vpop.eup %5868  ;;  %v2529_v6 = vunpack.c.h.bf16 %v4270_v48 }
 0x520   :  { %5876 = vrcp.f32 %v2490_v42  ;;  %v5871_v42 = vpop.eup %5870 }
 0x521   :  { %v7254_v37 = vadd.f32 %v2498_v8, %v2496_v44  ;;  %v4272_v44 = vld [vmem:[%s7588_s1 + $0xf8] sm:$0xff] }
 0x522   :  { %v2604_v25 = vpop.f32.mrb[36].mxu0  ;;  %v2681_v45 = vpop.f32.mrb[36].mxu1  ;;  %v2533_v32 = vunpack.c.h.bf16 %v4272_v44 }
 0x523   :  { %7845 = vst [vmem:[#allocation42_spill] sm:$0xff] %v7254_v37  ;;  %5878 = vtanh.f32 %v7254_v37  ;;  %v2692_v26 = vadd.f32 %v2604_v25, %v2526_v43  ;;  %v2606_v52 = vpop.f32.mrb[37].mxu0  ;;  %v2683_v51 = vpop.f32.mrb[37].mxu1 }
 0x524   :  { %v2693_v24 = vadd.f32 %v2606_v52, %v2527_v30  ;;  %v2695_v9 = vadd.f32 %v2683_v51, %v2529_v6 }
 0x525   :  { %v4377_v50 = vmul.f32 -1.442695, %v2692_v26  ;;  %v2491_v26 = vadd.f32 1.0, %v5869_v54  ;;  %v2532_v54 = vunpack.c.l.bf16 %v4272_v44 }
 0x526   :  { %v4379_v58 = vmul.f32 -1.442695, %v2693_v24  ;;  %v2610_v14 = vpop.f32.mrb[38].mxu0  ;;  %v2687_v8 = vpop.f32.mrb[38].mxu1  ;;  %v4381_v41 = vmul.f32 -1.442695, %v2695_v9 }
 0x527   :  { %5880 = vpow2.f32 %v4377_v50  ;;  %v2696_v17 = vadd.f32 %v2610_v14, %v2530_v11  ;;  %v2612_v43 = vpop.f32.mrb[39].mxu0  ;;  %v2689_v25 = vpop.f32.mrb[39].mxu1  ;;  %v2528_v50 = vunpack.c.l.bf16 %v4270_v48 }
 0x528   :  { %v5873_v37 = vpop.eup %5872  ;;  %5882 = vpow2.f32 %v4379_v58  ;;  %v2697_v62 = vadd.f32 %v2612_v43, %v2531_v35  ;;  %v2699_v58 = vadd.f32 %v2689_v25, %v2533_v32  ;;  %v2698_v32 = vadd.f32 %v2687_v8, %v2532_v54 }
 0x529   :  { %v5875_v30 = vpop.eup %5874  ;;  %v2499_v4 = vmul.f32 %v5873_v37, %v5871_v42  ;;  %v4378_v52 = vmul.f32 -1.442695, %v2696_v17  ;;  %v2694_v37 = vadd.f32 %v2681_v45, %v2528_v50 }
 0x52a   :  { %v2497_v24 = vmul.f32 %v5875_v30, %v7146_v55  ;;  %v4380_v33 = vmul.f32 -1.442695, %v2697_v62  ;;  %v5877_v11 = vpop.eup %5876  ;;  %v4382_v48 = vmul.f32 -1.442695, %v2699_v58 }
 0x52b   :  { %5884 = vpow2.f32 %v4378_v52 }
 0x52c   :  { %5886 = vpow2.f32 %v4380_v33  ;;  %v7264_v14 = vadd.f32 %v2499_v4, %v2497_v24 }
 0x52d   :  { %v5879_v15 = vpop.eup %5878  ;;  %5888 = vrcp.f32 %v2491_v26 }
 0x52e   :  { %v2504_v35 = vmul.f32 %v5879_v15, %v5877_v11  ;;  %5890 = vtanh.f32 %v7264_v14 }
 0x52f   :  { %5892 = vpow2.f32 %v4381_v41 }
 0x530   :  { %2845 = vmatmul.mubr.f32.vlgmr.msra.gmra.mrb[40].mxu0 %v2504_v35  ;;  %2922 = vmatmul.mubr.f32.vlgmr.msra.gmra.mrb[40].mxu1 %v2504_v35  ;;  %5894 = vtanh.f32 %v2694_v37 }
 0x531   :  { %v5881_v55 = vpop.eup %5880  ;;  %5278 = vmatpush1.bf16.msra.mxu0 %v6450_v60  ;;  %5310 = vmatpush1.bf16.msra.mxu1 %v6503_v31 }
 0x532   :  { %v5883_v62 = vpop.eup %5882  ;;  %v2706_v33 = vadd.f32 1.0, %v5881_v55  ;;  %2850 = vmatprep.mubr.f32.mxu0 %v7718_v19  ;;  %2927 = vmatprep.mubr.f32.mxu1 %v7718_v19 }
 0x533   :  { %v2718_v15 = vadd.f32 1.0, %v5883_v62  ;;  %5280 = vmatprep.subr.bf16.mxu0 %v6453_v61  ;;  %5312 = vmatprep.subr.bf16.mxu1 %v6509_v36 }
 0x534   :  { %5896 = vrcp.f32 %v2706_v33 }
 0x535   :  { %v5885_v9 = vpop.eup %5884  ;;  %5898 = vrcp.f32 %v2718_v15  ;;  %5282 = vmatpush1.bf16.msra.mxu0 %v6488_v20  ;;  %5314 = vmatpush1.bf16.msra.mxu1 %v6541_v57 }
 0x536   :  { %v5887_v41 = vpop.eup %5886  ;;  %v2707_v45 = vadd.f32 1.0, %v5885_v9  ;;  %5900 = vpow2.f32 %v4382_v48  ;;  %5284 = vmatprep.subr.bf16.mxu0 %v6491_v21  ;;  %5316 = vmatprep.subr.bf16.mxu1 %v6548_v63  ;;  %v7846_v9 = vld [vmem:[#allocation8_spill] sm:$0xff] }
 0x537   :  { %v5889_v51 = vpop.eup %5888  ;;  %5902 = vtanh.f32 %v2698_v32  ;;  %v2719_v6 = vadd.f32 1.0, %v5887_v41  ;;  %v7847_v41 = vld [vmem:[#allocation12_spill] sm:$0xff] }
 0x538   :  { %v5891_v8 = vpop.eup %5890  ;;  %5904 = vrcp.f32 %v2707_v45  ;;  %v7848_v45 = vld [vmem:[#allocation9_spill] sm:$0xff] }
 0x539   :  { %5906 = vrcp.f32 %v2719_v6  ;;  %v2505_v42 = vmul.f32 %v5891_v8, %v5889_v51  ;;  %5286 = vmatpush1.bf16.msra.mxu0 %v6525_v47  ;;  %5318 = vmatpush1.bf16.msra.mxu1 %v6580_v29  ;;  %v5893_v44 = vpop.eup %5892  ;;  %v7849_v51 = vld [vmem:[#allocation15_spill] sm:$0xff]  ;;  %v7850_v8 = vld [vmem:[#allocation10_spill] sm:$0xff] }
 0x53a   :  { %5288 = vmatprep.subr.bf16.mxu0 %v6529_v49  ;;  %5320 = vmatprep.subr.bf16.mxu1 %v6586_v38  ;;  %v5895_v43 = vpop.eup %5894  ;;  %v2732_v26 = vadd.f32 1.0, %v5893_v44  ;;  %v7853_v44 = vld [vmem:[#allocation18_spill] sm:$0xff] }
 0x53b   :  { %v4520_v17 = vpack.c.bf16 %v2505_v42, %v2504_v35  ;;  %2851 = vmatmul.mubr.f32.gmra.mrb[42].mxu0 %v2505_v42  ;;  %2928 = vmatmul.mubr.f32.gmra.mrb[42].mxu1 %v2505_v42  ;;  %v7851_v42 = vld [vmem:[#allocation16_spill] sm:$0xff] }
 0x53c   :  { %3086 = vmatprep.mubr.f32.mxu0 %v7718_v19  ;;  %3163 = vmatprep.mubr.f32.mxu1 %v7718_v19  ;;  %5908 = vrcp.f32 %v2732_v26  ;;  %v7858_v26 = vld [vmem:[#allocation17_spill] sm:$0xff] }
 0x53d   :  { %4564 = vst [vmem:[%s7591_s4 + $0x20] sm:$0xff] %v4520_v17   ;;  %5290 = vmatpush1.bf16.msra.mxu0 %v7720_v46  ;;  %5322 = vmatpush1.bf16.msra.mxu1 %v6617_v5  ;;  %v7852_v17 = vld [vmem:[#allocation11_spill] sm:$0xff] }
 0x53e   :  { %v5897_v25 = vpop.eup %5896  ;;  %5292 = vmatprep.subr.bf16.mxu0 %v7722_v1  ;;  %5324 = vmatprep.subr.bf16.mxu1 %v7721_v56 }
 0x53f   :  { %v5899_v30 = vpop.eup %5898  ;;  %v2740_v4 = vmul.f32 %v5897_v25, %v5895_v43  ;;  %v7854_v43 = vld [vmem:[#allocation13_spill] sm:$0xff]  ;;  %v7855_v25 = vld [vmem:[#allocation20_spill] sm:$0xff] }
 0x540   :  { %v5901_v52 = vpop.eup %5900  ;;  %v2738_v24 = vmul.f32 %v5899_v30, %v7175_v0  ;;  %v7856_v30 = vld [vmem:[#allocation14_spill] sm:$0xff] }
 0x541   :  { %v5903_v50 = vpop.eup %5902  ;;  %5294 = vmatpush1.bf16.msra.mxu0 %v7723_v34  ;;  %5326 = vmatpush1.bf16.msra.mxu1 %v6653_v59  ;;  %v2733_v54 = vadd.f32 1.0, %v5901_v52  ;;  %v7859_v52 = vld [vmem:[#allocation24_spill] sm:$0xff] }
 0x542   :  { %v5905_v11 = vpop.eup %5904  ;;  %v7293_v58 = vadd.f32 %v2740_v4, %v2738_v24  ;;  %5296 = vmatprep.subr.bf16.mxu0 %v7724_v53  ;;  %5328 = vmatprep.subr.bf16.mxu1 %v6659_v2  ;;  %v7857_v4 = vld [vmem:[#allocation21_spill] sm:$0xff]  ;;  %v7860_v24 = vld [vmem:[#allocation19_spill] sm:$0xff] }
 0x543   :  { %v5907_v35 = vpop.eup %5906  ;;  %v2741_v37 = vmul.f32 %v5905_v11, %v5903_v50  ;;  %v7861_v50 = vld [vmem:[#allocation25_spill] sm:$0xff]  ;;  %v7862_v11 = vld [vmem:[#allocation22_spill] sm:$0xff] }
 0x544   :  { %5910 = vtanh.f32 %v7293_v58  ;;  %v2739_v0 = vmul.f32 %v5907_v35, %v7185_v18  ;;  %v7863_v35 = vld [vmem:[#allocation28_spill] sm:$0xff] }
 0x545   :  { %5298 = vmatpush1.bf16.msra.mxu0 %v6638_v40  ;;  %5330 = vmatpush1.bf16.msra.mxu1 %v6686_v13  ;;  %5912 = vrcp.f32 %v2733_v54  ;;  %v7865_v54 = vld [vmem:[#allocation29_spill] sm:$0xff] }
 0x546   :  { %5300 = vmatprep.subr.bf16.mxu0 %v7725_v10  ;;  %5332 = vmatprep.subr.bf16.mxu1 %v6689_v7  ;;  %v7303_v55 = vadd.f32 %v2741_v37, %v2739_v0  ;;  %v5909_v18 = vpop.eup %5908  ;;  %v7864_v37 = vld [vmem:[#allocation23_spill] sm:$0xff]  ;;  %v7866_v0 = vld [vmem:[#allocation26_spill] sm:$0xff] }
 0x548   :  { %5914 = vtanh.f32 %v7303_v55 }
 0x549   :  { %5302 = vmatpush1.bf16.msra.mxu0 %v7726_v27  ;;  %5334 = vmatpush1.bf16.msra.mxu1 %v6708_v23 }
 0x54a   :  { %5304 = vmatprep.subr.bf16.mxu0 %v6677_v39  ;;  %5336 = vmatprep.subr.bf16.mxu1 %v6711_v28 }
 0x54d   :  { %5306 = vmatpush1.bf16.msra.mxu0 %v6704_v12  ;;  %5338 = vmatpush1.bf16.msra.mxu1 %v6721_v16 }
 0x54e   :  { %v5911_v62 = vpop.eup %5910  ;;  %5340 = vmatprep.subr.bf16.mxu0 %v6148_v3  ;;  %5372 = vmatprep.subr.bf16.mxu1 %v6202_v22 }
 0x54f   :  { %v2746_v33 = vmul.f32 %v5911_v62, %v5909_v18  ;;  %v5913_v48 = vpop.eup %5912  ;;  %v7867_v18 = vld [vmem:[#allocation32_spill] sm:$0xff]  ;;  %v7868_v62 = vld [vmem:[#allocation27_spill] sm:$0xff] }
 0x551   :  { %3087 = vmatmul.mubr.f32.vlgmr.msra.gmra.mrb[44].mxu0 %v2746_v33  ;;  %3164 = vmatmul.mubr.f32.vlgmr.msra.gmra.mrb[44].mxu1 %v2746_v33 }
 0x552   :  { %v5915_v15 = vpop.eup %5914  ;;  %3092 = vmatprep.mubr.f32.mxu0 %v7718_v19  ;;  %3169 = vmatprep.mubr.f32.mxu1 %v7718_v19 }
 0x553   :  { %v2747_v32 = vmul.f32 %v5915_v15, %v5913_v48  ;;  %5342 = vmatpush1.bf16.msra.mxu0 %v7846_v9  ;;  %5374 = vmatpush1.bf16.msra.mxu1 %v7847_v41  ;;  %v7870_v48 = vld [vmem:[#allocation30_spill] sm:$0xff]  ;;  %v7871_v15 = vld [vmem:[#allocation36_spill] sm:$0xff] }
 0x554   :  { %5344 = vmatprep.subr.bf16.mxu0 %v7848_v45  ;;  %5376 = vmatprep.subr.bf16.mxu1 %v7849_v51 }
 0x555   :  { %v4525_v6 = vpack.c.bf16 %v2747_v32, %v2746_v33  ;;  %3093 = vmatmul.mubr.f32.gmra.mrb[46].mxu0 %v2747_v32  ;;  %3170 = vmatmul.mubr.f32.gmra.mrb[46].mxu1 %v2747_v32  ;;  %v7869_v33 = vld [vmem:[#allocation33_spill] sm:$0xff]  ;;  %v7872_v32 = vld [vmem:[#allocation31_spill] sm:$0xff] }
 0x556   :  { %3328 = vmatprep.mubr.f32.mxu0 %v7718_v19  ;;  %3405 = vmatprep.mubr.f32.mxu1 %v7718_v19 }
 0x557   :  { %4565 = vst [vmem:[%s7592_s5 + $0x18] sm:$0xff] %v4525_v6   ;;  %5346 = vmatpush1.bf16.msra.mxu0 %v7850_v8  ;;  %5378 = vmatpush1.bf16.msra.mxu1 %v7851_v42  ;;  %v7873_v6 = vld [vmem:[#allocation37_spill] sm:$0xff] }
 0x558   :  { %5348 = vmatprep.subr.bf16.mxu0 %v7852_v17  ;;  %5380 = vmatprep.subr.bf16.mxu1 %v7853_v44 }
 0x55b   :  { %5350 = vmatpush1.bf16.msra.mxu0 %v7854_v43  ;;  %5382 = vmatpush1.bf16.msra.mxu1 %v7855_v25 }
 0x55c   :  { %5352 = vmatprep.subr.bf16.mxu0 %v7856_v30  ;;  %5384 = vmatprep.subr.bf16.mxu1 %v7857_v4 }
 0x55f   :  { %5354 = vmatpush1.bf16.msra.mxu0 %v7858_v26  ;;  %5386 = vmatpush1.bf16.msra.mxu1 %v7859_v52 }
 0x560   :  { %5356 = vmatprep.subr.bf16.mxu0 %v7860_v24  ;;  %5388 = vmatprep.subr.bf16.mxu1 %v7861_v50 }
 0x563   :  { %5358 = vmatpush1.bf16.msra.mxu0 %v7862_v11  ;;  %5390 = vmatpush1.bf16.msra.mxu1 %v7863_v35  ;;  %v7874_v35 = vld [vmem:[#allocation34_spill] sm:$0xff] }
 0x564   :  { %5360 = vmatprep.subr.bf16.mxu0 %v7864_v37  ;;  %5392 = vmatprep.subr.bf16.mxu1 %v7865_v54  ;;  %v7875_v37 = vld [vmem:[#allocation38_spill] sm:$0xff]  ;;  %v7876_v54 = vld [vmem:[#allocation35_spill] sm:$0xff] }
 0x567   :  { %5362 = vmatpush1.bf16.msra.mxu0 %v7866_v0  ;;  %5394 = vmatpush1.bf16.msra.mxu1 %v7867_v18  ;;  %v7877_v0 = vld [vmem:[#allocation39_spill] sm:$0xff] }
 0x568   :  { %5364 = vmatprep.subr.bf16.mxu0 %v7868_v62  ;;  %5396 = vmatprep.subr.bf16.mxu1 %v7869_v33  ;;  %v65_v33 = vld [vmem:[%s7587_s0 + $0x140] sm:$0xff] }
 0x569   :  { %v2768_v62 = vunpack.c.l.bf16 %v65_v33 }
 0x56b   :  { %5366 = vmatpush1.bf16.msra.mxu0 %v7870_v48  ;;  %5398 = vmatpush1.bf16.msra.mxu1 %v7871_v15  ;;  %v2769_v48 = vunpack.c.h.bf16 %v65_v33 }
 0x56c   :  { %5368 = vmatprep.subr.bf16.mxu0 %v7872_v32  ;;  %5400 = vmatprep.subr.bf16.mxu1 %v7873_v6  ;;  %v67_v32 = vld [vmem:[%s7587_s0 + $0x148] sm:$0xff] }
 0x56d   :  { %v2770_v52 = vunpack.c.l.bf16 %v67_v32 }
 0x56f   :  { %5370 = vmatpush1.bf16.msra.mxu0 %v7874_v35  ;;  %5402 = vmatpush1.bf16.msra.mxu1 %v7875_v37 }
 0x570   :  { %5404 = vmatprep.subr.bf16.mxu0 %v7876_v54  ;;  %5436 = vmatprep.subr.bf16.mxu1 %v7877_v0  ;;  %v2771_v54 = vunpack.c.h.bf16 %v67_v32  ;;  %v69_v0 = vld [vmem:[%s7587_s0 + $0x160] sm:$0xff] }
 0x571   :  { %v2772_v26 = vunpack.c.l.bf16 %v69_v0  ;;  %v2773_v4 = vunpack.c.h.bf16 %v69_v0 }
 0x603   :  { %v2846_v18 = vpop.f32.mrb[40].mxu0  ;;  %v2923_v6 = vpop.f32.mrb[40].mxu1 }
 0x604   :  { %v2934_v15 = vadd.f32 %v2846_v18, %v2768_v62  ;;  %v2848_v35 = vpop.f32.mrb[41].mxu0  ;;  %v2925_v11 = vpop.f32.mrb[41].mxu1  ;;  %v2936_v30 = vadd.f32 %v2923_v6, %v2770_v52 }
 0x605   :  { %v2935_v37 = vadd.f32 %v2848_v35, %v2769_v48  ;;  %v2937_v33 = vadd.f32 %v2925_v11, %v2771_v54  ;;  %v71_v35 = vld [vmem:[%s7587_s0 + $0x168] sm:$0xff] }
 0x606   :  { %v4387_v50 = vmul.f32 -1.442695, %v2934_v15  ;;  %v2775_v11 = vunpack.c.h.bf16 %v71_v35 }
 0x607   :  { %v4389_v24 = vmul.f32 -1.442695, %v2935_v37  ;;  %v4391_v25 = vmul.f32 -1.442695, %v2937_v33 }
 0x608   :  { %5916 = vpow2.f32 %v4387_v50 }
 0x609   :  { %5918 = vpow2.f32 %v4389_v24 }
 0x60a   :  { %5920 = vtanh.f32 %v2936_v30 }
 0x60b   :  { %5922 = vpow2.f32 %v4391_v25  ;;  %v4265_v25 = vld [vmem:[%s7588_s1 + $0x90] sm:$0xff] }
 0x60e   :  { %v2852_v43 = vpop.f32.mrb[42].mxu0  ;;  %v2929_v18 = vpop.f32.mrb[42].mxu1 }
 0x60f   :  { %v2938_v62 = vadd.f32 %v2852_v43, %v2772_v26  ;;  %v2854_v37 = vpop.f32.mrb[43].mxu0  ;;  %v2931_v50 = vpop.f32.mrb[43].mxu1  ;;  %v2774_v26 = vunpack.c.l.bf16 %v71_v35  ;;  %v7878_v35 = vld [vmem:[#allocation42_spill] sm:$0xff] }
 0x610   :  { %v2939_v48 = vadd.f32 %v2854_v37, %v2773_v4  ;;  %v2941_v43 = vadd.f32 %v2931_v50, %v2775_v11  ;;  %v3011_v11 = vunpack.c.h.bf16 %v4265_v25 }
 0x611   :  { %v4388_v15 = vmul.f32 -1.442695, %v2938_v62  ;;  %v2940_v33 = vadd.f32 %v2929_v18, %v2774_v26  ;;  %v3010_v18 = vunpack.c.l.bf16 %v4265_v25 }
 0x612   :  { %v5917_v44 = vpop.eup %5916  ;;  %v4390_v24 = vmul.f32 -1.442695, %v2939_v48  ;;  %v4392_v32 = vmul.f32 -1.442695, %v2941_v43 }
 0x613   :  { %v5919_v54 = vpop.eup %5918  ;;  %v2948_v0 = vadd.f32 1.0, %v5917_v44  ;;  %5924 = vpow2.f32 %v4388_v15 }
 0x614   :  { %v2960_v52 = vadd.f32 1.0, %v5919_v54  ;;  %5926 = vpow2.f32 %v4390_v24  ;;  %v5921_v6 = vpop.eup %5920  ;;  %v4267_v54 = vld [vmem:[%s7588_s1 + $0xb0] sm:$0xff] }
 0x615   :  { %5928 = vrcp.f32 %v2948_v0  ;;  %v5923_v17 = vpop.eup %5922 }
 0x616   :  { %5930 = vrcp.f32 %v2960_v52  ;;  %v2974_v24 = vadd.f32 1.0, %v5923_v17  ;;  %v4266_v17 = vld [vmem:[%s7588_s1 + $0x98] sm:$0xff] }
 0x617   :  { %5932 = vpow2.f32 %v4392_v32 }
 0x618   :  { %5934 = vtanh.f32 %v2940_v33  ;;  %v3014_v33 = vunpack.c.l.bf16 %v4267_v54 }
 0x61d   :  { %v5925_v4 = vpop.eup %5924 }
 0x61e   :  { %v5927_v30 = vpop.eup %5926  ;;  %v2949_v62 = vadd.f32 1.0, %v5925_v4 }
 0x61f   :  { %v5929_v44 = vpop.eup %5928  ;;  %v2961_v37 = vadd.f32 1.0, %v5927_v30  ;;  %v3015_v30 = vunpack.c.h.bf16 %v4267_v54 }
 0x620   :  { %v5931_v48 = vpop.eup %5930  ;;  %v2982_v15 = vmul.f32 %v5929_v44, %v5921_v6  ;;  %5936 = vrcp.f32 %v2949_v62 }
 0x621   :  { %v2980_v50 = vmul.f32 %v5931_v48, %v7878_v35  ;;  %5938 = vrcp.f32 %v2961_v37  ;;  %v5933_v25 = vpop.eup %5932  ;;  %v3013_v37 = vunpack.c.h.bf16 %v4266_v17 }
 0x622   :  { %5940 = vrcp.f32 %v2974_v24  ;;  %v5935_v24 = vpop.eup %5934 }
 0x623   :  { %v7372_v0 = vadd.f32 %v2982_v15, %v2980_v50  ;;  %v4268_v50 = vld [vmem:[%s7588_s1 + $0xb8] sm:$0xff] }
 0x624   :  { %v3088_v52 = vpop.f32.mrb[44].mxu0  ;;  %v3165_v43 = vpop.f32.mrb[44].mxu1  ;;  %v3017_v45 = vunpack.c.h.bf16 %v4268_v50 }
 0x625   :  { %7879 = vst [vmem:[#allocation43_spill] sm:$0xff] %v7372_v0  ;;  %5942 = vtanh.f32 %v7372_v0  ;;  %v3176_v26 = vadd.f32 %v3088_v52, %v3010_v18  ;;  %v3090_v32 = vpop.f32.mrb[45].mxu0  ;;  %v3167_v6 = vpop.f32.mrb[45].mxu1 }
 0x626   :  { %v3177_v4 = vadd.f32 %v3090_v32, %v3011_v11  ;;  %v3179_v8 = vadd.f32 %v3167_v6, %v3013_v37 }
 0x627   :  { %v4397_v62 = vmul.f32 -1.442695, %v3176_v26  ;;  %v2975_v26 = vadd.f32 1.0, %v5933_v25  ;;  %v3016_v25 = vunpack.c.l.bf16 %v4268_v50 }
 0x628   :  { %v4399_v44 = vmul.f32 -1.442695, %v3177_v4  ;;  %v3094_v48 = vpop.f32.mrb[46].mxu0  ;;  %v3171_v15 = vpop.f32.mrb[46].mxu1  ;;  %v4401_v9 = vmul.f32 -1.442695, %v3179_v8 }
 0x629   :  { %5944 = vpow2.f32 %v4397_v62  ;;  %v3180_v35 = vadd.f32 %v3094_v48, %v3014_v33  ;;  %v3096_v18 = vpop.f32.mrb[47].mxu0  ;;  %v3173_v52 = vpop.f32.mrb[47].mxu1  ;;  %v3012_v62 = vunpack.c.l.bf16 %v4266_v17 }
 0x62a   :  { %v5937_v0 = vpop.eup %5936  ;;  %5946 = vpow2.f32 %v4399_v44  ;;  %v3181_v42 = vadd.f32 %v3096_v18, %v3015_v30  ;;  %v3183_v44 = vadd.f32 %v3173_v52, %v3017_v45  ;;  %v3182_v45 = vadd.f32 %v3171_v15, %v3016_v25 }
 0x62b   :  { %v5939_v11 = vpop.eup %5938  ;;  %v2983_v54 = vmul.f32 %v5937_v0, %v5935_v24  ;;  %v4398_v32 = vmul.f32 -1.442695, %v3180_v35  ;;  %v3178_v0 = vadd.f32 %v3165_v43, %v3012_v62 }
 0x62c   :  { %v2981_v4 = vmul.f32 %v5939_v11, %v7264_v14  ;;  %v4400_v51 = vmul.f32 -1.442695, %v3181_v42  ;;  %v5941_v33 = vpop.eup %5940  ;;  %v4402_v17 = vmul.f32 -1.442695, %v3183_v44 }
 0x62d   :  { %5948 = vpow2.f32 %v4398_v32 }
 0x62e   :  { %5950 = vpow2.f32 %v4400_v51  ;;  %v7382_v48 = vadd.f32 %v2983_v54, %v2981_v4 }
 0x62f   :  { %v5943_v41 = vpop.eup %5942  ;;  %5952 = vrcp.f32 %v2975_v26 }
 0x630   :  { %v2988_v30 = vmul.f32 %v5943_v41, %v5941_v33  ;;  %5954 = vtanh.f32 %v7382_v48 }
 0x631   :  { %5956 = vpow2.f32 %v4401_v9 }
 0x632   :  { %3329 = vmatmul.mubr.f32.vlgmr.msra.gmra.mrb[48].mxu0 %v2988_v30  ;;  %3406 = vmatmul.mubr.f32.vlgmr.msra.gmra.mrb[48].mxu1 %v2988_v30  ;;  %5958 = vtanh.f32 %v3178_v0 }
 0x633   :  { %v5945_v14 = vpop.eup %5944  ;;  %5406 = vmatpush1.bf16.msra.mxu0 %v6450_v60  ;;  %5438 = vmatpush1.bf16.msra.mxu1 %v6503_v31 }
 0x634   :  { %v5947_v42 = vpop.eup %5946  ;;  %v3190_v51 = vadd.f32 1.0, %v5945_v14  ;;  %3334 = vmatprep.mubr.f32.mxu0 %v7718_v19  ;;  %3411 = vmatprep.mubr.f32.mxu1 %v7718_v19 }
 0x635   :  { %v3202_v41 = vadd.f32 1.0, %v5947_v42  ;;  %5408 = vmatprep.subr.bf16.mxu0 %v6453_v61  ;;  %5440 = vmatprep.subr.bf16.mxu1 %v6509_v36 }
 0x636   :  { %5960 = vrcp.f32 %v3190_v51 }
 0x637   :  { %v5949_v8 = vpop.eup %5948  ;;  %5962 = vrcp.f32 %v3202_v41  ;;  %5410 = vmatpush1.bf16.msra.mxu0 %v6488_v20  ;;  %5442 = vmatpush1.bf16.msra.mxu1 %v6541_v57 }
 0x638   :  { %v5951_v9 = vpop.eup %5950  ;;  %v3191_v43 = vadd.f32 1.0, %v5949_v8  ;;  %5964 = vpow2.f32 %v4402_v17  ;;  %5412 = vmatprep.subr.bf16.mxu0 %v6491_v21  ;;  %5444 = vmatprep.subr.bf16.mxu1 %v6548_v63  ;;  %v7880_v8 = vld [vmem:[#allocation8_spill] sm:$0xff] }
 0x639   :  { %v5953_v6 = vpop.eup %5952  ;;  %5966 = vtanh.f32 %v3182_v45  ;;  %v3203_v37 = vadd.f32 1.0, %v5951_v9  ;;  %v7881_v9 = vld [vmem:[#allocation12_spill] sm:$0xff] }
 0x63a   :  { %v5955_v15 = vpop.eup %5954  ;;  %5968 = vrcp.f32 %v3191_v43  ;;  %v7882_v43 = vld [vmem:[#allocation9_spill] sm:$0xff] }
 0x63b   :  { %5970 = vrcp.f32 %v3203_v37  ;;  %v2989_v24 = vmul.f32 %v5955_v15, %v5953_v6  ;;  %5414 = vmatpush1.bf16.msra.mxu0 %v6525_v47  ;;  %5446 = vmatpush1.bf16.msra.mxu1 %v6580_v29  ;;  %v5957_v50 = vpop.eup %5956  ;;  %v7883_v6 = vld [vmem:[#allocation15_spill] sm:$0xff]  ;;  %v7885_v37 = vld [vmem:[#allocation16_spill] sm:$0xff] }
 0x63c   :  { %5416 = vmatprep.subr.bf16.mxu0 %v6529_v49  ;;  %5448 = vmatprep.subr.bf16.mxu1 %v6586_v38  ;;  %v5959_v18 = vpop.eup %5958  ;;  %v3216_v26 = vadd.f32 1.0, %v5957_v50  ;;  %v7886_v15 = vld [vmem:[#allocation11_spill] sm:$0xff]  ;;  %v7889_v50 = vld [vmem:[#allocation20_spill] sm:$0xff] }
 0x63d   :  { %v4530_v35 = vpack.c.bf16 %v2989_v24, %v2988_v30  ;;  %3335 = vmatmul.mubr.f32.gmra.mrb[50].mxu0 %v2989_v24  ;;  %3412 = vmatmul.mubr.f32.gmra.mrb[50].mxu1 %v2989_v24  ;;  %v7887_v24 = vld [vmem:[#allocation18_spill] sm:$0xff] }
 0x63e   :  { %3570 = vmatprep.mubr.f32.mxu0 %v7718_v19  ;;  %3647 = vmatprep.mubr.f32.mxu1 %v7718_v19  ;;  %5972 = vrcp.f32 %v3216_v26  ;;  %v7894_v26 = vld [vmem:[#allocation19_spill] sm:$0xff] }
 0x63f   :  { %4566 = vst [vmem:[%s7591_s4 + $0x28] sm:$0xff] %v4530_v35   ;;  %5418 = vmatpush1.bf16.msra.mxu0 %v7720_v46  ;;  %5450 = vmatpush1.bf16.msra.mxu1 %v6617_v5  ;;  %v7888_v35 = vld [vmem:[#allocation13_spill] sm:$0xff] }
 0x640   :  { %v5961_v52 = vpop.eup %5960  ;;  %5420 = vmatprep.subr.bf16.mxu0 %v7722_v1  ;;  %5452 = vmatprep.subr.bf16.mxu1 %v7721_v56 }
 0x641   :  { %v5963_v11 = vpop.eup %5962  ;;  %v3224_v54 = vmul.f32 %v5961_v52, %v5959_v18  ;;  %v7890_v18 = vld [vmem:[#allocation14_spill] sm:$0xff]  ;;  %v7891_v52 = vld [vmem:[#allocation21_spill] sm:$0xff] }
 0x642   :  { %v5965_v32 = vpop.eup %5964  ;;  %v3222_v4 = vmul.f32 %v5963_v11, %v7293_v58  ;;  %v7892_v11 = vld [vmem:[#allocation17_spill] sm:$0xff] }
 0x643   :  { %v5967_v62 = vpop.eup %5966  ;;  %5422 = vmatpush1.bf16.msra.mxu0 %v7723_v34  ;;  %5454 = vmatpush1.bf16.msra.mxu1 %v6653_v59  ;;  %v3217_v25 = vadd.f32 1.0, %v5965_v32  ;;  %v7895_v32 = vld [vmem:[#allocation25_spill] sm:$0xff] }
 0x644   :  { %v5969_v33 = vpop.eup %5968  ;;  %v7411_v44 = vadd.f32 %v3224_v54, %v3222_v4  ;;  %5424 = vmatprep.subr.bf16.mxu0 %v7724_v53  ;;  %5456 = vmatprep.subr.bf16.mxu1 %v6659_v2  ;;  %v7893_v54 = vld [vmem:[#allocation24_spill] sm:$0xff]  ;;  %v7896_v4 = vld [vmem:[#allocation22_spill] sm:$0xff] }
 0x645   :  { %v5971_v30 = vpop.eup %5970  ;;  %v3225_v0 = vmul.f32 %v5969_v33, %v5967_v62  ;;  %v7897_v62 = vld [vmem:[#allocation28_spill] sm:$0xff]  ;;  %v7898_v33 = vld [vmem:[#allocation23_spill] sm:$0xff] }
 0x646   :  { %5974 = vtanh.f32 %v7411_v44  ;;  %v3223_v58 = vmul.f32 %v5971_v30, %v7303_v55  ;;  %v7899_v30 = vld [vmem:[#allocation29_spill] sm:$0xff] }
 0x647   :  { %5426 = vmatpush1.bf16.msra.mxu0 %v6638_v40  ;;  %5458 = vmatpush1.bf16.msra.mxu1 %v6686_v13  ;;  %5976 = vrcp.f32 %v3217_v25  ;;  %v7901_v25 = vld [vmem:[#allocation32_spill] sm:$0xff] }
 0x648   :  { %5428 = vmatprep.subr.bf16.mxu0 %v7725_v10  ;;  %5460 = vmatprep.subr.bf16.mxu1 %v6689_v7  ;;  %v7421_v14 = vadd.f32 %v3225_v0, %v3223_v58  ;;  %v5973_v55 = vpop.eup %5972  ;;  %v7900_v0 = vld [vmem:[#allocation26_spill] sm:$0xff]  ;;  %v7902_v58 = vld [vmem:[#allocation27_spill] sm:$0xff] }
 0x64a   :  { %5978 = vtanh.f32 %v7421_v14 }
 0x64b   :  { %5430 = vmatpush1.bf16.msra.mxu0 %v7726_v27  ;;  %5462 = vmatpush1.bf16.msra.mxu1 %v6708_v23 }
 0x64c   :  { %5432 = vmatprep.subr.bf16.mxu0 %v6677_v39  ;;  %5464 = vmatprep.subr.bf16.mxu1 %v6711_v28 }
 0x64f   :  { %5434 = vmatpush1.bf16.msra.mxu0 %v6704_v12  ;;  %5466 = vmatpush1.bf16.msra.mxu1 %v6721_v16 }
 0x650   :  { %v5975_v42 = vpop.eup %5974  ;;  %5468 = vmatprep.subr.bf16.mxu0 %v6148_v3  ;;  %5500 = vmatprep.subr.bf16.mxu1 %v6202_v22  ;;  %v7884_v22 = vld [vmem:[#allocation10_spill] sm:$0xff] }
 0x651   :  { %v3230_v51 = vmul.f32 %v5975_v42, %v5973_v55  ;;  %v5977_v17 = vpop.eup %5976  ;;  %v7903_v55 = vld [vmem:[#allocation33_spill] sm:$0xff]  ;;  %v7904_v42 = vld [vmem:[#allocation30_spill] sm:$0xff] }
 0x653   :  { %3571 = vmatmul.mubr.f32.vlgmr.msra.gmra.mrb[52].mxu0 %v3230_v51  ;;  %3648 = vmatmul.mubr.f32.vlgmr.msra.gmra.mrb[52].mxu1 %v3230_v51 }
 0x654   :  { %v5979_v41 = vpop.eup %5978  ;;  %3576 = vmatprep.mubr.f32.mxu0 %v7718_v19  ;;  %3653 = vmatprep.mubr.f32.mxu1 %v7718_v19 }
 0x655   :  { %v3231_v45 = vmul.f32 %v5979_v41, %v5977_v17  ;;  %5470 = vmatpush1.bf16.msra.mxu0 %v7880_v8  ;;  %5502 = vmatpush1.bf16.msra.mxu1 %v7881_v9  ;;  %v7906_v17 = vld [vmem:[#allocation31_spill] sm:$0xff]  ;;  %v7907_v41 = vld [vmem:[#allocation37_spill] sm:$0xff]  ;;  %v7909_v8 = vld [vmem:[#allocation38_spill] sm:$0xff] }
 0x656   :  { %5472 = vmatprep.subr.bf16.mxu0 %v7882_v43  ;;  %5504 = vmatprep.subr.bf16.mxu1 %v7883_v6  ;;  %v7910_v9 = vld [vmem:[#allocation35_spill] sm:$0xff]  ;;  %v73_v6 = vld [vmem:[%s7587_s0 + $0x180] sm:$0xff] }
 0x657   :  { %v4535_v3 = vpack.c.bf16 %v3231_v45, %v3230_v51  ;;  %3577 = vmatmul.mubr.f32.gmra.mrb[54].mxu0 %v3231_v45  ;;  %3654 = vmatmul.mubr.f32.gmra.mrb[54].mxu1 %v3231_v45  ;;  %v7905_v51 = vld [vmem:[#allocation36_spill] sm:$0xff]  ;;  %v7908_v45 = vld [vmem:[#allocation34_spill] sm:$0xff]  ;;  %v7911_v43 = vld [vmem:[#allocation39_spill] sm:$0xff] }
 0x658   :  { %3812 = vmatprep.mubr.f32.mxu0 %v7718_v19  ;;  %3889 = vmatprep.mubr.f32.mxu1 %v7718_v19 }
 0x659   :  { %4567 = vst [vmem:[%s7592_s5 + $0x10] sm:$0xff] %v4535_v3   ;;  %5474 = vmatpush1.bf16.msra.mxu0 %v7884_v22  ;;  %5506 = vmatpush1.bf16.msra.mxu1 %v7885_v37  ;;  %v3252_v3 = vunpack.c.l.bf16 %v73_v6  ;;  %v3253_v22 = vunpack.c.h.bf16 %v73_v6 }
 0x65a   :  { %5476 = vmatprep.subr.bf16.mxu0 %v7886_v15  ;;  %5508 = vmatprep.subr.bf16.mxu1 %v7887_v24  ;;  %v75_v15 = vld [vmem:[%s7587_s0 + $0x188] sm:$0xff] }
 0x65d   :  { %5478 = vmatpush1.bf16.msra.mxu0 %v7888_v35  ;;  %5510 = vmatpush1.bf16.msra.mxu1 %v7889_v50 }
 0x65e   :  { %5480 = vmatprep.subr.bf16.mxu0 %v7890_v18  ;;  %5512 = vmatprep.subr.bf16.mxu1 %v7891_v52 }
 0x661   :  { %5482 = vmatpush1.bf16.msra.mxu0 %v7892_v11  ;;  %5514 = vmatpush1.bf16.msra.mxu1 %v7893_v54  ;;  %v3255_v54 = vunpack.c.h.bf16 %v75_v15 }
 0x662   :  { %5484 = vmatprep.subr.bf16.mxu0 %v7894_v26  ;;  %5516 = vmatprep.subr.bf16.mxu1 %v7895_v32  ;;  %v77_v32 = vld [vmem:[%s7587_s0 + $0x1a0] sm:$0xff] }
 0x665   :  { %5486 = vmatpush1.bf16.msra.mxu0 %v7896_v4  ;;  %5518 = vmatpush1.bf16.msra.mxu1 %v7897_v62  ;;  %v3254_v4 = vunpack.c.l.bf16 %v75_v15 }
 0x666   :  { %5488 = vmatprep.subr.bf16.mxu0 %v7898_v33  ;;  %5520 = vmatprep.subr.bf16.mxu1 %v7899_v30  ;;  %v3256_v33 = vunpack.c.l.bf16 %v77_v32  ;;  %v3257_v30 = vunpack.c.h.bf16 %v77_v32  ;;  %v4261_v32 = vld [vmem:[%s7588_s1 + $0x50] sm:$0xff] }
 0x669   :  { %5490 = vmatpush1.bf16.msra.mxu0 %v7900_v0  ;;  %5522 = vmatpush1.bf16.msra.mxu1 %v7901_v25 }
 0x66a   :  { %5492 = vmatprep.subr.bf16.mxu0 %v7902_v58  ;;  %5524 = vmatprep.subr.bf16.mxu1 %v7903_v55 }
 0x66d   :  { %5494 = vmatpush1.bf16.msra.mxu0 %v7904_v42  ;;  %5526 = vmatpush1.bf16.msra.mxu1 %v7905_v51  ;;  %v79_v51 = vld [vmem:[%s7587_s0 + $0x1a8] sm:$0xff] }
 0x66e   :  { %5496 = vmatprep.subr.bf16.mxu0 %v7906_v17  ;;  %5528 = vmatprep.subr.bf16.mxu1 %v7907_v41  ;;  %v3259_v6 = vunpack.c.h.bf16 %v79_v51 }
 0x671   :  { %5498 = vmatpush1.bf16.msra.mxu0 %v7908_v45  ;;  %5530 = vmatpush1.bf16.msra.mxu1 %v7909_v8 }
 0x672   :  { %5532 = vmatprep.subr.bf16.mxu0 %v7910_v9  ;;  %5564 = vmatprep.subr.bf16.mxu1 %v7911_v43 }
 0x705   :  { %v3330_v37 = vpop.f32.mrb[48].mxu0  ;;  %v3407_v24 = vpop.f32.mrb[48].mxu1 }
 0x706   :  { %v3418_v35 = vadd.f32 %v3330_v37, %v3252_v3  ;;  %v3332_v50 = vpop.f32.mrb[49].mxu0  ;;  %v3409_v18 = vpop.f32.mrb[49].mxu1  ;;  %v3420_v0 = vadd.f32 %v3407_v24, %v3254_v4  ;;  %v3258_v24 = vunpack.c.l.bf16 %v79_v51  ;;  %v4263_v51 = vld [vmem:[%s7588_s1 + $0x70] sm:$0xff] }
 0x707   :  { %v3419_v52 = vadd.f32 %v3332_v50, %v3253_v22  ;;  %v3421_v62 = vadd.f32 %v3409_v18, %v3255_v54 }
 0x708   :  { %v4407_v11 = vmul.f32 -1.442695, %v3418_v35 }
 0x709   :  { %v4409_v26 = vmul.f32 -1.442695, %v3419_v52  ;;  %v4411_v25 = vmul.f32 -1.442695, %v3421_v62 }
 0x70a   :  { %5980 = vpow2.f32 %v4407_v11 }
 0x70b   :  { %5982 = vpow2.f32 %v4409_v26 }
 0x70c   :  { %5984 = vtanh.f32 %v3420_v0 }
 0x70d   :  { %5986 = vpow2.f32 %v4411_v25  ;;  %v7912_v25 = vld [vmem:[#allocation43_spill] sm:$0xff] }
 0x710   :  { %v3336_v58 = vpop.f32.mrb[50].mxu0  ;;  %v3413_v55 = vpop.f32.mrb[50].mxu1 }
 0x711   :  { %v3422_v42 = vadd.f32 %v3336_v58, %v3256_v33  ;;  %v3338_v17 = vpop.f32.mrb[51].mxu0  ;;  %v3415_v41 = vpop.f32.mrb[51].mxu1  ;;  %v3424_v18 = vadd.f32 %v3413_v55, %v3258_v24  ;;  %v3494_v55 = vunpack.c.l.bf16 %v4261_v32 }
 0x712   :  { %v3423_v45 = vadd.f32 %v3338_v17, %v3257_v30  ;;  %v3425_v15 = vadd.f32 %v3415_v41, %v3259_v6 }
 0x713   :  { %v4408_v8 = vmul.f32 -1.442695, %v3422_v42  ;;  %v3495_v42 = vunpack.c.h.bf16 %v4261_v32 }
 0x714   :  { %v5981_v9 = vpop.eup %5980  ;;  %v4410_v43 = vmul.f32 -1.442695, %v3423_v45  ;;  %v4412_v35 = vmul.f32 -1.442695, %v3425_v15 }
 0x715   :  { %v5983_v3 = vpop.eup %5982  ;;  %v3432_v22 = vadd.f32 1.0, %v5981_v9  ;;  %5988 = vpow2.f32 %v4408_v8  ;;  %v4262_v9 = vld [vmem:[%s7588_s1 + $0x58] sm:$0xff] }
 0x716   :  { %v3444_v37 = vadd.f32 1.0, %v5983_v3  ;;  %5990 = vpow2.f32 %v4410_v43  ;;  %v5985_v50 = vpop.eup %5984  ;;  %v3498_v3 = vunpack.c.l.bf16 %v4263_v51 }
 0x717   :  { %5992 = vrcp.f32 %v3432_v22  ;;  %v5987_v52 = vpop.eup %5986 }
 0x718   :  { %5994 = vrcp.f32 %v3444_v37  ;;  %v3458_v0 = vadd.f32 1.0, %v5987_v52  ;;  %v3499_v37 = vunpack.c.h.bf16 %v4263_v51 }
 0x719   :  { %5996 = vpow2.f32 %v4412_v35 }
 0x71a   :  { %5998 = vtanh.f32 %v3424_v18 }
 0x71f   :  { %v5989_v11 = vpop.eup %5988 }
 0x720   :  { %v5991_v54 = vpop.eup %5990  ;;  %v3433_v26 = vadd.f32 1.0, %v5989_v11 }
 0x721   :  { %v5993_v4 = vpop.eup %5992  ;;  %v3445_v62 = vadd.f32 1.0, %v5991_v54 }
 0x722   :  { %v5995_v33 = vpop.eup %5994  ;;  %v3466_v30 = vmul.f32 %v5993_v4, %v5985_v50  ;;  %6000 = vrcp.f32 %v3433_v26  ;;  %v3497_v50 = vunpack.c.h.bf16 %v4262_v9  ;;  %v4264_v26 = vld [vmem:[%s7588_s1 + $0x78] sm:$0xff] }
 0x723   :  { %v3464_v58 = vmul.f32 %v5995_v33, %v7912_v25  ;;  %6002 = vrcp.f32 %v3445_v62  ;;  %v5997_v24 = vpop.eup %5996 }
 0x724   :  { %6004 = vrcp.f32 %v3458_v0  ;;  %v5999_v11 = vpop.eup %5998  ;;  %v3459_v25 = vadd.f32 1.0, %v5997_v24 }
 0x725   :  { %v7490_v17 = vadd.f32 %v3466_v30, %v3464_v58 }
 0x726   :  { %v3572_v41 = vpop.f32.mrb[52].mxu0  ;;  %v3649_v45 = vpop.f32.mrb[52].mxu1 }
 0x727   :  { %6006 = vtanh.f32 %v7490_v17  ;;  %v3660_v8 = vadd.f32 %v3572_v41, %v3494_v55  ;;  %v3574_v43 = vpop.f32.mrb[53].mxu0  ;;  %v3651_v6 = vpop.f32.mrb[53].mxu1  ;;  %v3501_v41 = vunpack.c.h.bf16 %v4264_v26 }
 0x728   :  { %v3661_v22 = vadd.f32 %v3574_v43, %v3495_v42  ;;  %v3663_v42 = vadd.f32 %v3651_v6, %v3497_v50 }
 0x729   :  { %v4417_v15 = vmul.f32 -1.442695, %v3660_v8  ;;  %v3496_v8 = vunpack.c.l.bf16 %v4262_v9 }
 0x72a   :  { %v4419_v35 = vmul.f32 -1.442695, %v3661_v22  ;;  %v3578_v18 = vpop.f32.mrb[54].mxu0  ;;  %v3655_v52 = vpop.f32.mrb[54].mxu1 }
 0x72b   :  { %6008 = vpow2.f32 %v4417_v15  ;;  %v3664_v54 = vadd.f32 %v3578_v18, %v3498_v3  ;;  %v3580_v32 = vpop.f32.mrb[55].mxu0  ;;  %v3657_v4 = vpop.f32.mrb[55].mxu1  ;;  %v4421_v15 = vmul.f32 -1.442695, %v3663_v42  ;;  %v3662_v24 = vadd.f32 %v3649_v45, %v3496_v8 }
 0x72c   :  { %v6001_v62 = vpop.eup %6000  ;;  %6010 = vpow2.f32 %v4419_v35  ;;  %v3665_v33 = vadd.f32 %v3580_v32, %v3499_v37  ;;  %v3667_v35 = vadd.f32 %v3657_v4, %v3501_v41  ;;  %v3500_v18 = vunpack.c.l.bf16 %v4264_v26 }
 0x72d   :  { %v6003_v30 = vpop.eup %6002  ;;  %v3467_v0 = vmul.f32 %v6001_v62, %v5999_v11  ;;  %v4418_v58 = vmul.f32 -1.442695, %v3664_v54 }
 0x72e   :  { %v3465_v55 = vmul.f32 %v6003_v30, %v7382_v48  ;;  %v4420_v51 = vmul.f32 -1.442695, %v3665_v33  ;;  %v6005_v43 = vpop.eup %6004  ;;  %v4422_v50 = vmul.f32 -1.442695, %v3667_v35  ;;  %v3666_v54 = vadd.f32 %v3655_v52, %v3500_v18 }
 0x72f   :  { %6012 = vpow2.f32 %v4418_v58 }
 0x730   :  { %6014 = vpow2.f32 %v4420_v51  ;;  %v7500_v3 = vadd.f32 %v3467_v0, %v3465_v55  ;;  %v85_v55 = vld [vmem:[%s7587_s0 + $0x1e0] sm:$0xff] }
 0x731   :  { %v6007_v22 = vpop.eup %6006  ;;  %6016 = vrcp.f32 %v3459_v25  ;;  %v3740_v41 = vunpack.c.l.bf16 %v85_v55  ;;  %v3741_v8 = vunpack.c.h.bf16 %v85_v55 }
 0x732   :  { %v3472_v37 = vmul.f32 %v6007_v22, %v6005_v43  ;;  %6018 = vtanh.f32 %v7500_v3 }
 0x733   :  { %6020 = vpow2.f32 %v4421_v15 }
 0x734   :  { %3813 = vmatmul.mubr.f32.vlgmr.msra.gmra.mrb[56].mxu0 %v3472_v37  ;;  %3890 = vmatmul.mubr.f32.vlgmr.msra.gmra.mrb[56].mxu1 %v3472_v37  ;;  %6022 = vtanh.f32 %v3662_v24  ;;  %v87_v24 = vld [vmem:[%s7587_s0 + $0x1e8] sm:$0xff] }
 0x735   :  { %v6009_v48 = vpop.eup %6008  ;;  %5534 = vmatpush1.bf16.msra.mxu0 %v6450_v60  ;;  %5566 = vmatpush1.bf16.msra.mxu1 %v6503_v31 }
 0x736   :  { %v6011_v9 = vpop.eup %6010  ;;  %v3674_v6 = vadd.f32 1.0, %v6009_v48  ;;  %3818 = vmatprep.mubr.f32.mxu0 %v7718_v19  ;;  %3895 = vmatprep.mubr.f32.mxu1 %v7718_v19 }
 0x737   :  { %v3686_v11 = vadd.f32 1.0, %v6011_v9  ;;  %5536 = vmatprep.subr.bf16.mxu0 %v6453_v61  ;;  %5568 = vmatprep.subr.bf16.mxu1 %v6509_v36 }
 0x738   :  { %6024 = vrcp.f32 %v3674_v6 }
 0x739   :  { %v6013_v45 = vpop.eup %6012  ;;  %6026 = vrcp.f32 %v3686_v11  ;;  %5538 = vmatpush1.bf16.msra.mxu0 %v6488_v20  ;;  %5570 = vmatpush1.bf16.msra.mxu1 %v6541_v57 }
 0x73a   :  { %v6015_v60 = vpop.eup %6014  ;;  %v3675_v31 = vadd.f32 1.0, %v6013_v45  ;;  %6028 = vpow2.f32 %v4422_v50  ;;  %5540 = vmatprep.subr.bf16.mxu0 %v6491_v21  ;;  %5572 = vmatprep.subr.bf16.mxu1 %v6548_v63 }
 0x73b   :  { %v6017_v26 = vpop.eup %6016  ;;  %6030 = vtanh.f32 %v3666_v54  ;;  %v3687_v52 = vadd.f32 1.0, %v6015_v60  ;;  %v3743_v54 = vunpack.c.h.bf16 %v87_v24 }
 0x73c   :  { %v6019_v61 = vpop.eup %6018  ;;  %6032 = vrcp.f32 %v3675_v31 }
 0x73d   :  { %6034 = vrcp.f32 %v3687_v52  ;;  %v3473_v36 = vmul.f32 %v6019_v61, %v6017_v26  ;;  %5542 = vmatpush1.bf16.msra.mxu0 %v6525_v47  ;;  %5574 = vmatpush1.bf16.msra.mxu1 %v6580_v29  ;;  %v6021_v21 = vpop.eup %6020  ;;  %v3742_v52 = vunpack.c.l.bf16 %v87_v24 }
 0x73e   :  { %5544 = vmatprep.subr.bf16.mxu0 %v6529_v49  ;;  %5576 = vmatprep.subr.bf16.mxu1 %v6586_v38  ;;  %v6023_v57 = vpop.eup %6022  ;;  %v3700_v29 = vadd.f32 1.0, %v6021_v21 }
 0x73f   :  { %v4540_v20 = vpack.c.bf16 %v3473_v36, %v3472_v37  ;;  %3819 = vmatmul.mubr.f32.gmra.mrb[58].mxu0 %v3473_v36  ;;  %3896 = vmatmul.mubr.f32.gmra.mrb[58].mxu1 %v3473_v36 }
 0x740   :  { %4053 = vmatprep.mubr.f32.mxu0 %v7718_v19  ;;  %4130 = vmatprep.mubr.f32.mxu1 %v7718_v19  ;;  %6036 = vrcp.f32 %v3700_v29 }
 0x741   :  { %4568 = vst [vmem:[%s7591_s4 + $0x30] sm:$0xff] %v4540_v20   ;;  %5546 = vmatpush1.bf16.msra.mxu0 %v7720_v46  ;;  %5578 = vmatpush1.bf16.msra.mxu1 %v6617_v5 }
 0x742   :  { %v6025_v47 = vpop.eup %6024  ;;  %5548 = vmatprep.subr.bf16.mxu0 %v7722_v1  ;;  %5580 = vmatprep.subr.bf16.mxu1 %v7721_v56 }
 0x743   :  { %v6027_v49 = vpop.eup %6026  ;;  %v3708_v63 = vmul.f32 %v6025_v47, %v6023_v57 }
 0x744   :  { %v6029_v38 = vpop.eup %6028  ;;  %v3706_v32 = vmul.f32 %v6027_v49, %v7411_v44 }
 0x745   :  { %v6031_v4 = vpop.eup %6030  ;;  %5550 = vmatpush1.bf16.msra.mxu0 %v7723_v34  ;;  %5582 = vmatpush1.bf16.msra.mxu1 %v6653_v59  ;;  %v3701_v1 = vadd.f32 1.0, %v6029_v38 }
 0x746   :  { %v6033_v62 = vpop.eup %6032  ;;  %v7529_v46 = vadd.f32 %v3708_v63, %v3706_v32  ;;  %5552 = vmatprep.subr.bf16.mxu0 %v7724_v53  ;;  %5584 = vmatprep.subr.bf16.mxu1 %v6659_v2  ;;  %v4257_v63 = vld [vmem:[%s7588_s1 + $0x10] sm:$0xff] }
 0x747   :  { %v6035_v5 = vpop.eup %6034  ;;  %v3709_v56 = vmul.f32 %v6033_v62, %v6031_v4 }
 0x748   :  { %6038 = vtanh.f32 %v7529_v46  ;;  %v3707_v44 = vmul.f32 %v6035_v5, %v7421_v14 }
 0x749   :  { %5554 = vmatpush1.bf16.msra.mxu0 %v6638_v40  ;;  %5586 = vmatpush1.bf16.msra.mxu1 %v6686_v13  ;;  %6040 = vrcp.f32 %v3701_v1  ;;  %v3978_v1 = vunpack.c.h.bf16 %v4257_v63 }
 0x74a   :  { %5556 = vmatprep.subr.bf16.mxu0 %v7725_v10  ;;  %5588 = vmatprep.subr.bf16.mxu1 %v6689_v7  ;;  %v7539_v59 = vadd.f32 %v3709_v56, %v3707_v44  ;;  %v6037_v40 = vpop.eup %6036  ;;  %v83_v10 = vld [vmem:[%s7587_s0 + $0x1c8] sm:$0xff]  ;;  %v3977_v56 = vunpack.c.l.bf16 %v4257_v63  ;;  %v4259_v44 = vld [vmem:[%s7588_s1 + $0x30] sm:$0xff] }
 0x74b   :  { %v3739_v25 = vunpack.c.h.bf16 %v83_v10  ;;  %v3738_v42 = vunpack.c.l.bf16 %v83_v10 }
 0x74c   :  { %6042 = vtanh.f32 %v7539_v59 }
 0x74d   :  { %5558 = vmatpush1.bf16.msra.mxu0 %v7726_v27  ;;  %5590 = vmatpush1.bf16.msra.mxu1 %v6708_v23 }
 0x74e   :  { %5560 = vmatprep.subr.bf16.mxu0 %v6677_v39  ;;  %5592 = vmatprep.subr.bf16.mxu1 %v6711_v28  ;;  %v81_v39 = vld [vmem:[%s7587_s0 + $0x1c0] sm:$0xff] }
 0x74f   :  { %v3737_v28 = vunpack.c.h.bf16 %v81_v39 }
 0x751   :  { %5562 = vmatpush1.bf16.msra.mxu0 %v6704_v12  ;;  %5594 = vmatpush1.bf16.msra.mxu1 %v6721_v16  ;;  %v3736_v12 = vunpack.c.l.bf16 %v81_v39 }
 0x752   :  { %v6039_v13 = vpop.eup %6038 }
 0x753   :  { %v3714_v2 = vmul.f32 %v6039_v13, %v6037_v40  ;;  %v6041_v7 = vpop.eup %6040 }
 0x755   :  { %4054 = vmatmul.mubr.f32.vlgmr.msra.gmra.mrb[60].mxu0 %v3714_v2  ;;  %4131 = vmatmul.mubr.f32.vlgmr.msra.gmra.mrb[60].mxu1 %v3714_v2 }
 0x756   :  { %v6043_v34 = vpop.eup %6042  ;;  %4059 = vmatprep.mubr.f32.mxu0 %v7718_v19  ;;  %4136 = vmatprep.mubr.f32.mxu1 %v7718_v19 }
 0x757   :  { %v3715_v23 = vmul.f32 %v6043_v34, %v6041_v7  ;;  %v4258_v34 = vld [vmem:[%s7588_s1 + $0x18] sm:$0xff] }
 0x758   :  { %v3979_v24 = vunpack.c.l.bf16 %v4258_v34 }
 0x759   :  { %v4545_v53 = vpack.c.bf16 %v3715_v23, %v3714_v2  ;;  %4060 = vmatmul.mubr.f32.gmra.mrb[62].mxu0 %v3715_v23  ;;  %4137 = vmatmul.mubr.f32.gmra.mrb[62].mxu1 %v3715_v23 }
 0x75b   :  { %4569 = vst [vmem:[%s7592_s5 + $0x8] sm:$0xff] %v4545_v53  }
 0x807   :  { %v3814_v16 = vpop.f32.mrb[56].mxu0  ;;  %v3891_v19 = vpop.f32.mrb[56].mxu1 }
 0x808   :  { %v3902_v27 = vadd.f32 %v3814_v16, %v3736_v12  ;;  %v3816_v14 = vpop.f32.mrb[57].mxu0  ;;  %v3893_v33 = vpop.f32.mrb[57].mxu1  ;;  %v3904_v43 = vadd.f32 %v3891_v19, %v3738_v42  ;;  %v3982_v12 = vunpack.c.h.bf16 %v4259_v44  ;;  %v3980_v19 = vunpack.c.h.bf16 %v4258_v34 }
 0x809   :  { %v3903_v30 = vadd.f32 %v3816_v14, %v3737_v28  ;;  %v3905_v51 = vadd.f32 %v3893_v33, %v3739_v25 }
 0x80a   :  { %v4427_v0 = vmul.f32 -1.442695, %v3902_v27 }
 0x80b   :  { %v4429_v58 = vmul.f32 -1.442695, %v3903_v30  ;;  %v4431_v22 = vmul.f32 -1.442695, %v3905_v51 }
 0x80c   :  { %6044 = vpow2.f32 %v4427_v0  ;;  %v4260_v0 = vld [vmem:[%s7588_s1 + $0x38] sm:$0xff] }
 0x80d   :  { %6046 = vpow2.f32 %v4429_v58 }
 0x80e   :  { %6048 = vtanh.f32 %v3904_v43 }
 0x80f   :  { %6050 = vpow2.f32 %v4431_v22 }
 0x812   :  { %v3820_v15 = vpop.f32.mrb[58].mxu0  ;;  %v3897_v35 = vpop.f32.mrb[58].mxu1 }
 0x813   :  { %v3906_v37 = vadd.f32 %v3820_v15, %v3740_v41  ;;  %v3822_v18 = vpop.f32.mrb[59].mxu0  ;;  %v3899_v48 = vpop.f32.mrb[59].mxu1  ;;  %v3908_v20 = vadd.f32 %v3897_v35, %v3742_v52 }
 0x814   :  { %v3907_v9 = vadd.f32 %v3822_v18, %v3741_v8  ;;  %v3909_v26 = vadd.f32 %v3899_v48, %v3743_v54 }
 0x815   :  { %v4428_v6 = vmul.f32 -1.442695, %v3906_v37  ;;  %v3984_v37 = vunpack.c.h.bf16 %v4260_v0 }
 0x816   :  { %v6045_v50 = vpop.eup %6044  ;;  %v4430_v11 = vmul.f32 -1.442695, %v3907_v9  ;;  %v4432_v61 = vmul.f32 -1.442695, %v3909_v26 }
 0x817   :  { %v6047_v45 = vpop.eup %6046  ;;  %v3916_v60 = vadd.f32 1.0, %v6045_v50  ;;  %6052 = vpow2.f32 %v4428_v6 }
 0x818   :  { %v3928_v31 = vadd.f32 1.0, %v6047_v45  ;;  %6054 = vpow2.f32 %v4430_v11  ;;  %v6049_v36 = vpop.eup %6048  ;;  %v3983_v45 = vunpack.c.l.bf16 %v4260_v0 }
 0x819   :  { %6056 = vrcp.f32 %v3916_v60  ;;  %v6051_v21 = vpop.eup %6050 }
 0x81a   :  { %6058 = vrcp.f32 %v3928_v31  ;;  %v3942_v62 = vadd.f32 1.0, %v6051_v21 }
 0x81b   :  { %6060 = vpow2.f32 %v4432_v61 }
 0x81c   :  { %6062 = vtanh.f32 %v3908_v20 }
 0x821   :  { %v6053_v57 = vpop.eup %6052 }
 0x822   :  { %v6055_v47 = vpop.eup %6054  ;;  %v3917_v49 = vadd.f32 1.0, %v6053_v57 }
 0x823   :  { %v6057_v29 = vpop.eup %6056  ;;  %v3929_v38 = vadd.f32 1.0, %v6055_v47 }
 0x824   :  { %v6059_v32 = vpop.eup %6058  ;;  %v3950_v4 = vmul.f32 %v6057_v29, %v6049_v36  ;;  %6064 = vrcp.f32 %v3917_v49 }
 0x825   :  { %v3948_v5 = vmul.f32 %v6059_v32, %v7490_v17  ;;  %6066 = vrcp.f32 %v3929_v38  ;;  %v3981_v17 = vunpack.c.l.bf16 %v4259_v44  ;;  %v6061_v16 = vpop.eup %6060 }
 0x826   :  { %6068 = vrcp.f32 %v3942_v62  ;;  %v6063_v33 = vpop.eup %6062  ;;  %v3943_v8 = vadd.f32 1.0, %v6061_v16 }
 0x827   :  { %v3952_v40 = vadd.f32 %v3950_v4, %v3948_v5 }
 0x828   :  { %v4055_v13 = vpop.f32.mrb[60].mxu0  ;;  %v4132_v2 = vpop.f32.mrb[60].mxu1 }
 0x829   :  { %6070 = vtanh.f32 %v3952_v40  ;;  %v4143_v7 = vadd.f32 %v4055_v13, %v3977_v56  ;;  %v4057_v23 = vpop.f32.mrb[61].mxu0  ;;  %v4134_v53 = vpop.f32.mrb[61].mxu1  ;;  %v4145_v54 = vadd.f32 %v4132_v2, %v3979_v24 }
 0x82a   :  { %v4144_v39 = vadd.f32 %v4057_v23, %v3978_v1  ;;  %v4146_v15 = vadd.f32 %v4134_v53, %v3980_v19 }
 0x82b   :  { %v4437_v28 = vmul.f32 -1.442695, %v4143_v7 }
 0x82c   :  { %v4439_v10 = vmul.f32 -1.442695, %v4144_v39  ;;  %v4061_v27 = vpop.f32.mrb[62].mxu0  ;;  %v4138_v14 = vpop.f32.mrb[62].mxu1  ;;  %v4441_v50 = vmul.f32 -1.442695, %v4146_v15 }
 0x82d   :  { %6072 = vpow2.f32 %v4437_v28  ;;  %v4147_v30 = vadd.f32 %v4061_v27, %v3981_v17  ;;  %v4063_v25 = vpop.f32.mrb[63].mxu0  ;;  %v4140_v58 = vpop.f32.mrb[63].mxu1  ;;  %v4149_v61 = vadd.f32 %v4138_v14, %v3983_v45 }
 0x82e   :  { %v6065_v55 = vpop.eup %6064  ;;  %6074 = vpow2.f32 %v4439_v10  ;;  %v4148_v42 = vadd.f32 %v4063_v25, %v3982_v12  ;;  %v4150_v11 = vadd.f32 %v4140_v58, %v3984_v37 }
 0x82f   :  { %v6067_v51 = vpop.eup %6066  ;;  %v3951_v41 = vmul.f32 %v6065_v55, %v6063_v33  ;;  %v4438_v43 = vmul.f32 -1.442695, %v4147_v30 }
 0x830   :  { %v3949_v22 = vmul.f32 %v6067_v51, %v7500_v3  ;;  %v4440_v35 = vmul.f32 -1.442695, %v4148_v42  ;;  %v6069_v18 = vpop.eup %6068  ;;  %v4442_v3 = vmul.f32 -1.442695, %v4150_v11 }
 0x831   :  { %6076 = vpow2.f32 %v4438_v43 }
 0x832   :  { %v3953_v48 = vadd.f32 %v3951_v41, %v3949_v22  ;;  %6078 = vpow2.f32 %v4440_v35 }
 0x833   :  { %v6071_v9 = vpop.eup %6070  ;;  %6080 = vrcp.f32 %v3943_v8 }
 0x834   :  { %v3956_v6 = vmul.f32 %v6071_v9, %v6069_v18  ;;  %6082 = vtanh.f32 %v3953_v48 }
 0x835   :  { %6084 = vpow2.f32 %v4441_v50 }
 0x836   :  { %6086 = vtanh.f32 %v4145_v54 }
 0x837   :  { %v6073_v60 = vpop.eup %6072 }
 0x838   :  { %v6075_v31 = vpop.eup %6074  ;;  %v4157_v26 = vadd.f32 1.0, %v6073_v60 }
 0x839   :  { %v4169_v52 = vadd.f32 1.0, %v6075_v31 }
 0x83a   :  { %6088 = vrcp.f32 %v4157_v26 }
 0x83b   :  { %v6077_v36 = vpop.eup %6076  ;;  %6090 = vrcp.f32 %v4169_v52 }
 0x83c   :  { %v6079_v20 = vpop.eup %6078  ;;  %v4158_v21 = vadd.f32 1.0, %v6077_v36  ;;  %6092 = vpow2.f32 %v4442_v3 }
 0x83d   :  { %v6081_v57 = vpop.eup %6080  ;;  %6094 = vtanh.f32 %v4149_v61  ;;  %v4170_v47 = vadd.f32 1.0, %v6079_v20 }
 0x83e   :  { %v6083_v49 = vpop.eup %6082  ;;  %6096 = vrcp.f32 %v4158_v21 }
 0x83f   :  { %v3957_v63 = vmul.f32 %v6083_v49, %v6081_v57  ;;  %6098 = vrcp.f32 %v4170_v47  ;;  %v6085_v38 = vpop.eup %6084 }
 0x840   :  { %v6087_v32 = vpop.eup %6086  ;;  %v4183_v56 = vadd.f32 1.0, %v6085_v38 }
 0x841   :  { %v4550_v29 = vpack.c.bf16 %v3957_v63, %v3956_v6 }
 0x842   :  { %6100 = vrcp.f32 %v4183_v56 }
 0x843   :  { %4570 = vst [vmem:[%s7591_s4 + $0x38] sm:$0xff] %v4550_v29  }
 0x844   :  { %v6089_v4 = vpop.eup %6088 }
 0x845   :  { %v6091_v62 = vpop.eup %6090  ;;  %v4191_v5 = vmul.f32 %v6089_v4, %v6087_v32 }
 0x846   :  { %v6093_v1 = vpop.eup %6092  ;;  %v4189_v44 = vmul.f32 %v6091_v62, %v7529_v46 }
 0x847   :  { %v6095_v40 = vpop.eup %6094  ;;  %v4184_v23 = vadd.f32 1.0, %v6093_v1 }
 0x848   :  { %v6097_v13 = vpop.eup %6096  ;;  %v4193_v2 = vadd.f32 %v4191_v5, %v4189_v44 }
 0x849   :  { %v6099_v7 = vpop.eup %6098  ;;  %v4192_v34 = vmul.f32 %v6097_v13, %v6095_v40 }
 0x84a   :  { %6102 = vtanh.f32 %v4193_v2  ;;  %v4190_v53 = vmul.f32 %v6099_v7, %v7539_v59 }
 0x84b   :  { %6104 = vrcp.f32 %v4184_v23 }
 0x84c   :  { %v4194_v17 = vadd.f32 %v4192_v34, %v4190_v53  ;;  %v6101_v39 = vpop.eup %6100 }
 0x84e   :  { %6106 = vtanh.f32 %v4194_v17 }
 0x854   :  { %v6103_v12 = vpop.eup %6102 }
 0x855   :  { %v4197_v28 = vmul.f32 %v6103_v12, %v6101_v39  ;;  %v6105_v16 = vpop.eup %6104 }
 0x858   :  { %v6107_v10 = vpop.eup %6106 }
 0x859   :  { %v4198_v19 = vmul.f32 %v6107_v10, %v6105_v16 }
 0x85b   :  { %v4555_v46 = vpack.c.bf16 %v4198_v19, %v4197_v28 }
 0x85d   :  { %4556 = vst [vmem:[%s7592_s5] sm:$0xff] %v4555_v46  }

</bundles_post_ra>
